<compile_context>
chip_gen: v5e
topology: v5e:2x2
jax: 0.10.0
libtpu: 0.0.40
codegen_flags: <defaults>
</compile_context>

<pallas_src>
import math

import numpy as np
import jax
import jax.numpy as jnp
from jax.experimental import pallas as pl
from jax.experimental.pallas import tpu as pltpu

# ----------------------------- configuration (small) ------------------------
B = 2
SEQ_LEN = 32
PRED_LEN = 8
ENC_IN = 2                  # N, number of variates
D_MODEL = 16
N_HEADS = 4
D_FF = 32
DK = D_FF                   # d_keys passed to ReprogrammingLayer (== d_ff per module)
D_LLM = 64
PATCH_LEN = 16
STRIDE = 8
TOP_K = 5
VOCAB = 128                 # synthetic LLM vocabulary
NUM_TOKENS = 1000           # hard-coded in the module
S_PAD = 1024                # NUM_TOKENS padded to a lane multiple; padded keys masked
PROMPT_LEN = 8              # fixed synthetic prompt length (no real tokenizer)
PATCH_NUMS = (SEQ_LEN - PATCH_LEN) // STRIDE + 2      # = 4
HEAD_NF = D_FF * PATCH_NUMS                           # = 128
LLM_HEADS = 4
LLM_DH = D_LLM // LLM_HEADS                           # = 16
LLM_MLP = 128
BN = B * ENC_IN                                       # = 4
BNL = BN * PATCH_NUMS                                 # = 16
LF = PROMPT_LEN + PATCH_NUMS                          # = 12
HKD = N_HEADS * DK                                    # = 128
NROWS = BN * LF                                       # = 48
NEG = -1e30


# ---------------- precomputed PatchEmbedding index table (host constant) -----
def _patch_index_table():
    # feat[bn*PN + p, c*3 + k] = x_pad[bn, circ(p+k)*STRIDE + c]
    # where circ implements the k=3 circular pad of the TokenEmbedding conv and
    # x_pad is the series with STRIDE replication padding at the end.
    tbl = np.zeros((PATCH_NUMS, PATCH_LEN * 3), dtype=np.int32)
    for p in range(PATCH_NUMS):
        for k in range(3):
            l = p + k
            pp = PATCH_NUMS - 1 if l == 0 else (0 if l == PATCH_NUMS + 1 else l - 1)
            for c in range(PATCH_LEN):
                tbl[p, c * 3 + k] = pp * STRIDE + c
    return tbl


PATCH_IDX = jnp.asarray(_patch_index_table())


# ------------------------------- fused Pallas kernel -------------------------
def _timellm_kernel(
        feat_ref, prompt_ref, cw_ref, rqw_ref, rqb_ref, kt_ref, vsrc_ref,
        rpbias_ref, rphm_ref, rpo_w_ref, rpo_b_ref,
        ln1g_ref, ln1b_ref, aqkvw_ref, aqkvb_ref, lhm_ref, lbias_ref,
        aow_ref, aob_ref, ln2g_ref, ln2b_ref, m1w_ref, m1b_ref,
        m2w_ref, m2b_ref, lnfg_ref, lnfb_ref, hw_ref, hb_ref,
        o_ref, xbuf_ref, flat_ref):
    """Patch conv + reprogramming attention + stand-in LLM block + FlattenHead."""
    f32, bf16 = jnp.float32, jnp.bfloat16

    def ln(z, g, b):
        mu = jnp.mean(z, axis=-1, keepdims=True)
        var = jnp.mean((z - mu) ** 2, axis=-1, keepdims=True)
        return (z - mu) * jax.lax.rsqrt(var + 1e-5) * g + b

    # ---- patch TokenEmbedding conv (f32 GEMM) + query projection ------------
    enc = jnp.dot(feat_ref[...], cw_ref[...], preferred_element_type=f32)       # (BNL, d_model)
    q = jnp.dot(enc.astype(bf16), rqw_ref[...],
                preferred_element_type=f32) + rqb_ref[...]                       # (BNL, HKD)

    # ---- reprogramming attention: block-diagonal Q, one K=128 GEMM per stage -
    q_blk = (jnp.concatenate([q] * N_HEADS, axis=0) * rphm_ref[...]).astype(bf16)  # (H*BNL, HKD)
    s = (jnp.dot(q_blk, kt_ref[...], preferred_element_type=f32)
         * (1.0 / math.sqrt(DK)) + rpbias_ref[...])                             # (H*BNL, S_PAD)
    s = s - jnp.max(s, axis=-1, keepdims=True)
    p = jnp.exp(s)
    p = p / jnp.sum(p, axis=-1, keepdims=True)                                  # exact softmax
    oa = jnp.dot(p.astype(bf16), vsrc_ref[...], preferred_element_type=f32)     # (H*BNL, HKD)
    rep = (oa * rphm_ref[...]).reshape(N_HEADS, BNL, HKD).sum(axis=0)           # (BNL, HKD)
    enc_llm = (jnp.dot(rep.astype(bf16), rpo_w_ref[...], preferred_element_type=f32)
               + rpo_b_ref[...])                                                 # (BNL, d_llm)

    # ---- assemble LLM input [prompt | patches] per (batch, variate) ----------
    for bn in range(BN):
        r0 = bn * LF
        xbuf_ref[r0:r0 + PROMPT_LEN, :] = prompt_ref[bn * PROMPT_LEN:(bn + 1) * PROMPT_LEN, :]
        xbuf_ref[r0 + PROMPT_LEN:r0 + LF, :] = enc_llm[bn * PATCH_NUMS:(bn + 1) * PATCH_NUMS, :]
    x = xbuf_ref[...]                                                            # (NROWS, d_llm)

    # ---- stand-in frozen LLM transformer block (pre-LN) ----------------------
    # TODO(synk): the frozen pretrained LLaMA/GPT2/BERT backbone (+ HF checkpoint)
    # cannot be loaded; replaced by ONE deterministic pre-LN transformer block.
    h1 = ln(x, ln1g_ref[...], ln1b_ref[...])
    qkv = jnp.dot(h1.astype(bf16), aqkvw_ref[...],
                  preferred_element_type=f32) + aqkvb_ref[...]                   # (NROWS, 3*d_llm)
    ql = qkv[:, :D_LLM]
    kl = qkv[:, D_LLM:2 * D_LLM].astype(bf16)
    vl = qkv[:, 2 * D_LLM:].astype(bf16)
    # Block-diagonal Q over heads; cross-(batch,variate) attention is removed with
    # an additive block bias so all heads/batches run in one score GEMM.
    q_blk2 = (jnp.concatenate([ql] * LLM_HEADS, axis=0) * lhm_ref[...]).astype(bf16)  # (H*NROWS, d_llm)
    sc = (jax.lax.dot_general(q_blk2, kl, (((1,), (1,)), ((), ())),
                              preferred_element_type=f32)
          * (1.0 / math.sqrt(LLM_DH)) + lbias_ref[...])                          # (H*NROWS, NROWS)
    sc = sc - jnp.max(sc, axis=-1, keepdims=True)
    pr = jnp.exp(sc)
    pr = pr / jnp.sum(pr, axis=-1, keepdims=True)
    oa2 = jnp.dot(pr.astype(bf16), vl, preferred_element_type=f32)               # (H*NROWS, d_llm)
    attn = (oa2 * lhm_ref[...]).reshape(LLM_HEADS, NROWS, D_LLM).sum(axis=0)     # (NROWS, d_llm)
    x = x + jnp.dot(attn.astype(bf16), aow_ref[...],
                    preferred_element_type=f32) + aob_ref[...]

    h2 = ln(x, ln2g_ref[...], ln2b_ref[...])
    m = jax.nn.gelu(jnp.dot(h2.astype(bf16), m1w_ref[...],
                            preferred_element_type=f32) + m1b_ref[...])
    x = x + jnp.dot(m.astype(bf16), m2w_ref[...],
                    preferred_element_type=f32) + m2b_ref[...]
    dec = ln(x, lnfg_ref[...], lnfb_ref[...])                                    # (NROWS, d_llm)

    # ---- FlattenHead: gather last PATCH_NUMS rows (first d_ff feats), 1 GEMM ---
    for bn in range(BN):
        for pp in range(PATCH_NUMS):
            r = bn * LF + PROMPT_LEN + pp
            flat_ref[bn:bn + 1, pp * D_FF:(pp + 1) * D_FF] = dec[r:r + 1, :D_FF]
    o_ref[...] = (jnp.dot(flat_ref[...].astype(bf16), hw_ref[...],
                          preferred_element_type=f32)
                  + hb_ref[...]).astype(o_ref.dtype)                             # (BN, pred_len)


# ------------------------------- kernel wrapper -------------------------------
def timellm_call(feat, prompt2d, p):
    return pl.pallas_call(
        _timellm_kernel,
        out_shape=jax.ShapeDtypeStruct((BN, PRED_LEN), jnp.float32),
        scratch_shapes=[pltpu.VMEM((NROWS, D_LLM), jnp.float32),   # llm input buffer
                        pltpu.VMEM((BN, HEAD_NF), jnp.float32)],   # flatten-head gather
    )(feat, prompt2d,
      p['conv_w2'], p['rq_w'], p['rq_b'], p['kT'], p['v_src'],
      p['rp_bias'], p['rp_hmask'], p['ro_w'], p['ro_b'],
      p['ln1_g'], p['ln1_b'], p['aqkv_w'], p['aqkv_b'], p['llm_hmask'], p['llm_bias'],
      p['ao_w'], p['ao_b'], p['ln2_g'], p['ln2_b'], p['m1_w'], p['m1_b'],
      p['m2_w'], p['m2_b'], p['lnf_g'], p['lnf_b'], p['head_w2'], p['head_b'])


# ------------------------------- JAX glue ------------------------------------
def calcute_lags(x_bn_t):
    q_fft = jnp.fft.rfft(x_bn_t, axis=-1)
    corr = jnp.fft.irfft(q_fft * jnp.conj(q_fft), n=x_bn_t.shape[-1], axis=-1)
    _, lags = jax.lax.top_k(corr, TOP_K)
    return lags


def forecast(x_enc, p):
    b, t, n = x_enc.shape
    # RevIN (Normalize, affine=False): tiny reduction, left to XLA.
    mu = jnp.mean(x_enc, axis=1, keepdims=True)
    sd = jnp.sqrt(jnp.var(x_enc, axis=1, keepdims=True) + 1e-5)
    x_norm = (x_enc - mu) / sd

    x_bn_t = x_norm.transpose(0, 2, 1).reshape(b * n, t)            # (BN, T)

    # prompt statistics -> deterministic synthetic token ids
    lags = calcute_lags(x_bn_t)
    trends = jnp.sum(jnp.diff(x_bn_t, axis=-1), axis=-1, keepdims=True)
    # TODO(synk): real text prompt + HF tokenizer are not reproducible here; build
    # deterministic data-dependent token ids from the same statistics instead.
    tok = (lags[:, :1] * 7 + jnp.arange(PROMPT_LEN)[None, :]
           + (trends > 0).astype(jnp.int32)) % VOCAB
    prompt_emb = jnp.take(p['word_emb'], tok, axis=0)               # (BN, P, d_llm)

    # PatchEmbedding front-end as ONE precomputed-index gather (repl pad + unfold +
    # circular k=3 conv columns all folded into PATCH_IDX).
    x_pad = jnp.concatenate(
        [x_bn_t, jnp.broadcast_to(x_bn_t[:, -1:], (b * n, STRIDE))], axis=1)
    feat = x_pad[:, PATCH_IDX].reshape(b * n * PATCH_NUMS, PATCH_LEN * 3)

    out_bn = timellm_call(feat, prompt_emb.reshape(b * n * PROMPT_LEN, D_LLM), p)

    dec = out_bn.reshape(b, n, PRED_LEN).transpose(0, 2, 1)         # (B, pred_len, N)
    dec = dec * sd + mu                                             # RevIN denorm
    return dec[:, -PRED_LEN:, :]


# ------------------------------ parameters -----------------------------------
def init_params(key):
    ks = jax.random.split(key, 16)
    bf = jnp.bfloat16

    def dense(k, fi, fo, scale=0.02):
        return jax.random.normal(k, (fi, fo), jnp.float32) * scale

    word_emb = jax.random.normal(ks[0], (VOCAB, D_LLM), jnp.float32) * 0.02
    map_w = dense(ks[1], VOCAB, NUM_TOKENS)                         # (vocab, num_tokens)
    patch_conv_w = jax.random.normal(ks[2], (D_MODEL, PATCH_LEN, 3), jnp.float32) * 0.05
    conv_w2 = patch_conv_w.reshape(D_MODEL, PATCH_LEN * 3).T        # (patch_len*3, d_model)

    rq_w = dense(ks[3], D_MODEL, HKD)
    rk_w = dense(ks[4], D_LLM, HKD)
    rv_w = dense(ks[5], D_LLM, HKD)
    ro_w = dense(ks[6], HKD, D_LLM)

    # Input-independent: source_embeddings = mapping_layer(word_emb.T).T and its
    # K/V projections, hoisted out of the per-forward path (weights only).
    src = map_w.T @ word_emb                                        # (num_tokens, d_llm)
    k_src = src @ rk_w                                              # (num_tokens, HKD)
    v_src = src @ rv_w
    kT = jnp.zeros((HKD, S_PAD), jnp.float32).at[:, :NUM_TOKENS].set(k_src.T)
    v_pad = jnp.zeros((S_PAD, HKD), jnp.float32).at[:NUM_TOKENS].set(v_src)

    # Precomputed masks / additive biases for the fused kernel.
    rp_bias = jnp.where(jnp.arange(S_PAD) < NUM_TOKENS, 0.0, NEG).reshape(1, S_PAD)
    col = jnp.arange(HKD)
    rp_hmask = (col[None, :] // DK ==
                jnp.repeat(jnp.arange(N_HEADS), BNL)[:, None]).astype(jnp.float32)
    lcol = jnp.arange(D_LLM)
    llm_hmask = (lcol[None, :] // LLM_DH ==
                 jnp.repeat(jnp.arange(LLM_HEADS), NROWS)[:, None]).astype(jnp.float32)
    row_bn = jnp.tile(jnp.arange(NROWS) // LF, (LLM_HEADS,))
    col_bn = jnp.arange(NROWS) // LF
    llm_bias = jnp.where(row_bn[:, None] == col_bn[None, :], 0.0, NEG).astype(jnp.float32)

    aq_w = dense(ks[7], D_LLM, D_LLM)
    ak_w = dense(ks[8], D_LLM, D_LLM)
    av_w = dense(ks[9], D_LLM, D_LLM)
    ao_w = dense(ks[10], D_LLM, D_LLM)
    m1_w = dense(ks[11], D_LLM, LLM_MLP)
    m2_w = dense(ks[12], LLM_MLP, D_LLM)

    head_w = dense(ks[13], HEAD_NF, PRED_LEN)
    # Pre-permute so the kernel's (patch-major, feature) flatten order matches the
    # PyTorch (feature-major, patch) Flatten(start_dim=-2) + Linear.
    head_w2 = head_w.reshape(D_FF, PATCH_NUMS, PRED_LEN).transpose(1, 0, 2).reshape(
        HEAD_NF, PRED_LEN)

    zeros = lambda *s: jnp.zeros(s, jnp.float32)
    return {
        'word_emb': word_emb,                          # f32 for prompt-token gather
        'conv_w2': conv_w2,                            # f32 patch-conv GEMM weight
        'rq_w': rq_w.astype(bf), 'rq_b': zeros(1, HKD),
        'kT': kT.astype(bf), 'v_src': v_pad.astype(bf),
        'rp_bias': rp_bias.astype(jnp.float32), 'rp_hmask': rp_hmask,
        'ro_w': ro_w.astype(bf), 'ro_b': zeros(1, D_LLM),
        'ln1_g': jnp.ones((1, D_LLM), jnp.float32), 'ln1_b': zeros(1, D_LLM),
        'aqkv_w': jnp.concatenate([aq_w, ak_w, av_w], axis=1).astype(bf),
        'aqkv_b': zeros(1, 3 * D_LLM),
        'llm_hmask': llm_hmask, 'llm_bias': llm_bias,
        'ao_w': ao_w.astype(bf), 'ao_b': zeros(1, D_LLM),
        'ln2_g': jnp.ones((1, D_LLM), jnp.float32), 'ln2_b': zeros(1, D_LLM),
        'm1_w': m1_w.astype(bf), 'm1_b': zeros(1, LLM_MLP),
        'm2_w': m2_w.astype(bf), 'm2_b': zeros(1, D_LLM),
        'lnf_g': jnp.ones((1, D_LLM), jnp.float32), 'lnf_b': zeros(1, D_LLM),
        'head_w2': head_w2.astype(bf), 'head_b': zeros(1, PRED_LEN),
    }


if __name__ == "__main__":
    key = jax.random.PRNGKey(0)
    pkey, xkey = jax.random.split(key)
    params = init_params(pkey)
    x_enc = jax.random.normal(xkey, (B, SEQ_LEN, ENC_IN), jnp.float32)
    x_mark_enc = jnp.zeros((B, SEQ_LEN, 4), jnp.float32)     # unused by forward
    x_dec = jnp.zeros((B, PRED_LEN, ENC_IN), jnp.float32)    # unused by forward
    x_mark_dec = jnp.zeros((B, PRED_LEN, 4), jnp.float32)    # unused by forward
    out = jax.jit(forecast)(x_enc, params)
    out = jax.block_until_ready(out)
    assert out.shape == (B, PRED_LEN, ENC_IN) and out.dtype == jnp.float32
    print("KERNEL_OK")
</pallas_src>

<mosaic_0001>
module attributes {stable_mosaic.version = 11 : i64} {
  func.func @_timellm_kernel(%arg0: memref<16x48xf32, #tpu.memory_space<vmem>>, %arg1: memref<32x64xf32, #tpu.memory_space<vmem>>, %arg2: memref<48x16xf32, #tpu.memory_space<vmem>>, %arg3: memref<16x128xbf16, #tpu.memory_space<vmem>>, %arg4: memref<1x128xf32, #tpu.memory_space<vmem>>, %arg5: memref<128x1024xbf16, #tpu.memory_space<vmem>>, %arg6: memref<1024x128xbf16, #tpu.memory_space<vmem>>, %arg7: memref<1x1024xf32, #tpu.memory_space<vmem>>, %arg8: memref<64x128xf32, #tpu.memory_space<vmem>>, %arg9: memref<128x64xbf16, #tpu.memory_space<vmem>>, %arg10: memref<1x64xf32, #tpu.memory_space<vmem>>, %arg11: memref<1x64xf32, #tpu.memory_space<vmem>>, %arg12: memref<1x64xf32, #tpu.memory_space<vmem>>, %arg13: memref<64x192xbf16, #tpu.memory_space<vmem>>, %arg14: memref<1x192xf32, #tpu.memory_space<vmem>>, %arg15: memref<192x64xf32, #tpu.memory_space<vmem>>, %arg16: memref<192x48xf32, #tpu.memory_space<vmem>>, %arg17: memref<64x64xbf16, #tpu.memory_space<vmem>>, %arg18: memref<1x64xf32, #tpu.memory_space<vmem>>, %arg19: memref<1x64xf32, #tpu.memory_space<vmem>>, %arg20: memref<1x64xf32, #tpu.memory_space<vmem>>, %arg21: memref<64x128xbf16, #tpu.memory_space<vmem>>, %arg22: memref<1x128xf32, #tpu.memory_space<vmem>>, %arg23: memref<128x64xbf16, #tpu.memory_space<vmem>>, %arg24: memref<1x64xf32, #tpu.memory_space<vmem>>, %arg25: memref<1x64xf32, #tpu.memory_space<vmem>>, %arg26: memref<1x64xf32, #tpu.memory_space<vmem>>, %arg27: memref<128x8xbf16, #tpu.memory_space<vmem>>, %arg28: memref<1x8xf32, #tpu.memory_space<vmem>>, %arg29: memref<4x8xf32, #tpu.memory_space<vmem>>, %arg30: memref<48x64xf32, #tpu.memory_space<vmem>>, %arg31: memref<4x128xf32, #tpu.memory_space<vmem>>) attributes {dimension_semantics = [], scalar_prefetch = 0 : i64, scratch_operands = 2 : i64, tpu.core_type = #tpu.core_type<tc>} {
    %c0 = arith.constant 0 : index
    %c0_0 = arith.constant 0 : index
    %0 = vector.load %arg0[%c0, %c0_0] : memref<16x48xf32, #tpu.memory_space<vmem>>, vector<16x48xf32>
    %c0_1 = arith.constant 0 : index
    %c0_2 = arith.constant 0 : index
    %1 = vector.load %arg2[%c0_1, %c0_2] : memref<48x16xf32, #tpu.memory_space<vmem>>, vector<48x16xf32>
    %cst = arith.constant dense<0.000000e+00> : vector<16x16xf32>
    %2 = tpu.matmul %0, %1, %cst {dimension_numbers = #tpu.dot_dimension_numbers<[1], [0], [0], [1], [0, 0, 1, 1], [], []>} : vector<16x48xf32>, vector<48x16xf32>, vector<16x16xf32> -> vector<16x16xf32>
    %3 = arith.truncf %2 : vector<16x16xf32> to vector<16x16xbf16>
    %c0_3 = arith.constant 0 : index
    %c0_4 = arith.constant 0 : index
    %4 = vector.load %arg3[%c0_3, %c0_4] : memref<16x128xbf16, #tpu.memory_space<vmem>>, vector<16x128xbf16>
    %cst_5 = arith.constant dense<0.000000e+00> : vector<16x128xf32>
    %5 = tpu.matmul %3, %4, %cst_5 {dimension_numbers = #tpu.dot_dimension_numbers<[1], [0], [0], [1], [0, 0, 1, 1], [], []>} : vector<16x16xbf16>, vector<16x128xbf16>, vector<16x128xf32> -> vector<16x128xf32>
    %c0_6 = arith.constant 0 : index
    %c0_7 = arith.constant 0 : index
    %6 = vector.load %arg4[%c0_6, %c0_7] : memref<1x128xf32, #tpu.memory_space<vmem>>, vector<1x128xf32>
    %7 = vector.broadcast %6 : vector<1x128xf32> to vector<16x128xf32>
    %8 = arith.addf %5, %7 : vector<16x128xf32>
    %9 = tpu.concatenate %8, %8, %8, %8 in 0 : vector<16x128xf32>, vector<16x128xf32>, vector<16x128xf32>, vector<16x128xf32> -> vector<64x128xf32>
    %c0_8 = arith.constant 0 : index
    %c0_9 = arith.constant 0 : index
    %10 = vector.load %arg8[%c0_8, %c0_9] : memref<64x128xf32, #tpu.memory_space<vmem>>, vector<64x128xf32>
    %11 = arith.mulf %9, %10 : vector<64x128xf32>
    %12 = arith.truncf %11 : vector<64x128xf32> to vector<64x128xbf16>
    %c0_10 = arith.constant 0 : index
    %c0_11 = arith.constant 0 : index
    %13 = vector.load %arg5[%c0_10, %c0_11] : memref<128x1024xbf16, #tpu.memory_space<vmem>>, vector<128x1024xbf16>
    %cst_12 = arith.constant dense<0.000000e+00> : vector<64x1024xf32>
    %14 = tpu.matmul %12, %13, %cst_12 {dimension_numbers = #tpu.dot_dimension_numbers<[1], [0], [0], [1], [0, 0, 1, 1], [], []>} : vector<64x128xbf16>, vector<128x1024xbf16>, vector<64x1024xf32> -> vector<64x1024xf32>
    %cst_13 = arith.constant 0.176776692 : f32
    %15 = vector.broadcast %cst_13 : f32 to vector<64x1024xf32>
    %16 = arith.mulf %14, %15 : vector<64x1024xf32>
    %c0_14 = arith.constant 0 : index
    %c0_15 = arith.constant 0 : index
    %17 = vector.load %arg7[%c0_14, %c0_15] : memref<1x1024xf32, #tpu.memory_space<vmem>>, vector<1x1024xf32>
    %18 = vector.broadcast %17 : vector<1x1024xf32> to vector<64x1024xf32>
    %19 = arith.addf %16, %18 : vector<64x1024xf32>
    %cst_16 = arith.constant dense<0xFF800000> : vector<64xf32>
    %20 = vector.multi_reduction <maximumf>, %19, %cst_16 [1] : vector<64x1024xf32> to vector<64xf32>
    %21 = vector.shape_cast %20 : vector<64xf32> to vector<64x1xf32>
    %22 = vector.broadcast %21 : vector<64x1xf32> to vector<64x1024xf32>
    %23 = arith.subf %19, %22 : vector<64x1024xf32>
    %24 = math.exp %23 : vector<64x1024xf32>
    %cst_17 = arith.constant dense<0.000000e+00> : vector<64xf32>
    %25 = vector.multi_reduction <add>, %24, %cst_17 [1] : vector<64x1024xf32> to vector<64xf32>
    %26 = vector.shape_cast %25 : vector<64xf32> to vector<64x1xf32>
    %27 = vector.broadcast %26 : vector<64x1xf32> to vector<64x1024xf32>
    %28 = arith.divf %24, %27 : vector<64x1024xf32>
    %29 = arith.truncf %28 : vector<64x1024xf32> to vector<64x1024xbf16>
    %c0_18 = arith.constant 0 : index
    %c0_19 = arith.constant 0 : index
    %30 = vector.load %arg6[%c0_18, %c0_19] : memref<1024x128xbf16, #tpu.memory_space<vmem>>, vector<1024x128xbf16>
    %cst_20 = arith.constant dense<0.000000e+00> : vector<64x128xf32>
    %31 = tpu.matmul %29, %30, %cst_20 {dimension_numbers = #tpu.dot_dimension_numbers<[1], [0], [0], [1], [0, 0, 1, 1], [], []>} : vector<64x1024xbf16>, vector<1024x128xbf16>, vector<64x128xf32> -> vector<64x128xf32>
    %c0_21 = arith.constant 0 : index
    %c0_22 = arith.constant 0 : index
    %32 = vector.load %arg8[%c0_21, %c0_22] : memref<64x128xf32, #tpu.memory_space<vmem>>, vector<64x128xf32>
    %33 = arith.mulf %31, %32 : vector<64x128xf32>
    %34 = vector.shape_cast %33 : vector<64x128xf32> to vector<4x16x128xf32>
    %cst_23 = arith.constant dense<0.000000e+00> : vector<16x128xf32>
    %35 = vector.multi_reduction <add>, %34, %cst_23 [0] : vector<4x16x128xf32> to vector<16x128xf32>
    %36 = arith.truncf %35 : vector<16x128xf32> to vector<16x128xbf16>
    %c0_24 = arith.constant 0 : index
    %c0_25 = arith.constant 0 : index
    %37 = vector.load %arg9[%c0_24, %c0_25] : memref<128x64xbf16, #tpu.memory_space<vmem>>, vector<128x64xbf16>
    %cst_26 = arith.constant dense<0.000000e+00> : vector<16x64xf32>
    %38 = tpu.matmul %36, %37, %cst_26 {dimension_numbers = #tpu.dot_dimension_numbers<[1], [0], [0], [1], [0, 0, 1, 1], [], []>} : vector<16x128xbf16>, vector<128x64xbf16>, vector<16x64xf32> -> vector<16x64xf32>
    %c0_27 = arith.constant 0 : index
    %c0_28 = arith.constant 0 : index
    %39 = vector.load %arg10[%c0_27, %c0_28] : memref<1x64xf32, #tpu.memory_space<vmem>>, vector<1x64xf32>
    %40 = vector.broadcast %39 : vector<1x64xf32> to vector<16x64xf32>
    %41 = arith.addf %38, %40 : vector<16x64xf32>
    %c0_29 = arith.constant 0 : index
    %c0_30 = arith.constant 0 : index
    %42 = vector.load %arg1[%c0_29, %c0_30] : memref<32x64xf32, #tpu.memory_space<vmem>>, vector<8x64xf32>
    %c0_31 = arith.constant 0 : index
    %c0_32 = arith.constant 0 : index
    %43 = vector.load %arg30[%c0_31, %c0_32] : memref<48x64xf32, #tpu.memory_space<vmem>>, vector<8x64xf32>
    tpu.vector_store %arg30[%c0_31, %c0_32], %42 {strides = array<i32>} : memref<48x64xf32, #tpu.memory_space<vmem>>, vector<8x64xf32>,
    %44 = vector.extract_strided_slice %41 {offsets = [0, 0], sizes = [4, 64], strides = [1, 1]} : vector<16x64xf32> to vector<4x64xf32>
    %c8 = arith.constant 8 : index
    %c0_33 = arith.constant 0 : index
    %45 = vector.load %arg30[%c8, %c0_33] : memref<48x64xf32, #tpu.memory_space<vmem>>, vector<4x64xf32>
    tpu.vector_store %arg30[%c8, %c0_33], %44 {strides = array<i32>} : memref<48x64xf32, #tpu.memory_space<vmem>>, vector<4x64xf32>,
    %c8_34 = arith.constant 8 : index
    %c0_35 = arith.constant 0 : index
    %46 = vector.load %arg1[%c8_34, %c0_35] : memref<32x64xf32, #tpu.memory_space<vmem>>, vector<8x64xf32>
    %c12 = arith.constant 12 : index
    %c0_36 = arith.constant 0 : index
    %47 = vector.load %arg30[%c12, %c0_36] : memref<48x64xf32, #tpu.memory_space<vmem>>, vector<8x64xf32>
    tpu.vector_store %arg30[%c12, %c0_36], %46 {strides = array<i32>} : memref<48x64xf32, #tpu.memory_space<vmem>>, vector<8x64xf32>,
    %48 = vector.extract_strided_slice %41 {offsets = [4, 0], sizes = [4, 64], strides = [1, 1]} : vector<16x64xf32> to vector<4x64xf32>
    %c20 = arith.constant 20 : index
    %c0_37 = arith.constant 0 : index
    %49 = vector.load %arg30[%c20, %c0_37] : memref<48x64xf32, #tpu.memory_space<vmem>>, vector<4x64xf32>
    tpu.vector_store %arg30[%c20, %c0_37], %48 {strides = array<i32>} : memref<48x64xf32, #tpu.memory_space<vmem>>, vector<4x64xf32>,
    %c16 = arith.constant 16 : index
    %c0_38 = arith.constant 0 : index
    %50 = vector.load %arg1[%c16, %c0_38] : memref<32x64xf32, #tpu.memory_space<vmem>>, vector<8x64xf32>
    %c24 = arith.constant 24 : index
    %c0_39 = arith.constant 0 : index
    %51 = vector.load %arg30[%c24, %c0_39] : memref<48x64xf32, #tpu.memory_space<vmem>>, vector<8x64xf32>
    tpu.vector_store %arg30[%c24, %c0_39], %50 {strides = array<i32>} : memref<48x64xf32, #tpu.memory_space<vmem>>, vector<8x64xf32>,
    %52 = vector.extract_strided_slice %41 {offsets = [8, 0], sizes = [4, 64], strides = [1, 1]} : vector<16x64xf32> to vector<4x64xf32>
    %c32 = arith.constant 32 : index
    %c0_40 = arith.constant 0 : index
    %53 = vector.load %arg30[%c32, %c0_40] : memref<48x64xf32, #tpu.memory_space<vmem>>, vector<4x64xf32>
    tpu.vector_store %arg30[%c32, %c0_40], %52 {strides = array<i32>} : memref<48x64xf32, #tpu.memory_space<vmem>>, vector<4x64xf32>,
    %c24_41 = arith.constant 24 : index
    %c0_42 = arith.constant 0 : index
    %54 = vector.load %arg1[%c24_41, %c0_42] : memref<32x64xf32, #tpu.memory_space<vmem>>, vector<8x64xf32>
    %c36 = arith.constant 36 : index
    %c0_43 = arith.constant 0 : index
    %55 = vector.load %arg30[%c36, %c0_43] : memref<48x64xf32, #tpu.memory_space<vmem>>, vector<8x64xf32>
    tpu.vector_store %arg30[%c36, %c0_43], %54 {strides = array<i32>} : memref<48x64xf32, #tpu.memory_space<vmem>>, vector<8x64xf32>,
    %56 = vector.extract_strided_slice %41 {offsets = [12, 0], sizes = [4, 64], strides = [1, 1]} : vector<16x64xf32> to vector<4x64xf32>
    %c44 = arith.constant 44 : index
    %c0_44 = arith.constant 0 : index
    %57 = vector.load %arg30[%c44, %c0_44] : memref<48x64xf32, #tpu.memory_space<vmem>>, vector<4x64xf32>
    tpu.vector_store %arg30[%c44, %c0_44], %56 {strides = array<i32>} : memref<48x64xf32, #tpu.memory_space<vmem>>, vector<4x64xf32>,
    %c0_45 = arith.constant 0 : index
    %c0_46 = arith.constant 0 : index
    %58 = vector.load %arg30[%c0_45, %c0_46] : memref<48x64xf32, #tpu.memory_space<vmem>>, vector<48x64xf32>
    %c0_47 = arith.constant 0 : index
    %c0_48 = arith.constant 0 : index
    %59 = vector.load %arg11[%c0_47, %c0_48] : memref<1x64xf32, #tpu.memory_space<vmem>>, vector<1x64xf32>
    %c0_49 = arith.constant 0 : index
    %c0_50 = arith.constant 0 : index
    %60 = vector.load %arg12[%c0_49, %c0_50] : memref<1x64xf32, #tpu.memory_space<vmem>>, vector<1x64xf32>
    %cst_51 = arith.constant dense<0.000000e+00> : vector<48xf32>
    %61 = vector.multi_reduction <add>, %58, %cst_51 [1] : vector<48x64xf32> to vector<48xf32>
    %62 = vector.shape_cast %61 : vector<48xf32> to vector<48x1xf32>
    %cst_52 = arith.constant 6.400000e+01 : f32
    %63 = vector.broadcast %cst_52 : f32 to vector<48x1xf32>
    %64 = arith.divf %62, %63 : vector<48x1xf32>
    %65 = vector.broadcast %64 : vector<48x1xf32> to vector<48x64xf32>
    %66 = arith.subf %58, %65 : vector<48x64xf32>
    %67 = arith.mulf %66, %66 : vector<48x64xf32>
    %cst_53 = arith.constant dense<0.000000e+00> : vector<48xf32>
    %68 = vector.multi_reduction <add>, %67, %cst_53 [1] : vector<48x64xf32> to vector<48xf32>
    %69 = vector.shape_cast %68 : vector<48xf32> to vector<48x1xf32>
    %cst_54 = arith.constant 6.400000e+01 : f32
    %70 = vector.broadcast %cst_54 : f32 to vector<48x1xf32>
    %71 = arith.divf %69, %70 : vector<48x1xf32>
    %72 = vector.broadcast %64 : vector<48x1xf32> to vector<48x64xf32>
    %73 = arith.subf %58, %72 : vector<48x64xf32>
    %cst_55 = arith.constant 9.99999974E-6 : f32
    %74 = vector.broadcast %cst_55 : f32 to vector<48x1xf32>
    %75 = arith.addf %71, %74 : vector<48x1xf32>
    %76 = math.rsqrt %75 : vector<48x1xf32>
    %77 = vector.broadcast %76 : vector<48x1xf32> to vector<48x64xf32>
    %78 = arith.mulf %73, %77 : vector<48x64xf32>
    %79 = vector.broadcast %59 : vector<1x64xf32> to vector<48x64xf32>
    %80 = arith.mulf %78, %79 : vector<48x64xf32>
    %81 = vector.broadcast %60 : vector<1x64xf32> to vector<48x64xf32>
    %82 = arith.addf %80, %81 : vector<48x64xf32>
    %83 = arith.truncf %82 : vector<48x64xf32> to vector<48x64xbf16>
    %c0_56 = arith.constant 0 : index
    %c0_57 = arith.constant 0 : index
    %84 = vector.load %arg13[%c0_56, %c0_57] : memref<64x192xbf16, #tpu.memory_space<vmem>>, vector<64x192xbf16>
    %cst_58 = arith.constant dense<0.000000e+00> : vector<48x192xf32>
    %85 = tpu.matmul %83, %84, %cst_58 {dimension_numbers = #tpu.dot_dimension_numbers<[1], [0], [0], [1], [0, 0, 1, 1], [], []>} : vector<48x64xbf16>, vector<64x192xbf16>, vector<48x192xf32> -> vector<48x192xf32>
    %c0_59 = arith.constant 0 : index
    %c0_60 = arith.constant 0 : index
    %86 = vector.load %arg14[%c0_59, %c0_60] : memref<1x192xf32, #tpu.memory_space<vmem>>, vector<1x192xf32>
    %87 = vector.broadcast %86 : vector<1x192xf32> to vector<48x192xf32>
    %88 = arith.addf %85, %87 : vector<48x192xf32>
    %89 = vector.extract_strided_slice %88 {offsets = [0, 0], sizes = [48, 64], strides = [1, 1]} : vector<48x192xf32> to vector<48x64xf32>
    %90 = vector.extract_strided_slice %88 {offsets = [0, 64], sizes = [48, 64], strides = [1, 1]} : vector<48x192xf32> to vector<48x64xf32>
    %91 = arith.truncf %90 : vector<48x64xf32> to vector<48x64xbf16>
    %92 = vector.extract_strided_slice %88 {offsets = [0, 128], sizes = [48, 64], strides = [1, 1]} : vector<48x192xf32> to vector<48x64xf32>
    %93 = arith.truncf %92 : vector<48x64xf32> to vector<48x64xbf16>
    %94 = tpu.concatenate %89, %89, %89, %89 in 0 : vector<48x64xf32>, vector<48x64xf32>, vector<48x64xf32>, vector<48x64xf32> -> vector<192x64xf32>
    %c0_61 = arith.constant 0 : index
    %c0_62 = arith.constant 0 : index
    %95 = vector.load %arg15[%c0_61, %c0_62] : memref<192x64xf32, #tpu.memory_space<vmem>>, vector<192x64xf32>
    %96 = arith.mulf %94, %95 : vector<192x64xf32>
    %97 = arith.truncf %96 : vector<192x64xf32> to vector<192x64xbf16>
    %cst_63 = arith.constant dense<0.000000e+00> : vector<192x48xf32>
    %98 = tpu.matmul %97, %91, %cst_63 {dimension_numbers = #tpu.dot_dimension_numbers<[1], [1], [0], [0], [0, 0, 1, 0], [], []>} : vector<192x64xbf16>, vector<48x64xbf16>, vector<192x48xf32> -> vector<192x48xf32>
    %cst_64 = arith.constant 2.500000e-01 : f32
    %99 = vector.broadcast %cst_64 : f32 to vector<192x48xf32>
    %100 = arith.mulf %98, %99 : vector<192x48xf32>
    %c0_65 = arith.constant 0 : index
    %c0_66 = arith.constant 0 : index
    %101 = vector.load %arg16[%c0_65, %c0_66] : memref<192x48xf32, #tpu.memory_space<vmem>>, vector<192x48xf32>
    %102 = arith.addf %100, %101 : vector<192x48xf32>
    %cst_67 = arith.constant dense<0xFF800000> : vector<192xf32>
    %103 = vector.multi_reduction <maximumf>, %102, %cst_67 [1] : vector<192x48xf32> to vector<192xf32>
    %104 = vector.shape_cast %103 : vector<192xf32> to vector<192x1xf32>
    %105 = vector.broadcast %104 : vector<192x1xf32> to vector<192x48xf32>
    %106 = arith.subf %102, %105 : vector<192x48xf32>
    %107 = math.exp %106 : vector<192x48xf32>
    %cst_68 = arith.constant dense<0.000000e+00> : vector<192xf32>
    %108 = vector.multi_reduction <add>, %107, %cst_68 [1] : vector<192x48xf32> to vector<192xf32>
    %109 = vector.shape_cast %108 : vector<192xf32> to vector<192x1xf32>
    %110 = vector.broadcast %109 : vector<192x1xf32> to vector<192x48xf32>
    %111 = arith.divf %107, %110 : vector<192x48xf32>
    %112 = arith.truncf %111 : vector<192x48xf32> to vector<192x48xbf16>
    %cst_69 = arith.constant dense<0.000000e+00> : vector<192x64xf32>
    %113 = tpu.matmul %112, %93, %cst_69 {dimension_numbers = #tpu.dot_dimension_numbers<[1], [0], [0], [1], [0, 0, 1, 1], [], []>} : vector<192x48xbf16>, vector<48x64xbf16>, vector<192x64xf32> -> vector<192x64xf32>
    %c0_70 = arith.constant 0 : index
    %c0_71 = arith.constant 0 : index
    %114 = vector.load %arg15[%c0_70, %c0_71] : memref<192x64xf32, #tpu.memory_space<vmem>>, vector<192x64xf32>
    %115 = arith.mulf %113, %114 : vector<192x64xf32>
    %116 = vector.shape_cast %115 : vector<192x64xf32> to vector<4x48x64xf32>
    %cst_72 = arith.constant dense<0.000000e+00> : vector<48x64xf32>
    %117 = vector.multi_reduction <add>, %116, %cst_72 [0] : vector<4x48x64xf32> to vector<48x64xf32>
    %118 = arith.truncf %117 : vector<48x64xf32> to vector<48x64xbf16>
    %c0_73 = arith.constant 0 : index
    %c0_74 = arith.constant 0 : index
    %119 = vector.load %arg17[%c0_73, %c0_74] : memref<64x64xbf16, #tpu.memory_space<vmem>>, vector<64x64xbf16>
    %cst_75 = arith.constant dense<0.000000e+00> : vector<48x64xf32>
    %120 = tpu.matmul %118, %119, %cst_75 {dimension_numbers = #tpu.dot_dimension_numbers<[1], [0], [0], [1], [0, 0, 1, 1], [], []>} : vector<48x64xbf16>, vector<64x64xbf16>, vector<48x64xf32> -> vector<48x64xf32>
    %121 = arith.addf %58, %120 : vector<48x64xf32>
    %c0_76 = arith.constant 0 : index
    %c0_77 = arith.constant 0 : index
    %122 = vector.load %arg18[%c0_76, %c0_77] : memref<1x64xf32, #tpu.memory_space<vmem>>, vector<1x64xf32>
    %123 = vector.broadcast %122 : vector<1x64xf32> to vector<48x64xf32>
    %124 = arith.addf %121, %123 : vector<48x64xf32>
    %c0_78 = arith.constant 0 : index
    %c0_79 = arith.constant 0 : index
    %125 = vector.load %arg19[%c0_78, %c0_79] : memref<1x64xf32, #tpu.memory_space<vmem>>, vector<1x64xf32>
    %c0_80 = arith.constant 0 : index
    %c0_81 = arith.constant 0 : index
    %126 = vector.load %arg20[%c0_80, %c0_81] : memref<1x64xf32, #tpu.memory_space<vmem>>, vector<1x64xf32>
    %cst_82 = arith.constant dense<0.000000e+00> : vector<48xf32>
    %127 = vector.multi_reduction <add>, %124, %cst_82 [1] : vector<48x64xf32> to vector<48xf32>
    %128 = vector.shape_cast %127 : vector<48xf32> to vector<48x1xf32>
    %cst_83 = arith.constant 6.400000e+01 : f32
    %129 = vector.broadcast %cst_83 : f32 to vector<48x1xf32>
    %130 = arith.divf %128, %129 : vector<48x1xf32>
    %131 = vector.broadcast %130 : vector<48x1xf32> to vector<48x64xf32>
    %132 = arith.subf %124, %131 : vector<48x64xf32>
    %133 = arith.mulf %132, %132 : vector<48x64xf32>
    %cst_84 = arith.constant dense<0.000000e+00> : vector<48xf32>
    %134 = vector.multi_reduction <add>, %133, %cst_84 [1] : vector<48x64xf32> to vector<48xf32>
    %135 = vector.shape_cast %134 : vector<48xf32> to vector<48x1xf32>
    %cst_85 = arith.constant 6.400000e+01 : f32
    %136 = vector.broadcast %cst_85 : f32 to vector<48x1xf32>
    %137 = arith.divf %135, %136 : vector<48x1xf32>
    %138 = vector.broadcast %130 : vector<48x1xf32> to vector<48x64xf32>
    %139 = arith.subf %124, %138 : vector<48x64xf32>
    %cst_86 = arith.constant 9.99999974E-6 : f32
    %140 = vector.broadcast %cst_86 : f32 to vector<48x1xf32>
    %141 = arith.addf %137, %140 : vector<48x1xf32>
    %142 = math.rsqrt %141 : vector<48x1xf32>
    %143 = vector.broadcast %142 : vector<48x1xf32> to vector<48x64xf32>
    %144 = arith.mulf %139, %143 : vector<48x64xf32>
    %145 = vector.broadcast %125 : vector<1x64xf32> to vector<48x64xf32>
    %146 = arith.mulf %144, %145 : vector<48x64xf32>
    %147 = vector.broadcast %126 : vector<1x64xf32> to vector<48x64xf32>
    %148 = arith.addf %146, %147 : vector<48x64xf32>
    %149 = arith.truncf %148 : vector<48x64xf32> to vector<48x64xbf16>
    %c0_87 = arith.constant 0 : index
    %c0_88 = arith.constant 0 : index
    %150 = vector.load %arg21[%c0_87, %c0_88] : memref<64x128xbf16, #tpu.memory_space<vmem>>, vector<64x128xbf16>
    %cst_89 = arith.constant dense<0.000000e+00> : vector<48x128xf32>
    %151 = tpu.matmul %149, %150, %cst_89 {dimension_numbers = #tpu.dot_dimension_numbers<[1], [0], [0], [1], [0, 0, 1, 1], [], []>} : vector<48x64xbf16>, vector<64x128xbf16>, vector<48x128xf32> -> vector<48x128xf32>
    %c0_90 = arith.constant 0 : index
    %c0_91 = arith.constant 0 : index
    %152 = vector.load %arg22[%c0_90, %c0_91] : memref<1x128xf32, #tpu.memory_space<vmem>>, vector<1x128xf32>
    %153 = vector.broadcast %152 : vector<1x128xf32> to vector<48x128xf32>
    %154 = arith.addf %151, %153 : vector<48x128xf32>
    %155 = arith.mulf %154, %154 : vector<48x128xf32>
    %156 = arith.mulf %154, %155 : vector<48x128xf32>
    %cst_92 = arith.constant 4.471500e-02 : f32
    %157 = vector.broadcast %cst_92 : f32 to vector<48x128xf32>
    %158 = arith.mulf %157, %156 : vector<48x128xf32>
    %159 = arith.addf %154, %158 : vector<48x128xf32>
    %cst_93 = arith.constant 0.797884583 : f32
    %160 = vector.broadcast %cst_93 : f32 to vector<48x128xf32>
    %161 = arith.mulf %160, %159 : vector<48x128xf32>
    %162 = math.tanh %161 : vector<48x128xf32>
    %cst_94 = arith.constant 1.000000e+00 : f32
    %163 = vector.broadcast %cst_94 : f32 to vector<48x128xf32>
    %164 = arith.addf %163, %162 : vector<48x128xf32>
    %cst_95 = arith.constant 5.000000e-01 : f32
    %165 = vector.broadcast %cst_95 : f32 to vector<48x128xf32>
    %166 = arith.mulf %165, %164 : vector<48x128xf32>
    %167 = arith.mulf %154, %166 : vector<48x128xf32>
    %168 = arith.truncf %167 : vector<48x128xf32> to vector<48x128xbf16>
    %c0_96 = arith.constant 0 : index
    %c0_97 = arith.constant 0 : index
    %169 = vector.load %arg23[%c0_96, %c0_97] : memref<128x64xbf16, #tpu.memory_space<vmem>>, vector<128x64xbf16>
    %cst_98 = arith.constant dense<0.000000e+00> : vector<48x64xf32>
    %170 = tpu.matmul %168, %169, %cst_98 {dimension_numbers = #tpu.dot_dimension_numbers<[1], [0], [0], [1], [0, 0, 1, 1], [], []>} : vector<48x128xbf16>, vector<128x64xbf16>, vector<48x64xf32> -> vector<48x64xf32>
    %171 = arith.addf %124, %170 : vector<48x64xf32>
    %c0_99 = arith.constant 0 : index
    %c0_100 = arith.constant 0 : index
    %172 = vector.load %arg24[%c0_99, %c0_100] : memref<1x64xf32, #tpu.memory_space<vmem>>, vector<1x64xf32>
    %173 = vector.broadcast %172 : vector<1x64xf32> to vector<48x64xf32>
    %174 = arith.addf %171, %173 : vector<48x64xf32>
    %c0_101 = arith.constant 0 : index
    %c0_102 = arith.constant 0 : index
    %175 = vector.load %arg25[%c0_101, %c0_102] : memref<1x64xf32, #tpu.memory_space<vmem>>, vector<1x64xf32>
    %c0_103 = arith.constant 0 : index
    %c0_104 = arith.constant 0 : index
    %176 = vector.load %arg26[%c0_103, %c0_104] : memref<1x64xf32, #tpu.memory_space<vmem>>, vector<1x64xf32>
    %cst_105 = arith.constant dense<0.000000e+00> : vector<48xf32>
    %177 = vector.multi_reduction <add>, %174, %cst_105 [1] : vector<48x64xf32> to vector<48xf32>
    %178 = vector.shape_cast %177 : vector<48xf32> to vector<48x1xf32>
    %cst_106 = arith.constant 6.400000e+01 : f32
    %179 = vector.broadcast %cst_106 : f32 to vector<48x1xf32>
    %180 = arith.divf %178, %179 : vector<48x1xf32>
    %181 = vector.broadcast %180 : vector<48x1xf32> to vector<48x64xf32>
    %182 = arith.subf %174, %181 : vector<48x64xf32>
    %183 = arith.mulf %182, %182 : vector<48x64xf32>
    %cst_107 = arith.constant dense<0.000000e+00> : vector<48xf32>
    %184 = vector.multi_reduction <add>, %183, %cst_107 [1] : vector<48x64xf32> to vector<48xf32>
    %185 = vector.shape_cast %184 : vector<48xf32> to vector<48x1xf32>
    %cst_108 = arith.constant 6.400000e+01 : f32
    %186 = vector.broadcast %cst_108 : f32 to vector<48x1xf32>
    %187 = arith.divf %185, %186 : vector<48x1xf32>
    %188 = vector.broadcast %180 : vector<48x1xf32> to vector<48x64xf32>
    %189 = arith.subf %174, %188 : vector<48x64xf32>
    %cst_109 = arith.constant 9.99999974E-6 : f32
    %190 = vector.broadcast %cst_109 : f32 to vector<48x1xf32>
    %191 = arith.addf %187, %190 : vector<48x1xf32>
    %192 = math.rsqrt %191 : vector<48x1xf32>
    %193 = vector.broadcast %192 : vector<48x1xf32> to vector<48x64xf32>
    %194 = arith.mulf %189, %193 : vector<48x64xf32>
    %195 = vector.broadcast %175 : vector<1x64xf32> to vector<48x64xf32>
    %196 = arith.mulf %194, %195 : vector<48x64xf32>
    %197 = vector.broadcast %176 : vector<1x64xf32> to vector<48x64xf32>
    %198 = arith.addf %196, %197 : vector<48x64xf32>
    %199 = vector.extract_strided_slice %198 {offsets = [8, 0], sizes = [1, 32], strides = [1, 1]} : vector<48x64xf32> to vector<1x32xf32>
    %c0_110 = arith.constant 0 : index
    %c0_111 = arith.constant 0 : index
    %200 = vector.load %arg31[%c0_110, %c0_111] : memref<4x128xf32, #tpu.memory_space<vmem>>, vector<1x32xf32>
    tpu.vector_store %arg31[%c0_110, %c0_111], %199 {strides = array<i32>} : memref<4x128xf32, #tpu.memory_space<vmem>>, vector<1x32xf32>,
    %201 = vector.extract_strided_slice %198 {offsets = [9, 0], sizes = [1, 32], strides = [1, 1]} : vector<48x64xf32> to vector<1x32xf32>
    %c0_112 = arith.constant 0 : index
    %c32_113 = arith.constant 32 : index
    %202 = vector.load %arg31[%c0_112, %c32_113] : memref<4x128xf32, #tpu.memory_space<vmem>>, vector<1x32xf32>
    tpu.vector_store %arg31[%c0_112, %c32_113], %201 {strides = array<i32>} : memref<4x128xf32, #tpu.memory_space<vmem>>, vector<1x32xf32>,
    %203 = vector.extract_strided_slice %198 {offsets = [10, 0], sizes = [1, 32], strides = [1, 1]} : vector<48x64xf32> to vector<1x32xf32>
    %c0_114 = arith.constant 0 : index
    %c64 = arith.constant 64 : index
    %204 = vector.load %arg31[%c0_114, %c64] : memref<4x128xf32, #tpu.memory_space<vmem>>, vector<1x32xf32>
    tpu.vector_store %arg31[%c0_114, %c64], %203 {strides = array<i32>} : memref<4x128xf32, #tpu.memory_space<vmem>>, vector<1x32xf32>,
    %205 = vector.extract_strided_slice %198 {offsets = [11, 0], sizes = [1, 32], strides = [1, 1]} : vector<48x64xf32> to vector<1x32xf32>
    %c0_115 = arith.constant 0 : index
    %c96 = arith.constant 96 : index
    %206 = vector.load %arg31[%c0_115, %c96] : memref<4x128xf32, #tpu.memory_space<vmem>>, vector<1x32xf32>
    tpu.vector_store %arg31[%c0_115, %c96], %205 {strides = array<i32>} : memref<4x128xf32, #tpu.memory_space<vmem>>, vector<1x32xf32>,
    %207 = vector.extract_strided_slice %198 {offsets = [20, 0], sizes = [1, 32], strides = [1, 1]} : vector<48x64xf32> to vector<1x32xf32>
    %c1 = arith.constant 1 : index
    %c0_116 = arith.constant 0 : index
    %208 = vector.load %arg31[%c1, %c0_116] : memref<4x128xf32, #tpu.memory_space<vmem>>, vector<1x32xf32>
    tpu.vector_store %arg31[%c1, %c0_116], %207 {strides = array<i32>} : memref<4x128xf32, #tpu.memory_space<vmem>>, vector<1x32xf32>,
    %209 = vector.extract_strided_slice %198 {offsets = [21, 0], sizes = [1, 32], strides = [1, 1]} : vector<48x64xf32> to vector<1x32xf32>
    %c1_117 = arith.constant 1 : index
    %c32_118 = arith.constant 32 : index
    %210 = vector.load %arg31[%c1_117, %c32_118] : memref<4x128xf32, #tpu.memory_space<vmem>>, vector<1x32xf32>
    tpu.vector_store %arg31[%c1_117, %c32_118], %209 {strides = array<i32>} : memref<4x128xf32, #tpu.memory_space<vmem>>, vector<1x32xf32>,
    %211 = vector.extract_strided_slice %198 {offsets = [22, 0], sizes = [1, 32], strides = [1, 1]} : vector<48x64xf32> to vector<1x32xf32>
    %c1_119 = arith.constant 1 : index
    %c64_120 = arith.constant 64 : index
    %212 = vector.load %arg31[%c1_119, %c64_120] : memref<4x128xf32, #tpu.memory_space<vmem>>, vector<1x32xf32>
    tpu.vector_store %arg31[%c1_119, %c64_120], %211 {strides = array<i32>} : memref<4x128xf32, #tpu.memory_space<vmem>>, vector<1x32xf32>,
    %213 = vector.extract_strided_slice %198 {offsets = [23, 0], sizes = [1, 32], strides = [1, 1]} : vector<48x64xf32> to vector<1x32xf32>
    %c1_121 = arith.constant 1 : index
    %c96_122 = arith.constant 96 : index
    %214 = vector.load %arg31[%c1_121, %c96_122] : memref<4x128xf32, #tpu.memory_space<vmem>>, vector<1x32xf32>
    tpu.vector_store %arg31[%c1_121, %c96_122], %213 {strides = array<i32>} : memref<4x128xf32, #tpu.memory_space<vmem>>, vector<1x32xf32>,
    %215 = vector.extract_strided_slice %198 {offsets = [32, 0], sizes = [1, 32], strides = [1, 1]} : vector<48x64xf32> to vector<1x32xf32>
    %c2 = arith.constant 2 : index
    %c0_123 = arith.constant 0 : index
    %216 = vector.load %arg31[%c2, %c0_123] : memref<4x128xf32, #tpu.memory_space<vmem>>, vector<1x32xf32>
    tpu.vector_store %arg31[%c2, %c0_123], %215 {strides = array<i32>} : memref<4x128xf32, #tpu.memory_space<vmem>>, vector<1x32xf32>,
    %217 = vector.extract_strided_slice %198 {offsets = [33, 0], sizes = [1, 32], strides = [1, 1]} : vector<48x64xf32> to vector<1x32xf32>
    %c2_124 = arith.constant 2 : index
    %c32_125 = arith.constant 32 : index
    %218 = vector.load %arg31[%c2_124, %c32_125] : memref<4x128xf32, #tpu.memory_space<vmem>>, vector<1x32xf32>
    tpu.vector_store %arg31[%c2_124, %c32_125], %217 {strides = array<i32>} : memref<4x128xf32, #tpu.memory_space<vmem>>, vector<1x32xf32>,
    %219 = vector.extract_strided_slice %198 {offsets = [34, 0], sizes = [1, 32], strides = [1, 1]} : vector<48x64xf32> to vector<1x32xf32>
    %c2_126 = arith.constant 2 : index
    %c64_127 = arith.constant 64 : index
    %220 = vector.load %arg31[%c2_126, %c64_127] : memref<4x128xf32, #tpu.memory_space<vmem>>, vector<1x32xf32>
    tpu.vector_store %arg31[%c2_126, %c64_127], %219 {strides = array<i32>} : memref<4x128xf32, #tpu.memory_space<vmem>>, vector<1x32xf32>,
    %221 = vector.extract_strided_slice %198 {offsets = [35, 0], sizes = [1, 32], strides = [1, 1]} : vector<48x64xf32> to vector<1x32xf32>
    %c2_128 = arith.constant 2 : index
    %c96_129 = arith.constant 96 : index
    %222 = vector.load %arg31[%c2_128, %c96_129] : memref<4x128xf32, #tpu.memory_space<vmem>>, vector<1x32xf32>
    tpu.vector_store %arg31[%c2_128, %c96_129], %221 {strides = array<i32>} : memref<4x128xf32, #tpu.memory_space<vmem>>, vector<1x32xf32>,
    %223 = vector.extract_strided_slice %198 {offsets = [44, 0], sizes = [1, 32], strides = [1, 1]} : vector<48x64xf32> to vector<1x32xf32>
    %c3 = arith.constant 3 : index
    %c0_130 = arith.constant 0 : index
    %224 = vector.load %arg31[%c3, %c0_130] : memref<4x128xf32, #tpu.memory_space<vmem>>, vector<1x32xf32>
    tpu.vector_store %arg31[%c3, %c0_130], %223 {strides = array<i32>} : memref<4x128xf32, #tpu.memory_space<vmem>>, vector<1x32xf32>,
    %225 = vector.extract_strided_slice %198 {offsets = [45, 0], sizes = [1, 32], strides = [1, 1]} : vector<48x64xf32> to vector<1x32xf32>
    %c3_131 = arith.constant 3 : index
    %c32_132 = arith.constant 32 : index
    %226 = vector.load %arg31[%c3_131, %c32_132] : memref<4x128xf32, #tpu.memory_space<vmem>>, vector<1x32xf32>
    tpu.vector_store %arg31[%c3_131, %c32_132], %225 {strides = array<i32>} : memref<4x128xf32, #tpu.memory_space<vmem>>, vector<1x32xf32>,
    %227 = vector.extract_strided_slice %198 {offsets = [46, 0], sizes = [1, 32], strides = [1, 1]} : vector<48x64xf32> to vector<1x32xf32>
    %c3_133 = arith.constant 3 : index
    %c64_134 = arith.constant 64 : index
    %228 = vector.load %arg31[%c3_133, %c64_134] : memref<4x128xf32, #tpu.memory_space<vmem>>, vector<1x32xf32>
    tpu.vector_store %arg31[%c3_133, %c64_134], %227 {strides = array<i32>} : memref<4x128xf32, #tpu.memory_space<vmem>>, vector<1x32xf32>,
    %229 = vector.extract_strided_slice %198 {offsets = [47, 0], sizes = [1, 32], strides = [1, 1]} : vector<48x64xf32> to vector<1x32xf32>
    %c3_135 = arith.constant 3 : index
    %c96_136 = arith.constant 96 : index
    %230 = vector.load %arg31[%c3_135, %c96_136] : memref<4x128xf32, #tpu.memory_space<vmem>>, vector<1x32xf32>
    tpu.vector_store %arg31[%c3_135, %c96_136], %229 {strides = array<i32>} : memref<4x128xf32, #tpu.memory_space<vmem>>, vector<1x32xf32>,
    %c0_137 = arith.constant 0 : index
    %c0_138 = arith.constant 0 : index
    %231 = vector.load %arg31[%c0_137, %c0_138] : memref<4x128xf32, #tpu.memory_space<vmem>>, vector<4x128xf32>
    %232 = arith.truncf %231 : vector<4x128xf32> to vector<4x128xbf16>
    %c0_139 = arith.constant 0 : index
    %c0_140 = arith.constant 0 : index
    %233 = vector.load %arg27[%c0_139, %c0_140] : memref<128x8xbf16, #tpu.memory_space<vmem>>, vector<128x8xbf16>
    %cst_141 = arith.constant dense<0.000000e+00> : vector<4x8xf32>
    %234 = tpu.matmul %232, %233, %cst_141 {dimension_numbers = #tpu.dot_dimension_numbers<[1], [0], [0], [1], [0, 0, 1, 1], [], []>} : vector<4x128xbf16>, vector<128x8xbf16>, vector<4x8xf32> -> vector<4x8xf32>
    %c0_142 = arith.constant 0 : index
    %c0_143 = arith.constant 0 : index
    %235 = vector.load %arg28[%c0_142, %c0_143] : memref<1x8xf32, #tpu.memory_space<vmem>>, vector<1x8xf32>
    %236 = vector.broadcast %235 : vector<1x8xf32> to vector<4x8xf32>
    %237 = arith.addf %234, %236 : vector<4x8xf32>
    %c0_144 = arith.constant 0 : index
    %c0_145 = arith.constant 0 : index
    %238 = vector.load %arg29[%c0_144, %c0_145] : memref<4x8xf32, #tpu.memory_space<vmem>>, vector<4x8xf32>
    tpu.vector_store %arg29[%c0_144, %c0_145], %237 {strides = array<i32>} : memref<4x8xf32, #tpu.memory_space<vmem>>, vector<4x8xf32>,
    return
  }
}

</mosaic_0001>

<bundles_post_ra>
// kernel: reverse.1
= control target key start
LH: loop header
LB: loop body
LE: loop exit
PB: predicated region body
PF: predicated region fallthrough
CT: control target
= control target key end

     0   :  { %v2_v0 = vlaneseq  ;;  %s109_s0 = inlined_call_operand.vmem [shape: f32[4,15], index: 0, kind: input, shape index: {}]   ;;  %s110_s1 = inlined_call_operand.vmem [shape: f32[4,15], index: 1, kind: output, shape index: {}]  }
   0x2   :  { %v3_v1 = vsub.s32 14, %v2_v0 }
   0x4   :  { %4 = vset.pattern.permute.xlu0 %v3_v1 }
   0x5   :  { %v21_v2 = vld [vmem:[%s109_s0] sm:$0xf] }
   0x6   :  { %22 = vst [vmem:[#allocation1] sm:$0xf] %v21_v2 }
   0xd   :  { %v40_v3 = vld [vmem:[#allocation1] sm:$0xf] }
   0xe   :  { %41 = vst [vmem:[#allocation0] sm:$0xf] %v40_v3 }
  0x15   :  { %v42_v4 = vld [vmem:[#allocation0] sm:$0xff] }
  0x16   :  { %43 = vperm.xlu0 %4, %v42_v4  }
  0x88   :  { %v44_v5 = vpop.permute.xlu0 %43 }
  0x89   :  { %45 = vst [vmem:[#allocation2] sm:$0xff] %v44_v5 }
  0x90   :  { %v48_v6 = vld [vmem:[#allocation2] sm:$0xf] }
  0x91   :  { %51 = vst [vmem:[#allocation3] sm:$0xf] %v48_v6 }
  0x98   :  { %v68_v7 = vld [vmem:[#allocation3] sm:$0xf] }
  0x99   :  { %69 = vst [vmem:[%s110_s1] sm:$0xf] %v68_v7 }

// kernel: forecast.1
= control target key start
LH: loop header
LB: loop body
LE: loop exit
PB: predicated region body
PF: predicated region fallthrough
CT: control target
= control target key end

     0   :  { %s5691_s3 = smov 2   ;;  %vm131_vm0 = vcmask 392192   ;;  %s5692_s10 = smov 4   ;;  %vm174_vm1 = vcmask 130048   ;;  %s8018_s0 = inlined_call_operand.smem [shape: u32[30], index: -1, kind: input, shape index: {}] }
   0x1   :  { %s4394_s6 = sld [smem:[%s8018_s0 + %s5691_s3]]   ;;  %s5693_s14 = smov 3  }
   0x2   :  { %s1_s9 = sld [smem:[%s8018_s0]]   ;;  %s5694_s18 = smov 5  }
   0x3   :  { %s5740_s13 = sld [smem:[%s8018_s0 + %s5692_s10]]   ;;  %s5695_s22 = smov 8  }
   0x4   :  { %s4395_s17 = sld [smem:[%s8018_s0 + %s5693_s14]]   ;;  %s5696_s26 = smov 7  }
   0x5   :  { %s5748_s21 = sld [smem:[%s8018_s0 + %s5694_s18]]   ;;  %s5697_s30 = smov 6  }
   0x6   :  { %s5853_s25 = sld [smem:[%s8018_s0 + %s5695_s22]]   ;;  %s5698_s4 = smov 9  }
   0x7   :  { %v130_v0 = vld [vmem:[%s4394_s6 + $0x28] sm:$0xff]  ;;  %v129_v1 = vld [vmem:[%s4394_s6 + $0x20] sm:$0xff]  ;;  %v128_v2 = vld [vmem:[%s4394_s6 + $0x18] sm:$0xff]  ;;  %s4399_s29 = sld [smem:[%s8018_s0 + %s5696_s26]]   ;;  %s5699_s8 = smov 1  }
   0x8   :  { %148 = vmatpush.msra.mxu0 %v130_v0  ;;  %v127_v3 = vld [vmem:[%s4394_s6 + $0x10] sm:$0xff]  ;;  %v126_v4 = vld [vmem:[%s4394_s6 + $0x8] sm:$0xff]  ;;  %v125_v5 = vld [vmem:[%s4394_s6] sm:$0xff]  ;;  %s6480_s3 = sld [smem:[%s8018_s0 + %s5697_s30]]   ;;  %s5700_s12 = smov 10  }
   0x9   :  { %v123_v6 = vld [vmem:[%s1_s9] sm:$0xff]  ;;  %v124_v7 = vld [vmem:[%s1_s9 + $0x8] sm:$0xff]  ;;  %s6951_s7 = sld [smem:[%s8018_s0 + %s5698_s4]]   ;;  %s5701_s16 = smov 11  }
   0xa   :  { %149 = vmatpush.msra.mxu0 %v129_v1  ;;  %v5137_v8 = vld [vmem:[%s4395_s17] sm:$0xff]  ;;  %s6967_s11 = sld [smem:[%s8018_s0 + %s5699_s8]]   ;;  %s5702_s20 = smov 12  }
   0xb   :  { %185 = vmatpush.bf16.msra.mxu1 %v5137_v8  ;;  %v4655_v9 = vld [vmem:[%s5748_s21 + $0x1c0] sm:$0xf]  ;;  %v5194_v11 = vld [vmem:[%s5748_s21 + $0x1c4] sm:$0xf]  ;;  %v5195_v14 = vld [vmem:[%s5748_s21 + $0x1cc] sm:$0xf]  ;;  %s6988_s15 = sld [smem:[%s8018_s0 + %s5700_s12]]  }
   0xc   :  { %150 = vmatpush.msra.mxu0 %v128_v2  ;;  %v5198_v10 = vld [vmem:[%s5748_s21 + $0x1dc] sm:$0xf0]  ;;  %v4657_v13 = vld [vmem:[%s5748_s21 + $0x1e0] sm:$0xf0]  ;;  %v4665_v15 = vld [vmem:[%s5748_s21 + $0x1e8] sm:$0xf0]  ;;  %s7026_s19 = sld [smem:[%s8018_s0 + %s5701_s16]]  }
   0xd   :  { %v4656_v12 = vor.u32 %v5198_v10, %v4655_v9  ;;  %v4660_v16 = vor.u32 %v5194_v11, %v4657_v13  ;;  %v5756_v17 = vor.u32 %v5195_v14, %v4665_v15  ;;  %v4623_v18 = vld [vmem:[%s5748_s21 + $0x180] sm:$0xf]  ;;  %v5186_v20 = vld [vmem:[%s5748_s21 + $0x184] sm:$0xf]  ;;  %v5187_v23 = vld [vmem:[%s5748_s21 + $0x18c] sm:$0xf]  ;;  %s7031_s23 = sld [smem:[%s8018_s0 + %s5702_s20]]  }
   0xe   :  { %151 = vmatpush.msra.mxu0 %v127_v3  ;;  %v5190_v19 = vld [vmem:[%s5748_s21 + $0x19c] sm:$0xf0]  ;;  %v4625_v22 = vld [vmem:[%s5748_s21 + $0x1a0] sm:$0xf0]  ;;  %v4633_v24 = vld [vmem:[%s5748_s21 + $0x1a8] sm:$0xf0] }
   0xf   :  { %596 = vmatpush.bf16.msrb.mxu1 %v4656_v12  ;;  %5306 = vmatpush.bf16.msra.mxu2 %v4656_v12  ;;  %v4624_v21 = vor.u32 %v5190_v19, %v4623_v18  ;;  %v4628_v25 = vor.u32 %v5186_v20, %v4625_v22  ;;  %v5765_v26 = vor.u32 %v5187_v23, %v4633_v24  ;;  %v4591_v27 = vld [vmem:[%s5748_s21 + $0x140] sm:$0xf]  ;;  %v5178_v29 = vld [vmem:[%s5748_s21 + $0x144] sm:$0xf]  ;;  %v5179_v31 = vld [vmem:[%s5748_s21 + $0x14c] sm:$0xf] }
  0x10   :  { %152 = vmatpush.msra.mxu0 %v126_v4  ;;  %625 = vmatpush.bf16.msra.mxu3 %v4660_v16  ;;  %v5182_v28 = vld [vmem:[%s5748_s21 + $0x15c] sm:$0xf0]  ;;  %v4593_v30 = vld [vmem:[%s5748_s21 + $0x160] sm:$0xf0]  ;;  %v4601_v32 = vld [vmem:[%s5748_s21 + $0x168] sm:$0xf0] }
  0x11   :  { %v4592_v33 = vor.u32 %v5182_v28, %v4591_v27  ;;  %v4596_v34 = vor.u32 %v5178_v29, %v4593_v30  ;;  %v5774_v35 = vor.u32 %v5179_v31, %v4601_v32  ;;  %v4559_v36 = vld [vmem:[%s5748_s21 + $0x100] sm:$0xf]  ;;  %v5170_v38 = vld [vmem:[%s5748_s21 + $0x104] sm:$0xf]  ;;  %v5171_v40 = vld [vmem:[%s5748_s21 + $0x10c] sm:$0xf] }
  0x12   :  { %153 = vmatpush.msra.mxu0 %v125_v5  ;;  %v5174_v37 = vld [vmem:[%s5748_s21 + $0x11c] sm:$0xf0]  ;;  %v4561_v39 = vld [vmem:[%s5748_s21 + $0x120] sm:$0xf0]  ;;  %v4569_v41 = vld [vmem:[%s5748_s21 + $0x128] sm:$0xf0] }
  0x13   :  { %4422 = vmatmul.msk.f32.vlgmr.msra.gmra.mxu0 %vm131_vm0, %v123_v6  ;;  %597 = vmatpush.bf16.msrb.mxu1 %v4624_v21  ;;  %v4560_v42 = vor.u32 %v5174_v37, %v4559_v36  ;;  %v4564_v43 = vor.u32 %v5170_v38, %v4561_v39  ;;  %v5783_v44 = vor.u32 %v5171_v40, %v4569_v41  ;;  %v4527_v48 = vld [vmem:[%s5748_s21 + $0xc0] sm:$0xf]  ;;  %v5162_v50 = vld [vmem:[%s5748_s21 + $0xc4] sm:$0xf]  ;;  %v5163_v53 = vld [vmem:[%s5748_s21 + $0xcc] sm:$0xf] }
  0x14   :  { %683 = vmatpush.bf16.msrb.mxu0 %v5756_v17  ;;  %5307 = vmatpush.bf16.msra.mxu2 %v4624_v21  ;;  %v5166_v49 = vld [vmem:[%s5748_s21 + $0xdc] sm:$0xf0]  ;;  %v4529_v52 = vld [vmem:[%s5748_s21 + $0xe0] sm:$0xf0]  ;;  %v4537_v54 = vld [vmem:[%s5748_s21 + $0xe8] sm:$0xf0] }
  0x15   :  { %626 = vmatpush.bf16.msra.mxu3 %v4628_v25  ;;  %v4528_v51 = vor.u32 %v5166_v49, %v4527_v48  ;;  %v4532_v55 = vor.u32 %v5162_v50, %v4529_v52  ;;  %v5792_v56 = vor.u32 %v5163_v53, %v4537_v54  ;;  %v4495_v57 = vld [vmem:[%s5748_s21 + $0x80] sm:$0xf]  ;;  %v5154_v60 = vld [vmem:[%s5748_s21 + $0x84] sm:$0xf]  ;;  %v5155_v62 = vld [vmem:[%s5748_s21 + $0x8c] sm:$0xf] }
  0x16   :  { %v5158_v58 = vld [vmem:[%s5748_s21 + $0x9c] sm:$0xf0]  ;;  %v4497_v61 = vld [vmem:[%s5748_s21 + $0xa0] sm:$0xf0]  ;;  %v4505_v0 = vld [vmem:[%s5748_s21 + $0xa8] sm:$0xf0] }
  0x17   :  { %598 = vmatpush.bf16.msrb.mxu1 %v4592_v33  ;;  %v4496_v59 = vor.u32 %v5158_v58, %v4495_v57  ;;  %v4500_v63 = vor.u32 %v5154_v60, %v4497_v61  ;;  %v5801_v1 = vor.u32 %v5155_v62, %v4505_v0  ;;  %v4463_v2 = vld [vmem:[%s5748_s21 + $0x40] sm:$0xf]  ;;  %v5146_v4 = vld [vmem:[%s5748_s21 + $0x44] sm:$0xf]  ;;  %v4473_v8 = vld [vmem:[%s5748_s21 + $0x68] sm:$0xf0] }
  0x18   :  { %684 = vmatpush.bf16.msrb.mxu0 %v5765_v26  ;;  %5308 = vmatpush.bf16.msra.mxu2 %v4592_v33  ;;  %v5150_v3 = vld [vmem:[%s5748_s21 + $0x5c] sm:$0xf0]  ;;  %v4465_v6 = vld [vmem:[%s5748_s21 + $0x60] sm:$0xf0]  ;;  %v5139_v16 = vld [vmem:[%s5748_s21 + $0xc] sm:$0xf] }
  0x19   :  { %627 = vmatpush.bf16.msra.mxu3 %v4596_v34  ;;  %v4464_v5 = vor.u32 %v5150_v3, %v4463_v2  ;;  %v4468_v9 = vor.u32 %v5146_v4, %v4465_v6  ;;  %v4431_v11 = vld [vmem:[%s5748_s21] sm:$0xf]  ;;  %v5138_v14 = vld [vmem:[%s5748_s21 + $0x4] sm:$0xf]  ;;  %v4441_v19 = vld [vmem:[%s5748_s21 + $0x28] sm:$0xf0] }
  0x1a   :  { %v5142_v12 = vld [vmem:[%s5748_s21 + $0x1c] sm:$0xf0]  ;;  %v4433_v15 = vld [vmem:[%s5748_s21 + $0x20] sm:$0xf0]  ;;  %v5819_v20 = vor.u32 %v5139_v16, %v4441_v19  ;;  %v4663_v21 = vld [vmem:[%s5748_s21 + $0x1c8] sm:$0xf] }
  0x1b   :  { %4423 = vmatmul.msk.f32.gmra.mxu0 %vm131_vm0, %v124_v7  ;;  %599 = vmatpush.bf16.msrb.mxu1 %v4560_v42  ;;  %v5147_v7 = vld [vmem:[%s5748_s21 + $0x4c] sm:$0xf]  ;;  %v4432_v13 = vor.u32 %v5142_v12, %v4431_v11  ;;  %v4436_v18 = vor.u32 %v5138_v14, %v4433_v15  ;;  %v5199_v22 = vld [vmem:[%s5748_s21 + $0x1e4] sm:$0xf0]  ;;  %v4671_v23 = vld [vmem:[%s5748_s21 + $0x1d0] sm:$0xf] }
  0x1c   :  { %685 = vmatpush.bf16.msrb.mxu0 %v5774_v35  ;;  %5309 = vmatpush.bf16.msra.mxu2 %v4560_v42  ;;  %v5810_v10 = vor.u32 %v5147_v7, %v4473_v8  ;;  %v4664_v24 = vor.u32 %v5199_v22, %v4663_v21  ;;  %v5200_v25 = vld [vmem:[%s5748_s21 + $0x1ec] sm:$0xf0]  ;;  %v5197_v27 = vld [vmem:[%s5748_s21 + $0x1dc] sm:$0xf]  ;;  %v4631_v31 = vld [vmem:[%s5748_s21 + $0x188] sm:$0xf] }
  0x1d   :  { %628 = vmatpush.bf16.msra.mxu3 %v4564_v43  ;;  %v4681_v28 = vld [vmem:[%s5748_s21 + $0x1f8] sm:$0xf0]  ;;  %v4672_v29 = vor.u32 %v5200_v25, %v4671_v23  ;;  %v5191_v32 = vld [vmem:[%s5748_s21 + $0x1a4] sm:$0xf0]  ;;  %v4639_v33 = vld [vmem:[%s5748_s21 + $0x190] sm:$0xf] }
  0x1e   :  { %v4684_v30 = vor.u32 %v5197_v27, %v4681_v28  ;;  %v4632_v34 = vor.u32 %v5191_v32, %v4631_v31  ;;  %v5192_v36 = vld [vmem:[%s5748_s21 + $0x1ac] sm:$0xf0]  ;;  %v5189_v37 = vld [vmem:[%s5748_s21 + $0x19c] sm:$0xf]  ;;  %v4599_v40 = vld [vmem:[%s5748_s21 + $0x148] sm:$0xf] }
  0x1f   :  { %600 = vmatpush.bf16.msrb.mxu1 %v4528_v51  ;;  %v4649_v38 = vld [vmem:[%s5748_s21 + $0x1b8] sm:$0xf0]  ;;  %v4640_v39 = vor.u32 %v5192_v36, %v4639_v33  ;;  %v5183_v41 = vld [vmem:[%s5748_s21 + $0x164] sm:$0xf0]  ;;  %v4607_v42 = vld [vmem:[%s5748_s21 + $0x150] sm:$0xf] }
  0x20   :  { %686 = vmatpush.bf16.msrb.mxu0 %v5783_v44  ;;  %5310 = vmatpush.bf16.msra.mxu2 %v4528_v51  ;;  %v5184_v43 = vld [vmem:[%s5748_s21 + $0x16c] sm:$0xf0]  ;;  %v4567_v50 = vld [vmem:[%s5748_s21 + $0x108] sm:$0xf]  ;;  %v5173_v54 = vld [vmem:[%s5748_s21 + $0x11c] sm:$0xf] }
  0x21   :  { %629 = vmatpush.bf16.msra.mxu3 %v4532_v55  ;;  %v4608_v48 = vor.u32 %v5184_v43, %v4607_v42  ;;  %v5175_v51 = vld [vmem:[%s5748_s21 + $0x124] sm:$0xf0]  ;;  %v4575_v52 = vld [vmem:[%s5748_s21 + $0x110] sm:$0xf]  ;;  %v4585_v55 = vld [vmem:[%s5748_s21 + $0x138] sm:$0xf0] }
  0x22   :  { %v5176_v53 = vld [vmem:[%s5748_s21 + $0x12c] sm:$0xf0]  ;;  %v4588_v58 = vor.u32 %v5173_v54, %v4585_v55  ;;  %v5165_v62 = vld [vmem:[%s5748_s21 + $0xdc] sm:$0xf]  ;;  %v4503_v4 = vld [vmem:[%s5748_s21 + $0x88] sm:$0xf] }
  0x23   :  { %601 = vmatpush.bf16.msrb.mxu1 %v4496_v59  ;;  %v4576_v57 = vor.u32 %v5176_v53, %v4575_v52  ;;  %v4543_v60 = vld [vmem:[%s5748_s21 + $0xd0] sm:$0xf]  ;;  %v5355_v7 = vld [vmem:[%s5740_s13] ss:$0 sm:$0xff]  ;;  %v5157_v11 = vld [vmem:[%s5748_s21 + $0x9c] sm:$0xf] }
  0x24   :  { %687 = vmatpush.bf16.msrb.mxu0 %v5792_v56  ;;  %5311 = vmatpush.bf16.msra.mxu2 %v4496_v59  ;;  %v5167_v59 = vld [vmem:[%s5748_s21 + $0xe4] sm:$0xf0]  ;;  %v4511_v6 = vld [vmem:[%s5748_s21 + $0x90] sm:$0xf]  ;;  %v4521_v12 = vld [vmem:[%s5748_s21 + $0xb8] sm:$0xf0] }
  0x25   :  { %630 = vmatpush.bf16.msra.mxu3 %v4500_v63  ;;  %v4553_v63 = vld [vmem:[%s5748_s21 + $0xf8] sm:$0xf0]  ;;  %v4471_v14 = vld [vmem:[%s5748_s21 + $0x48] sm:$0xf]  ;;  %v4479_v16 = vld [vmem:[%s5748_s21 + $0x50] sm:$0xf] }
  0x26   :  { %v4556_v3 = vor.u32 %v5165_v62, %v4553_v63  ;;  %v5151_v15 = vld [vmem:[%s5748_s21 + $0x64] sm:$0xf0]  ;;  %v5149_v19 = vld [vmem:[%s5748_s21 + $0x5c] sm:$0xf]  ;;  %v192_v23 = vld [vmem:[%s5853_s25] sm:$0xff]  ;;  %s5704_s24 = smov 13  }
  0x27   :  { %602 = vmatpush.bf16.msrb.mxu1 %v4464_v5  ;;  %v4489_v21 = vld [vmem:[%s5748_s21 + $0x78] sm:$0xf0]  ;;  %v4472_v22 = vor.u32 %v5151_v15, %v4471_v14  ;;  %v4439_v27 = vld [vmem:[%s5748_s21 + $0x8] sm:$0xf]  ;;  %v5144_v31 = vld [vmem:[%s5748_s21 + $0x2c] sm:$0xf0]  ;;  %s7086_s27 = sld [smem:[%s8018_s0 + %s5704_s24]]  }
  0x28   :  { %688 = vmatpush.bf16.msrb.mxu0 %v5801_v1  ;;  %5312 = vmatpush.bf16.msra.mxu2 %v4464_v5  ;;  %v5159_v5 = vld [vmem:[%s5748_s21 + $0xa4] sm:$0xf0]  ;;  %v4492_v25 = vor.u32 %v5149_v19, %v4489_v21  ;;  %v5141_v32 = vld [vmem:[%s5748_s21 + $0x1c] sm:$0xf]  ;;  %v4647_v62 = vld [vmem:[%s5748_s21 + $0x198] sm:$0xf] }
  0x29   :  { %631 = vmatpush.bf16.msra.mxu3 %v4468_v9  ;;  %v4504_v8 = vor.u32 %v5159_v5, %v4503_v4  ;;  %v5160_v9 = vld [vmem:[%s5748_s21 + $0xac] sm:$0xf0]  ;;  %v5143_v28 = vld [vmem:[%s5748_s21 + $0x24] sm:$0xf0]  ;;  %v4457_v33 = vld [vmem:[%s5748_s21 + $0x38] sm:$0xf0] }
  0x2a   :  { %v193_v36 = vld [vmem:[%s5853_s25 + $0x8] sm:$0xff]  ;;  %v4609_v4 = vld [vmem:[%s5748_s21 + $0x170] sm:$0xf0]  ;;  %v4615_v5 = vld [vmem:[%s5748_s21 + $0x158] sm:$0xf]  ;;  %s5705_s28 = smov 14  }
  0x2b   :  { %603 = vmatpush.bf16.msrb.mxu1 %v4432_v13  ;;  %v5164_v15 = vld [vmem:[%s5748_s21 + $0xd4] sm:$0xf]  ;;  %v5169_v21 = vld [vmem:[%s5748_s21 + $0xf4] sm:$0xf0]  ;;  %s4406_s1 = sld [smem:[%s8018_s0 + %s5705_s28]]   ;;  %s5706_s2 = smov 15  }
  0x2c   :  { %689 = vmatpush.bf16.msrb.mxu0 %v5810_v10  ;;  %5313 = vmatpush.bf16.msra.mxu2 %v4432_v13  ;;  %v4524_v13 = vor.u32 %v5157_v11, %v4521_v12  ;;  %v4577_v11 = vld [vmem:[%s5748_s21 + $0x130] sm:$0xf0]  ;;  %v4583_v12 = vld [vmem:[%s5748_s21 + $0x118] sm:$0xf]  ;;  %s7160_s5 = sld [smem:[%s8018_s0 + %s5706_s2]]   ;;  %s5707_s6 = smov 64  }
  0x2d   :  { %632 = vmatpush.bf16.msra.mxu3 %v4436_v18  ;;  %v5152_v18 = vld [vmem:[%s5748_s21 + $0x6c] sm:$0xf0]  ;;  %s5721_s24 = smov 28   ;;  %s5722_s28 = smov 27  }
  0x30   :  { %690 = vmatpush.bf16.msrb.mxu0 %v5819_v20  ;;  %712 = vmatpush.bf16.msrb.mxu2 %v4672_v29  ;;  %v4447_v29 = vld [vmem:[%s5748_s21 + $0x10] sm:$0xf] }
  0x31   :  { %5314 = vmatpush.bf16.msrb.mxu3 %v5756_v17  ;;  %v4652_v17 = vor.u32 %v5189_v37, %v4649_v38  ;;  %v197_v37 = vld [vmem:[%s5853_s25 + $0x28] sm:$0xff] }
  0x34   :  { %799 = vmatpush.bf16.msra.mxu0 %v4684_v30  ;;  %713 = vmatpush.bf16.msrb.mxu2 %v4640_v39  ;;  %v4440_v39 = vor.u32 %v5143_v28, %v4439_v27  ;;  %v5161_v28 = vld [vmem:[%s5748_s21 + $0xb4] sm:$0xf0] }
  0x35   :  { %5315 = vmatpush.bf16.msrb.mxu3 %v5765_v26  ;;  %v4568_v26 = vor.u32 %v5175_v51, %v4567_v50 }
  0x38   :  { %800 = vmatpush.bf16.msra.mxu0 %v4652_v17  ;;  %714 = vmatpush.bf16.msrb.mxu2 %v4608_v48  ;;  %v4448_v17 = vor.u32 %v5144_v31, %v4447_v29  ;;  %v194_v48 = vld [vmem:[%s5853_s25 + $0x10] sm:$0xff] }
  0x39   :  { %5316 = vmatpush.bf16.msrb.mxu3 %v5774_v35  ;;  %v4535_v35 = vld [vmem:[%s5748_s21 + $0xc8] sm:$0xf]  ;;  %v4481_v31 = vld [vmem:[%s5748_s21 + $0x70] sm:$0xf0] }
  0x3a   :  { %v4536_v61 = vor.u32 %v5167_v59, %v4535_v35  ;;  %v5201_v59 = vld [vmem:[%s5748_s21 + $0x1f4] sm:$0xf0] }
  0x3c   :  { %715 = vmatpush.bf16.msrb.mxu2 %v4576_v57  ;;  %v4673_v57 = vld [vmem:[%s5748_s21 + $0x1f0] sm:$0xf0] }
  0x3d   :  { %5317 = vmatpush.bf16.msrb.mxu3 %v5783_v44  ;;  %v5168_v44 = vld [vmem:[%s5748_s21 + $0xec] sm:$0xf0] }
  0x3e   :  { %v4544_v2 = vor.u32 %v5168_v44, %v4543_v60  ;;  %v4641_v44 = vld [vmem:[%s5748_s21 + $0x1b0] sm:$0xf0] }
  0x40   :  { %716 = vmatpush.bf16.msrb.mxu2 %v4544_v2 }
  0x41   :  { %5318 = vmatpush.bf16.msrb.mxu3 %v5792_v56  ;;  %v4512_v56 = vor.u32 %v5160_v9, %v4511_v6  ;;  %v5185_v6 = vld [vmem:[%s5748_s21 + $0x174] sm:$0xf0]  ;;  %v5172_v9 = vld [vmem:[%s5748_s21 + $0x114] sm:$0xf] }
  0x44   :  { %717 = vmatpush.bf16.msrb.mxu2 %v4512_v56  ;;  %v5177_v56 = vld [vmem:[%s5748_s21 + $0x134] sm:$0xf0] }
  0x45   :  { %5319 = vmatpush.bf16.msrb.mxu3 %v5801_v1  ;;  %v196_v1 = vld [vmem:[%s5853_s25 + $0x20] sm:$0xff]  ;;  %v4584_v14 = vor.u32 %v5177_v56, %v4583_v12 }
  0x49   :  { %5320 = vmatpush.bf16.msrb.mxu3 %v5810_v10 }
  0x4d   :  { %5321 = vmatpush.bf16.msrb.mxu3 %v5819_v20  ;;  %v199_v20 = vld [vmem:[%s5853_s25 + $0x38] sm:$0xff] }
  0x90   :  { %v155_v45 = vpop.f32.mrf.mxu0 }
  0x98   :  { %v158_v46 = vpop.f32.mrf.mxu0 }
  0x99   :  { %v161_v47 = vpack.c.bf16 %v158_v46, %v155_v45  ;;  %v5181_v45 = vld [vmem:[%s5748_s21 + $0x15c] sm:$0xf] }
  0x9a   :  { %v4617_v46 = vld [vmem:[%s5748_s21 + $0x178] sm:$0xf0] }
  0x9b   :  { %4428 = vmatmul.msk.bf16.vlgmr.msra.gmra.mxu1 %vm174_vm1, %v161_v47  ;;  %v4600_v47 = vor.u32 %v5183_v41, %v4599_v40  ;;  %v4620_v49 = vor.u32 %v5181_v45, %v4617_v46  ;;  %v4460_v40 = vor.u32 %v5141_v32, %v4457_v33  ;;  %v4487_v32 = vld [vmem:[%s5748_s21 + $0x58] sm:$0xf] }
  0x9c   :  { %654 = vmatpush.bf16.msra.mxu1 %v4664_v24  ;;  %v4480_v24 = vor.u32 %v5152_v18, %v4479_v16  ;;  %v4545_v16 = vld [vmem:[%s5748_s21 + $0xf0] sm:$0xf0]  ;;  %v4551_v18 = vld [vmem:[%s5748_s21 + $0xd8] sm:$0xf] }
  0x9d   :  { %801 = vmatpush.bf16.msra.mxu0 %v4620_v49  ;;  %v198_v49 = vld [vmem:[%s5853_s25 + $0x30] sm:$0xff]  ;;  %v4548_v19 = vor.u32 %v5164_v15, %v4545_v16  ;;  %v5153_v33 = vld [vmem:[%s5748_s21 + $0x74] sm:$0xf0] }
  0x9e   :  { %718 = vmatpush.bf16.msrb.mxu2 %v4480_v24  ;;  %v4513_v24 = vld [vmem:[%s5748_s21 + $0xb0] sm:$0xf0] }
  0xa0   :  { %655 = vmatpush.bf16.msra.mxu1 %v4632_v34 }
  0xa1   :  { %802 = vmatpush.bf16.msra.mxu0 %v4588_v58  ;;  %v4679_v58 = vld [vmem:[%s5748_s21 + $0x1d8] sm:$0xf] }
  0xa2   :  { %719 = vmatpush.bf16.msrb.mxu2 %v4448_v17  ;;  %v4680_v60 = vor.u32 %v5201_v59, %v4679_v58 }
  0xa4   :  { %656 = vmatpush.bf16.msra.mxu1 %v4600_v47  ;;  %v195_v47 = vld [vmem:[%s5853_s25 + $0x18] sm:$0xff] }
  0xa5   :  { %803 = vmatpush.bf16.msra.mxu0 %v4556_v3  ;;  %v5180_v3 = vld [vmem:[%s5748_s21 + $0x154] sm:$0xf] }
  0xa8   :  { %657 = vmatpush.bf16.msra.mxu1 %v4568_v26  ;;  %v5196_v26 = vld [vmem:[%s5748_s21 + $0x1d4] sm:$0xf] }
  0xa9   :  { %804 = vmatpush.bf16.msra.mxu0 %v4524_v13  ;;  %v4676_v35 = vor.u32 %v5196_v26, %v4673_v57  ;;  %v4580_v13 = vor.u32 %v5172_v9, %v4577_v11 }
  0xac   :  { %658 = vmatpush.bf16.msra.mxu1 %v4536_v61  ;;  %v5188_v61 = vld [vmem:[%s5748_s21 + $0x194] sm:$0xf] }
  0xad   :  { %805 = vmatpush.bf16.msra.mxu0 %v4492_v25  ;;  %v4644_v63 = vor.u32 %v5188_v61, %v4641_v44  ;;  %v4519_v25 = vld [vmem:[%s5748_s21 + $0x98] sm:$0xf] }
  0xae   :  { %v4520_v29 = vor.u32 %v5161_v28, %v4519_v25 }
  0xb0   :  { %659 = vmatpush.bf16.msra.mxu1 %v4504_v8  ;;  %v4616_v8 = vor.u32 %v5185_v6, %v4615_v5 }
  0xb1   :  { %806 = vmatpush.bf16.msra.mxu0 %v4460_v40 }
  0xb4   :  { %660 = vmatpush.bf16.msra.mxu1 %v4472_v22  ;;  %v4552_v22 = vor.u32 %v5169_v21, %v4551_v18 }
  0xb8   :  { %661 = vmatpush.bf16.msra.mxu1 %v4440_v39  ;;  %v5145_v39 = vld [vmem:[%s5748_s21 + $0x34] sm:$0xf0] }
 0x118   :  { %v187_v0 = vpop.f32.mrf.mxu1 }
 0x119   :  { %v188_v30 = vadd.f32 %v5355_v7, %v187_v0  ;;  %v5193_v0 = vld [vmem:[%s5748_s21 + $0x1b4] sm:$0xf0] }
 0x11a   :  { %v4648_v2 = vor.u32 %v5193_v0, %v4647_v62 }
 0x11b   :  { %v200_v41 = vmul.f32 %v192_v23, %v188_v30  ;;  %v204_v42 = vmul.f32 %v196_v1, %v188_v30  ;;  %v202_v52 = vmul.f32 %v194_v48, %v188_v30  ;;  %v206_v53 = vmul.f32 %v198_v49, %v188_v30  ;;  %v5156_v23 = vld [vmem:[%s5748_s21 + $0x94] sm:$0xf] }
 0x11c   :  { %v4516_v27 = vor.u32 %v5156_v23, %v4513_v24  ;;  %v5148_v30 = vld [vmem:[%s5748_s21 + $0x54] sm:$0xf] }
 0x11d   :  { %v4484_v1 = vor.u32 %v5148_v30, %v4481_v31 }
 0x120   :  { %v189_v34 = vpop.f32.mrf.mxu1 }
 0x121   :  { %v190_v38 = vadd.f32 %v5355_v7, %v189_v34  ;;  %v4612_v7 = vor.u32 %v5180_v3, %v4609_v4  ;;  %v4488_v34 = vor.u32 %v5153_v33, %v4487_v32 }
 0x123   :  { %v201_v43 = vmul.f32 %v193_v36, %v190_v38  ;;  %v205_v45 = vmul.f32 %v197_v37, %v190_v38  ;;  %v203_v50 = vmul.f32 %v195_v47, %v190_v38  ;;  %v207_v51 = vmul.f32 %v199_v20, %v190_v38  ;;  %v5140_v36 = vld [vmem:[%s5748_s21 + $0x14] sm:$0xf]  ;;  %v4455_v38 = vld [vmem:[%s5748_s21 + $0x18] sm:$0xf] }
 0x124   :  { %v4449_v37 = vld [vmem:[%s5748_s21 + $0x30] sm:$0xf0]  ;;  %v4456_v40 = vor.u32 %v5145_v39, %v4455_v38 }
 0x125   :  { %v5888_v10 = vpack.c.bf16 %v201_v43, %v200_v41  ;;  %v5890_v46 = vpack.c.bf16 %v205_v45, %v204_v42  ;;  %v5900_v54 = vpack.c.bf16 %v203_v50, %v202_v52  ;;  %v5902_v55 = vpack.c.bf16 %v207_v51, %v206_v53 }
 0x126   :  { %v4452_v17 = vor.u32 %v5140_v36, %v4449_v37 }
 0x127   :  { %604 = vmatmul.bf16.vlgmr.msrb.gmra.mxu1 %v5888_v10  ;;  %614 = vmatmul.bf16.vlgmr.msra.gmra.mxu2 %v5890_v46 }
 0x128   :  { %633 = vmatmul.bf16.vlgmr.msra.gmra.mxu3 %v5888_v10  ;;  %691 = vmatmul.bf16.vlgmr.msrb.gmra.mxu0 %v5888_v10 }
 0x129   :  { %741 = vmatpush.bf16.msra.mxu3 %v4676_v35  ;;  %770 = vmatpush.bf16.msrb.mxu1 %v4680_v60 }
 0x12d   :  { %742 = vmatpush.bf16.msra.mxu3 %v4644_v63  ;;  %771 = vmatpush.bf16.msrb.mxu1 %v4648_v2 }
 0x131   :  { %743 = vmatpush.bf16.msra.mxu3 %v4612_v7  ;;  %772 = vmatpush.bf16.msrb.mxu1 %v4616_v8  ;;  %v892_v7 = vld [vmem:[%s4399_s29] sm:$0xff] }
 0x132   :  { %v6013_v11 = vperm.slane %v892_v7, 1  ;;  %v6015_v56 = vperm.slane %v892_v7, 0  ;;  %v6030_v23 = vperm.slane %v892_v7, 3  ;;  %v6046_v37 = vperm.slane %v892_v7, 5 }
 0x135   :  { %744 = vmatpush.bf16.msra.mxu3 %v4580_v13  ;;  %773 = vmatpush.bf16.msrb.mxu1 %v4584_v14  ;;  %v6017_v14 = vperm.slane %v892_v7, 2 }
 0x137   :  { %609 = vmatmul.bf16.gmra.mxu1 %v5900_v54  ;;  %619 = vmatmul.bf16.gmra.mxu2 %v5902_v55 }
 0x138   :  { %638 = vmatmul.bf16.gmra.mxu3 %v5900_v54  ;;  %696 = vmatmul.bf16.gmra.mxu0 %v5900_v54 }
 0x139   :  { %745 = vmatpush.bf16.msra.mxu3 %v4548_v19  ;;  %774 = vmatpush.bf16.msrb.mxu1 %v4552_v22 }
 0x13d   :  { %746 = vmatpush.bf16.msra.mxu3 %v4516_v27  ;;  %775 = vmatpush.bf16.msrb.mxu1 %v4520_v29  ;;  %v6034_v29 = vperm.slane %v892_v7, 4 }
 0x141   :  { %747 = vmatpush.bf16.msra.mxu3 %v4484_v1  ;;  %776 = vmatpush.bf16.msrb.mxu1 %v4488_v34 }
 0x145   :  { %748 = vmatpush.bf16.msra.mxu3 %v4452_v17  ;;  %777 = vmatpush.bf16.msrb.mxu1 %v4456_v40 }
 0x147   :  { %662 = vmatmul.bf16.vlgmr.msra.gmra.mxu1 %v5888_v10  ;;  %720 = vmatmul.bf16.vlgmr.msrb.gmra.mxu2 %v5888_v10 }
 0x148   :  { %643 = vmatmul.bf16.gmra.mxu3 %v5890_v46  ;;  %807 = vmatmul.bf16.vlgmr.msra.gmra.mxu0 %v5888_v10 }
 0x157   :  { %667 = vmatmul.bf16.gmra.mxu1 %v5900_v54  ;;  %725 = vmatmul.bf16.gmra.mxu2 %v5900_v54 }
 0x158   :  { %648 = vmatmul.bf16.gmra.mxu3 %v5902_v55  ;;  %812 = vmatmul.bf16.gmra.mxu0 %v5900_v54 }
 0x167   :  { %672 = vmatmul.bf16.gmra.mxu1 %v5890_v46  ;;  %730 = vmatmul.bf16.gmra.mxu2 %v5890_v46 }
 0x168   :  { %701 = vmatmul.bf16.vlgmr.msrb.gmra.mxu3 %v5890_v46  ;;  %817 = vmatmul.bf16.gmra.mxu0 %v5890_v46 }
 0x177   :  { %677 = vmatmul.bf16.gmra.mxu1 %v5902_v55  ;;  %735 = vmatmul.bf16.gmra.mxu2 %v5902_v55 }
 0x178   :  { %706 = vmatmul.bf16.gmra.mxu3 %v5902_v55  ;;  %822 = vmatmul.bf16.gmra.mxu0 %v5902_v55 }
 0x187   :  { %778 = vmatmul.bf16.vlgmr.msrb.gmra.mxu1 %v5888_v10 }
 0x188   :  { %749 = vmatmul.bf16.vlgmr.msra.gmra.mxu3 %v5888_v10 }
 0x197   :  { %783 = vmatmul.bf16.gmra.mxu1 %v5900_v54 }
 0x198   :  { %754 = vmatmul.bf16.gmra.mxu3 %v5900_v54 }
 0x1a4   :  { %v605_v41 = vpop.f32.mrf.mxu1 }
 0x1a5   :  { %v692_v54 = vpop.f32.mrf.mxu0  ;;  %v828_v12 = vmul.f32 0.17677669, %v605_v41 }
 0x1a6   :  { %v831_v25 = vmul.f32 0.17677669, %v692_v54 }
 0x1a7   :  { %788 = vmatmul.bf16.gmra.mxu1 %v5890_v46  ;;  %v6025_v19 = vadd.f32 %v6015_v56, %v828_v12 }
 0x1a8   :  { %759 = vmatmul.bf16.gmra.mxu3 %v5890_v46  ;;  %v6041_v34 = vadd.f32 %v6030_v23, %v831_v25 }
 0x1aa   :  { %v5974_v46 = vpop.f32.mrf.mxu2 }
 0x1ab   :  { %v634_v42 = vpop.f32.mrf.mxu3 }
 0x1ac   :  { %v607_v43 = vpop.f32.mrf.mxu1  ;;  %v829_v9 = vmul.f32 0.17677669, %v634_v42 }
 0x1ad   :  { %v694_v58 = vpop.f32.mrf.mxu0  ;;  %v836_v30 = vmul.f32 0.17677669, %v607_v43  ;;  %v6055_v43 = vperm.slane %v892_v7, 6 }
 0x1ae   :  { %v6020_v16 = vadd.f32 %v6013_v11, %v829_v9  ;;  %v6060_v9 = vperm.slane %v892_v7, 7 }
 0x1af   :  { %v6049_v38 = vadd.f32 %v6015_v56, %v836_v30 }
 0x1b0   :  { %v974_v27 = vmax.f32 %v6025_v19, %v6020_v16 }
 0x1b2   :  { %v5980_v26 = vpop.f32.mrf.mxu2 }
 0x1b3   :  { %v636_v45 = vpop.f32.mrf.mxu3 }
 0x1b4   :  { %v5962_v47 = vpop.f32.mrf.mxu1  ;;  %v837_v24 = vmul.f32 0.17677669, %v636_v45 }
 0x1b5   :  { %v5992_v61 = vpop.f32.mrf.mxu0 }
 0x1b6   :  { %v6038_v1 = vadd.f32 %v6013_v11, %v837_v24 }
 0x1b7   :  { %793 = vmatmul.bf16.gmra.mxu1 %v5902_v55 }
 0x1b8   :  { %764 = vmatmul.bf16.gmra.mxu3 %v5902_v55  ;;  %v983_v54 = vmax.f32 %v6049_v38, %v6038_v1 }
 0x1ba   :  { %v5986_v35 = vpop.f32.mrf.mxu2 }
 0x1bb   :  { %v5966_v20 = vpop.f32.mrf.mxu3 }
 0x1bc   :  { %v5968_v10 = vpop.f32.mrf.mxu1 }
 0x1bd   :  { %v6000_v0 = vpop.f32.mrf.mxu0 }
 0x1c2   :  { %v5998_v63 = vpop.f32.mrf.mxu2 }
 0x1c3   :  { %v5970_v48 = vpop.f32.mrf.mxu3 }
 0x1c4   :  { %v663_v49 = vpop.f32.mrf.mxu1 }
 0x1c5   :  { %v808_v8 = vpop.f32.mrf.mxu0  ;;  %v830_v13 = vmul.f32 0.17677669, %v663_v49 }
 0x1c6   :  { %v835_v12 = vmul.f32 0.17677669, %v808_v8 }
 0x1c7   :  { %v6028_v21 = vadd.f32 %v6017_v14, %v830_v13 }
 0x1c9   :  { %v975_v33 = vmax.f32 %v974_v27, %v6028_v21 }
 0x1ca   :  { %v721_v4 = vpop.f32.mrf.mxu2 }
 0x1cb   :  { %v5972_v50 = vpop.f32.mrf.mxu3  ;;  %v832_v28 = vmul.f32 0.17677669, %v721_v4  ;;  %v976_v41 = vmax.f32 %v975_v33, %v6041_v34  ;;  %v845_v4 = vmul.f32 0.17677669, %v5966_v20 }
 0x1cc   :  { %v665_v51 = vpop.f32.mrf.mxu1 }
 0x1cd   :  { %v838_v31 = vmul.f32 0.17677669, %v665_v51  ;;  %v810_v32 = vpop.f32.mrf.mxu0  ;;  %v6044_v36 = vadd.f32 %v6034_v29, %v832_v28  ;;  %v839_v51 = vmul.f32 0.17677669, %v694_v58  ;;  %v6077_v8 = vadd.f32 %v6013_v11, %v845_v4 }
 0x1ce   :  { %v847_v4 = vmul.f32 0.17677669, %v5992_v61 }
 0x1cf   :  { %v6052_v39 = vadd.f32 %v6017_v14, %v838_v31  ;;  %v977_v13 = vmax.f32 %v976_v41, %v6044_v36  ;;  %v6074_v7 = vadd.f32 %v6030_v23, %v839_v51  ;;  %8057 = vst [vmem:[#allocation4_spill] sm:$0xff] %v6077_v8 }
 0x1d1   :  { %v984_v27 = vmax.f32 %v983_v54, %v6052_v39 }
 0x1d2   :  { %v723_v15 = vpop.f32.mrf.mxu2 }
 0x1d3   :  { %v5976_v52 = vpop.f32.mrf.mxu3  ;;  %v840_v24 = vmul.f32 0.17677669, %v723_v15  ;;  %v985_v33 = vmax.f32 %v984_v27, %v6074_v7 }
 0x1d4   :  { %v5978_v53 = vpop.f32.mrf.mxu1 }
 0x1d5   :  { %v846_v58 = vmul.f32 0.17677669, %v5978_v53  ;;  %v813_v15 = vpop.f32.mrf.mxu0  ;;  %v6080_v30 = vadd.f32 %v6034_v29, %v840_v24 }
 0x1d7   :  { %v6091_v41 = vadd.f32 %v6017_v14, %v846_v58  ;;  %v986_v27 = vmax.f32 %v985_v33, %v6080_v30 }
 0x1d9   :  { %8059 = vst [vmem:[#allocation6_spill] sm:$0xff] %v6091_v41 }
 0x1da   :  { %v726_v17 = vpop.f32.mrf.mxu2 }
 0x1db   :  { %v5982_v55 = vpop.f32.mrf.mxu3 }
 0x1dc   :  { %v5984_v57 = vpop.f32.mrf.mxu1 }
 0x1e2   :  { %v728_v24 = vpop.f32.mrf.mxu2 }
 0x1e3   :  { %v5988_v59 = vpop.f32.mrf.mxu3 }
 0x1e4   :  { %v5990_v60 = vpop.f32.mrf.mxu1 }
 0x1eb   :  { %v5994_v44 = vpop.f32.mrf.mxu3 }
 0x1ec   :  { %v5996_v62 = vpop.f32.mrf.mxu1 }
 0x1f3   :  { %v6002_v2 = vpop.f32.mrf.mxu3 }
 0x1f4   :  { %v6004_v3 = vpop.f32.mrf.mxu1 }
 0x1fb   :  { %v6009_v5 = vpop.f32.mrf.mxu3 }
 0x1fc   :  { %v6011_v6 = vpop.f32.mrf.mxu1 }
 0x203   :  { %v6022_v18 = vpop.f32.mrf.mxu3 }
 0x204   :  { %v779_v22 = vpop.f32.mrf.mxu1 }
 0x205   :  { %v834_v42 = vmul.f32 0.17677669, %v779_v22  ;;  %v844_v22 = vmul.f32 0.17677669, %v5962_v47  ;;  %v6083_v47 = vadd.f32 %v6060_v9, %v835_v12 }
 0x207   :  { %v6070_v28 = vadd.f32 %v6055_v43, %v834_v42  ;;  %v6087_v31 = vadd.f32 %v6015_v56, %v844_v22  ;;  %v843_v22 = vmul.f32 0.17677669, %v810_v32 }
 0x209   :  { %8058 = vst [vmem:[#allocation5_spill] sm:$0xff] %v6087_v31  ;;  %v992_v12 = vmax.f32 %v6087_v31, %v6077_v8  ;;  %v851_v8 = vmul.f32 0.17677669, %v813_v15  ;;  %v856_v31 = vmul.f32 0.17677669, %v728_v24 }
 0x20b   :  { %v750_v40 = vpop.f32.mrf.mxu3  ;;  %v993_v61 = vmax.f32 %v992_v12, %v6091_v41 }
 0x20c   :  { %v833_v45 = vmul.f32 0.17677669, %v750_v40  ;;  %v781_v49 = vpop.f32.mrf.mxu1 }
 0x20d   :  { %v842_v42 = vmul.f32 0.17677669, %v781_v49  ;;  %v852_v49 = vmul.f32 0.17677669, %v5968_v10  ;;  %v6119_v10 = vadd.f32 %v6060_v9, %v843_v22  ;;  %v855_v22 = vmul.f32 0.17677669, %v6000_v0 }
 0x20e   :  { %v6064_v25 = vadd.f32 %v6046_v37, %v833_v45  ;;  %v862_v0 = vmul.f32 0.17677669, %v5990_v60 }
 0x20f   :  { %v6146_v15 = vadd.f32 %v6030_v23, %v855_v22 }
 0x210   :  { %v978_v20 = vmax.f32 %v977_v13, %v6064_v25  ;;  %v853_v13 = vmul.f32 0.17677669, %v5970_v48 }
 0x212   :  { %v979_v53 = vmax.f32 %v978_v20, %v6070_v28  ;;  %v848_v20 = vmul.f32 0.17677669, %v726_v17  ;;  %v6110_v32 = vadd.f32 %v6013_v11, %v853_v13  ;;  %v6113_v17 = vadd.f32 %v6030_v23, %v847_v4 }
 0x213   :  { %v752_v40 = vpop.f32.mrf.mxu3 }
 0x214   :  { %v841_v45 = vmul.f32 0.17677669, %v752_v40  ;;  %v784_v51 = vpop.f32.mrf.mxu1  ;;  %v980_v54 = vmax.f32 %v979_v53, %v6083_v47  ;;  %v854_v53 = vmul.f32 0.17677669, %v5984_v57  ;;  %v6106_v40 = vadd.f32 %v6055_v43, %v842_v42  ;;  %8061 = vst [vmem:[#allocation8_spill] sm:$0xff] %v6110_v32 }
 0x215   :  { %v6116_v33 = vadd.f32 %v6034_v29, %v848_v20  ;;  %v994_v13 = vmax.f32 %v993_v61, %v6113_v17  ;;  %v850_v4 = vmul.f32 0.17677669, %v784_v51  ;;  %v860_v51 = vmul.f32 0.17677669, %v5974_v46 }
 0x216   :  { %v6100_v58 = vadd.f32 %v6046_v37, %v841_v45  ;;  %981 = vmax.xlane.f32.xlu0 %v980_v54  ;;  %8060 = vst [vmem:[#allocation7_spill] sm:$0xff] %v6106_v40  ;;  %v6123_v45 = vadd.f32 %v6015_v56, %v852_v49  ;;  %v6126_v42 = vadd.f32 %v6017_v14, %v854_v53  ;;  %v815_v54 = vpop.f32.mrf.mxu0  ;;  %v861_v49 = vmul.f32 0.17677669, %v5972_v50 }
 0x217   :  { %v995_v53 = vmax.f32 %v994_v13, %v6116_v33  ;;  %v6152_v13 = vadd.f32 %v6034_v29, %v856_v31  ;;  %v863_v46 = vmul.f32 0.17677669, %v5994_v44 }
 0x218   :  { %v987_v48 = vmax.f32 %v986_v27, %v6100_v58  ;;  %8062 = vst [vmem:[#allocation9_spill] sm:$0xff] %v6126_v42  ;;  %v6149_v24 = vadd.f32 %v6013_v11, %v861_v49 }
 0x21a   :  { %v988_v57 = vmax.f32 %v987_v48, %v6106_v40  ;;  %v1001_v48 = vmax.f32 %v6123_v45, %v6110_v32  ;;  %8063 = vst [vmem:[#allocation10_spill] sm:$0xff] %v6149_v24  ;;  %v859_v32 = vmul.f32 0.17677669, %v815_v54 }
 0x21b   :  { %v755_v12 = vpop.f32.mrf.mxu3 }
 0x21c   :  { %v849_v27 = vmul.f32 0.17677669, %v755_v12  ;;  %v786_v41 = vpop.f32.mrf.mxu1  ;;  %v989_v20 = vmax.f32 %v988_v57, %v6119_v10  ;;  %v1002_v61 = vmax.f32 %v1001_v48, %v6126_v42  ;;  %v731_v57 = vpop.f32.mrf.mxu2  ;;  %v6142_v12 = vadd.f32 %v6055_v43, %v850_v4 }
 0x21d   :  { %v6160_v4 = vadd.f32 %v6015_v56, %v860_v51  ;;  %v6164_v48 = vadd.f32 %v6017_v14, %v862_v0  ;;  %v858_v49 = vmul.f32 0.17677669, %v786_v41  ;;  %v868_v41 = vmul.f32 0.17677669, %v5980_v26 }
 0x21e   :  { %v6136_v40 = vadd.f32 %v6046_v37, %v849_v27  ;;  %990 = vmax.xlane.f32.xlu0 %v989_v20  ;;  %v6156_v27 = vadd.f32 %v6060_v9, %v851_v8  ;;  %v1003_v20 = vmax.f32 %v1002_v61, %v6146_v15  ;;  %v869_v8 = vmul.f32 0.17677669, %v5976_v52 }
 0x21f   :  { %8064 = vst [vmem:[#allocation11_spill] sm:$0xff] %v6160_v4  ;;  %v1010_v44 = vmax.f32 %v6160_v4, %v6149_v24  ;;  %v6172_v61 = vadd.f32 %v6030_v23, %v863_v46  ;;  %v870_v24 = vmul.f32 0.17677669, %v5996_v62  ;;  %v6181_v52 = vadd.f32 %v6055_v43, %v858_v49 }
 0x220   :  { %v996_v50 = vmax.f32 %v995_v53, %v6136_v40  ;;  %8065 = vst [vmem:[#allocation12_spill] sm:$0xff] %v6164_v48  ;;  %v1004_v51 = vmax.f32 %v1003_v20, %v6152_v13  ;;  %v6185_v20 = vadd.f32 %v6013_v11, %v869_v8  ;;  %v6190_v26 = vadd.f32 %v6060_v9, %v859_v32 }
 0x221   :  { %8066 = vst [vmem:[#allocation13_spill] sm:$0xff] %v6172_v61  ;;  %v6194_v62 = vadd.f32 %v6015_v56, %v868_v41  ;;  %v6200_v8 = vadd.f32 %v6017_v14, %v870_v24  ;;  %v877_v32 = vmul.f32 0.17677669, %v5982_v55  ;;  %v876_v24 = vmul.f32 0.17677669, %v5986_v35 }
 0x222   :  { %v997_v60 = vmax.f32 %v996_v50, %v6142_v12  ;;  %v818_v50 = vpop.f32.mrf.mxu0  ;;  %8067 = vst [vmem:[#allocation14_spill] sm:$0xff] %v6185_v20 }
 0x223   :  { %v757_v22 = vpop.f32.mrf.mxu3  ;;  %8068 = vst [vmem:[#allocation15_spill] sm:$0xff] %v6200_v8 }
 0x224   :  { %v857_v53 = vmul.f32 0.17677669, %v757_v22  ;;  %v789_v31 = vpop.f32.mrf.mxu1  ;;  %v998_v42 = vmax.f32 %v997_v60, %v6156_v27  ;;  %v864_v22 = vmul.f32 0.17677669, %v731_v57  ;;  %v1011_v60 = vmax.f32 %v1010_v44, %v6164_v48  ;;  %v733_v46 = vpop.f32.mrf.mxu2 }
 0x226   :  { %v6175_v0 = vadd.f32 %v6046_v37, %v857_v53  ;;  %999 = vmax.xlane.f32.xlu1 %v998_v42  ;;  %v1012_v53 = vmax.f32 %v1011_v60, %v6172_v61  ;;  %v871_v42 = vmul.f32 0.17677669, %v6002_v2  ;;  %v6197_v49 = vadd.f32 %v6034_v29, %v864_v22 }
 0x227   :  { %v1019_v2 = vmax.f32 %v6194_v62, %v6185_v20  ;;  %v867_v61 = vmul.f32 0.17677669, %v818_v50  ;;  %v878_v20 = vmul.f32 0.17677669, %v6004_v3 }
 0x228   :  { %v1005_v54 = vmax.f32 %v1004_v51, %v6175_v0  ;;  %v866_v51 = vmul.f32 0.17677669, %v789_v31  ;;  %v1013_v41 = vmax.f32 %v1012_v53, %v6197_v49  ;;  %v6208_v22 = vadd.f32 %v6030_v23, %v871_v42 }
 0x229   :  { %v6221_v53 = vadd.f32 %v6013_v11, %v877_v32  ;;  %v879_v42 = vmul.f32 0.17677669, %v6009_v5  ;;  %v6226_v35 = vadd.f32 %v6060_v9, %v867_v61  ;;  %v6236_v32 = vadd.f32 %v6017_v14, %v878_v20 }
 0x22a   :  { %v1006_v57 = vmax.f32 %v1005_v54, %v6181_v52  ;;  %8069 = vst [vmem:[#allocation16_spill] sm:$0xff] %v6208_v22  ;;  %v820_v31 = vpop.f32.mrf.mxu0  ;;  %v6217_v55 = vadd.f32 %v6055_v43, %v866_v51  ;;  %v884_v20 = vmul.f32 0.17677669, %v5998_v63 }
 0x22b   :  { %v760_v44 = vpop.f32.mrf.mxu3  ;;  %8070 = vst [vmem:[#allocation17_spill] sm:$0xff] %v6221_v53 }
 0x22c   :  { %v865_v48 = vmul.f32 0.17677669, %v760_v44  ;;  %v1007_v60 = vmax.f32 %v1006_v57, %v6190_v26  ;;  %v791_v54 = vpop.f32.mrf.mxu1  ;;  %v872_v57 = vmul.f32 0.17677669, %v733_v46  ;;  %v1020_v44 = vmax.f32 %v1019_v2, %v6200_v8  ;;  %v736_v51 = vpop.f32.mrf.mxu2 }
 0x22e   :  { %v6211_v4 = vadd.f32 %v6046_v37, %v865_v48  ;;  %1008 = vmax.xlane.f32.xlu1 %v1007_v60  ;;  %v1021_v48 = vmax.f32 %v1020_v44, %v6208_v22  ;;  %v6230_v60 = vadd.f32 %v6015_v56, %v876_v24  ;;  %v6233_v3 = vadd.f32 %v6034_v29, %v872_v57 }
 0x22f   :  { %v875_v22 = vmul.f32 0.17677669, %v820_v31  ;;  %v6244_v57 = vadd.f32 %v6030_v23, %v879_v42 }
 0x230   :  { %v1014_v50 = vmax.f32 %v1013_v41, %v6211_v4  ;;  %v874_v41 = vmul.f32 0.17677669, %v791_v54  ;;  %v1028_v61 = vmax.f32 %v6230_v60, %v6221_v53  ;;  %v1022_v24 = vmax.f32 %v1021_v48, %v6233_v3 }
 0x231   :  { %8071 = vst [vmem:[#allocation18_spill] sm:$0xff] %v6244_v57  ;;  %v880_v54 = vmul.f32 0.17677669, %v736_v51  ;;  %v886_v53 = vmul.f32 0.17677669, %v6011_v6  ;;  %v6262_v63 = vadd.f32 %v6060_v9, %v875_v22  ;;  %v6266_v6 = vadd.f32 %v6015_v56, %v884_v20 }
 0x232   :  { %v1015_v46 = vmax.f32 %v1014_v50, %v6217_v55  ;;  %v885_v50 = vmul.f32 0.17677669, %v5988_v59  ;;  %v6253_v59 = vadd.f32 %v6055_v43, %v874_v41  ;;  %v823_v42 = vpop.f32.mrf.mxu0 }
 0x233   :  { %v762_v2 = vpop.f32.mrf.mxu3  ;;  %v6269_v41 = vadd.f32 %v6034_v29, %v880_v54 }
 0x234   :  { %v873_v44 = vmul.f32 0.17677669, %v762_v2  ;;  %v1016_v5 = vmax.f32 %v1015_v46, %v6226_v35  ;;  %v794_v2 = vpop.f32.mrf.mxu1  ;;  %v1029_v46 = vmax.f32 %v1028_v61, %v6236_v32  ;;  %v6257_v48 = vadd.f32 %v6013_v11, %v885_v50  ;;  %v738_v22 = vpop.f32.mrf.mxu2 }
 0x235   :  { %v6272_v11 = vadd.f32 %v6017_v14, %v886_v53  ;;  %v882_v50 = vmul.f32 0.17677669, %v794_v2  ;;  %v888_v53 = vmul.f32 0.17677669, %v738_v22 }
 0x236   :  { %v6247_v8 = vadd.f32 %v6046_v37, %v873_v44  ;;  %1017 = vmax.xlane.f32.xlu2 %v1016_v5  ;;  %v1030_v44 = vmax.f32 %v1029_v46, %v6244_v57  ;;  %v887_v5 = vmul.f32 0.17677669, %v6022_v18  ;;  %v1037_v18 = vmax.f32 %v6266_v6, %v6257_v48 }
 0x237   :  { %8072 = vst [vmem:[#allocation19_spill] sm:$0xff] %v6272_v11  ;;  %v883_v57 = vmul.f32 0.17677669, %v823_v42  ;;  %v6286_v54 = vadd.f32 %v6055_v43, %v882_v50 }
 0x238   :  { %v1023_v31 = vmax.f32 %v1022_v24, %v6247_v8  ;;  %v6279_v56 = vadd.f32 %v6030_v23, %v887_v5  ;;  %v1038_v14 = vmax.f32 %v1037_v18, %v6272_v11 }
 0x239   :  { %v6290_v42 = vadd.f32 %v6060_v9, %v883_v57 }
 0x23a   :  { %v1024_v51 = vmax.f32 %v1023_v31, %v6253_v59  ;;  %v1031_v31 = vmax.f32 %v1030_v44, %v6269_v41  ;;  %v1039_v44 = vmax.f32 %v1038_v14, %v6279_v56  ;;  %v825_v5 = vpop.f32.mrf.mxu0 }
 0x23b   :  { %v765_v61 = vpop.f32.mrf.mxu3  ;;  %v891_v22 = vmul.f32 0.17677669, %v825_v5 }
 0x23c   :  { %v881_v24 = vmul.f32 0.17677669, %v765_v61  ;;  %v1025_v46 = vmax.f32 %v1024_v51, %v6262_v63  ;;  %v796_v51 = vpop.f32.mrf.mxu1 }
 0x23e   :  { %v6282_v20 = vadd.f32 %v6046_v37, %v881_v24  ;;  %1026 = vmax.xlane.f32.xlu2 %v1025_v46  ;;  %v6295_v24 = vadd.f32 %v6034_v29, %v888_v53  ;;  %v890_v46 = vmul.f32 0.17677669, %v796_v51 }
 0x240   :  { %v1032_v2 = vmax.f32 %v1031_v31, %v6282_v20  ;;  %v1040_v31 = vmax.f32 %v1039_v44, %v6295_v24  ;;  %v6303_v57 = vadd.f32 %v6055_v43, %v890_v46 }
 0x242   :  { %v1033_v23 = vmax.f32 %v1032_v2, %v6286_v54  ;;  %v6307_v2 = vadd.f32 %v6060_v9, %v891_v22 }
 0x243   :  { %v767_v61 = vpop.f32.mrf.mxu3 }
 0x244   :  { %v889_v18 = vmul.f32 0.17677669, %v767_v61  ;;  %v1034_v50 = vmax.f32 %v1033_v23, %v6290_v42 }
 0x246   :  { %v6300_v11 = vadd.f32 %v6046_v37, %v889_v18  ;;  %1035 = vmax.xlane.f32.xlu0 %v1034_v50 }
 0x248   :  { %v1041_v14 = vmax.f32 %v1040_v31, %v6300_v11 }
 0x24a   :  { %v1042_v29 = vmax.f32 %v1041_v14, %v6303_v57 }
 0x24c   :  { %v1043_v53 = vmax.f32 %v1042_v29, %v6307_v2 }
 0x24e   :  { %1044 = vmax.xlane.f32.xlu1 %v1043_v53 }
 0x289   :  { %v982_v51 = vpop.xlane.xlu0 %981 }
 0x28a   :  { %v1046_v44 = vsub.f32 %v6025_v19, %v982_v51  ;;  %v1047_v37 = vsub.f32 %v6020_v16, %v982_v51  ;;  %v1048_v23 = vsub.f32 %v6028_v21, %v982_v51  ;;  %v1049_v43 = vsub.f32 %v6041_v34, %v982_v51 }
 0x28b   :  { %v1050_v5 = vsub.f32 %v6044_v36, %v982_v51  ;;  %v1051_v61 = vsub.f32 %v6064_v25, %v982_v51  ;;  %v1052_v18 = vsub.f32 %v6070_v28, %v982_v51  ;;  %v1053_v22 = vsub.f32 %v6083_v47, %v982_v51 }
 0x28c   :  { %v1110_v9 = vmul.f32 1.442695, %v1046_v44  ;;  %v1112_v46 = vmul.f32 1.442695, %v1047_v37  ;;  %v1114_v50 = vmul.f32 1.442695, %v1048_v23 }
 0x28d   :  { %v1116_v31 = vmul.f32 1.442695, %v1049_v43  ;;  %v1118_v19 = vmul.f32 1.442695, %v1050_v5  ;;  %v1120_v16 = vmul.f32 1.442695, %v1051_v61 }
 0x28e   :  { %5367 = vpow2.f32 %v1110_v9  ;;  %v1122_v21 = vmul.f32 1.442695, %v1052_v18  ;;  %v1124_v34 = vmul.f32 1.442695, %v1053_v22  ;;  %v8073_v23 = vld [vmem:[#allocation7_spill] sm:$0xff] }
 0x28f   :  { %5369 = vpow2.f32 %v1112_v46 }
 0x290   :  { %5371 = vpow2.f32 %v1114_v50 }
 0x291   :  { %v991_v14 = vpop.xlane.xlu0 %990  ;;  %5373 = vpow2.f32 %v1116_v31 }
 0x292   :  { %v1054_v36 = vsub.f32 %v6049_v38, %v991_v14  ;;  %v1055_v25 = vsub.f32 %v6038_v1, %v991_v14  ;;  %5375 = vpow2.f32 %v1118_v19  ;;  %v1056_v28 = vsub.f32 %v6052_v39, %v991_v14 }
 0x293   :  { %5377 = vpow2.f32 %v1120_v16  ;;  %v1057_v47 = vsub.f32 %v6074_v7, %v991_v14  ;;  %v1058_v29 = vsub.f32 %v6080_v30, %v991_v14  ;;  %v1059_v53 = vsub.f32 %v6100_v58, %v991_v14  ;;  %v8074_v16 = vld [vmem:[#allocation5_spill] sm:$0xff] }
 0x294   :  { %v6325_v51 = vpop.eup %5367  ;;  %v1126_v44 = vmul.f32 1.442695, %v1054_v36  ;;  %v1128_v37 = vmul.f32 1.442695, %v1055_v25  ;;  %5379 = vpow2.f32 %v1122_v21  ;;  %v1060_v43 = vsub.f32 %v8073_v23, %v991_v14 }
 0x295   :  { %v6328_v38 = vpop.eup %5369  ;;  %5381 = vpow2.f32 %v1124_v34  ;;  %v1061_v1 = vsub.f32 %v6119_v10, %v991_v14  ;;  %v1130_v39 = vmul.f32 1.442695, %v1056_v28  ;;  %v1132_v5 = vmul.f32 1.442695, %v1057_v47  ;;  %v8075_v14 = vld [vmem:[#allocation4_spill] sm:$0xff]  ;;  %v8076_v28 = vld [vmem:[#allocation6_spill] sm:$0xff] }
 0x296   :  { %v6331_v61 = vpop.eup %5371  ;;  %v1238_v7 = vadd.f32 %v6328_v38, %v6325_v51  ;;  %5383 = vpow2.f32 %v1126_v44  ;;  %v1134_v30 = vmul.f32 1.442695, %v1058_v29  ;;  %v1136_v9 = vmul.f32 1.442695, %v1059_v53 }
 0x297   :  { %v6335_v58 = vpop.eup %5373  ;;  %5385 = vpow2.f32 %v1128_v37  ;;  %v1138_v50 = vmul.f32 1.442695, %v1060_v43  ;;  %v1140_v31 = vmul.f32 1.442695, %v1061_v1 }
 0x298   :  { %v6337_v46 = vpop.eup %5375  ;;  %v1239_v18 = vadd.f32 %v6331_v61, %v1238_v7  ;;  %5387 = vpow2.f32 %v1130_v39 }
 0x299   :  { %v6340_v10 = vpop.eup %5377  ;;  %v1000_v22 = vpop.xlane.xlu1 %999  ;;  %5389 = vpow2.f32 %v1132_v5 }
 0x29a   :  { %v6342_v19 = vpop.eup %5379  ;;  %v1062_v21 = vsub.f32 %v8074_v16, %v1000_v22  ;;  %v1063_v34 = vsub.f32 %v8075_v14, %v1000_v22  ;;  %v1240_v36 = vadd.f32 %v6335_v58, %v1239_v18  ;;  %5391 = vpow2.f32 %v1134_v30 }
 0x29b   :  { %v6347_v25 = vpop.eup %5381  ;;  %5393 = vpow2.f32 %v1136_v9  ;;  %v1064_v47 = vsub.f32 %v8076_v28, %v1000_v22  ;;  %v1065_v29 = vsub.f32 %v6113_v17, %v1000_v22  ;;  %v1066_v53 = vsub.f32 %v6116_v33, %v1000_v22 }
 0x29c   :  { %v6352_v44 = vpop.eup %5383  ;;  %v1142_v37 = vmul.f32 1.442695, %v1062_v21  ;;  %v1144_v23 = vmul.f32 1.442695, %v1063_v34  ;;  %v1241_v43 = vadd.f32 %v6337_v46, %v1240_v36  ;;  %5395 = vpow2.f32 %v1138_v50 }
 0x29d   :  { %v6355_v1 = vpop.eup %5385  ;;  %5397 = vpow2.f32 %v1140_v31  ;;  %v1067_v39 = vsub.f32 %v6136_v40, %v1000_v22  ;;  %v1068_v5 = vsub.f32 %v6142_v12, %v1000_v22  ;;  %v1069_v7 = vsub.f32 %v6156_v27, %v1000_v22 }
 0x29e   :  { %v6360_v30 = vpop.eup %5387  ;;  %v1242_v17 = vadd.f32 %v6340_v10, %v1241_v43  ;;  %v1247_v33 = vadd.f32 %v6355_v1, %v6352_v44  ;;  %5399 = vpow2.f32 %v1142_v37  ;;  %v1146_v9 = vmul.f32 1.442695, %v1064_v47  ;;  %v8077_v47 = vld [vmem:[#allocation8_spill] sm:$0xff]  ;;  %v8078_v43 = vld [vmem:[#allocation9_spill] sm:$0xff] }
 0x29f   :  { %v6365_v18 = vpop.eup %5389  ;;  %5401 = vpow2.f32 %v1144_v23  ;;  %v1148_v50 = vmul.f32 1.442695, %v1065_v29  ;;  %v1150_v31 = vmul.f32 1.442695, %v1066_v53  ;;  %v1152_v27 = vmul.f32 1.442695, %v1067_v39 }
 0x2a0   :  { %v6367_v16 = vpop.eup %5391  ;;  %v1243_v40 = vadd.f32 %v6342_v19, %v1242_v17  ;;  %v1248_v12 = vadd.f32 %v6360_v30, %v1247_v33  ;;  %5403 = vpow2.f32 %v1146_v9  ;;  %v1154_v14 = vmul.f32 1.442695, %v1068_v5 }
 0x2a1   :  { %v6371_v22 = vpop.eup %5393  ;;  %v1009_v21 = vpop.xlane.xlu1 %1008  ;;  %5405 = vpow2.f32 %v1148_v50  ;;  %v1156_v34 = vmul.f32 1.442695, %v1069_v7 }
 0x2a2   :  { %v6373_v36 = vpop.eup %5395  ;;  %v1070_v28 = vsub.f32 %v6123_v45, %v1009_v21  ;;  %v1071_v29 = vsub.f32 %v8077_v47, %v1009_v21  ;;  %v1244_v53 = vadd.f32 %v6347_v25, %v1243_v40  ;;  %v1249_v37 = vadd.f32 %v6365_v18, %v1248_v12 }
 0x2a3   :  { %v6379_v23 = vpop.eup %5397  ;;  %5407 = vpow2.f32 %v1150_v31  ;;  %v1072_v39 = vsub.f32 %v8078_v43, %v1009_v21  ;;  %v1073_v17 = vsub.f32 %v6146_v15, %v1009_v21  ;;  %v1074_v5 = vsub.f32 %v6152_v13, %v1009_v21 }
 0x2a4   :  { %v6384_v7 = vpop.eup %5399  ;;  %v1158_v33 = vmul.f32 1.442695, %v1070_v28  ;;  %v1160_v9 = vmul.f32 1.442695, %v1071_v29  ;;  %1245 = vadd.xlane.f32.xlu2 %v1244_v53  ;;  %v1250_v45 = vadd.f32 %v6367_v16, %v1249_v37  ;;  %5409 = vpow2.f32 %v1152_v27 }
 0x2a5   :  { %v6387_v50 = vpop.eup %5401  ;;  %5411 = vpow2.f32 %v1154_v14  ;;  %v1075_v40 = vsub.f32 %v6175_v0, %v1009_v21  ;;  %v1076_v31 = vsub.f32 %v6181_v52, %v1009_v21  ;;  %v1162_v28 = vmul.f32 1.442695, %v1072_v39 }
 0x2a6   :  { %v6391_v12 = vpop.eup %5403  ;;  %v1251_v15 = vadd.f32 %v6371_v22, %v1250_v45  ;;  %5413 = vpow2.f32 %v1156_v34  ;;  %v1256_v13 = vadd.f32 %v6387_v50, %v6384_v7  ;;  %v1077_v27 = vsub.f32 %v6190_v26, %v1009_v21  ;;  %v8080_v45 = vld [vmem:[#allocation11_spill] sm:$0xff]  ;;  %v8081_v21 = vld [vmem:[#allocation10_spill] sm:$0xff] }
 0x2a7   :  { %8079 = vst [vmem:[#allocation7_spill] sm:$0xff] %v6391_v12  ;;  %v6396_v47 = vpop.eup %5405  ;;  %5415 = vpow2.f32 %v1158_v33  ;;  %v1164_v29 = vmul.f32 1.442695, %v1073_v17  ;;  %v1166_v52 = vmul.f32 1.442695, %v1074_v5 }
 0x2a8   :  { %v1252_v14 = vadd.f32 %v6373_v36, %v1251_v15  ;;  %v1257_v0 = vadd.f32 %v6391_v12, %v1256_v13  ;;  %5417 = vpow2.f32 %v1160_v9  ;;  %v1168_v34 = vmul.f32 1.442695, %v1075_v40  ;;  %v8083_v13 = vld [vmem:[#allocation12_spill] sm:$0xff] }
 0x2a9   :  { %v6401_v53 = vpop.eup %5407  ;;  %v6403_v37 = vpop.xlane.xlu2 %1017  ;;  %5419 = vpow2.f32 %v1162_v28  ;;  %v1170_v43 = vmul.f32 1.442695, %v1076_v31  ;;  %v1172_v15 = vmul.f32 1.442695, %v1077_v27 }
 0x2aa   :  { %v6405_v39 = vpop.eup %5409  ;;  %v1078_v26 = vsub.f32 %v8080_v45, %v6403_v37  ;;  %v1079_v17 = vsub.f32 %v8081_v21, %v6403_v37  ;;  %v1253_v33 = vadd.f32 %v6379_v23, %v1252_v14  ;;  %v1258_v9 = vadd.f32 %v6396_v47, %v1257_v0  ;;  %v8084_v21 = vld [vmem:[#allocation13_spill] sm:$0xff] }
 0x2ab   :  { %v6413_v5 = vpop.eup %5411  ;;  %5421 = vpow2.f32 %v1164_v29  ;;  %v1080_v40 = vsub.f32 %v8083_v13, %v6403_v37  ;;  %v1081_v12 = vsub.f32 %v8084_v21, %v6403_v37  ;;  %v1082_v27 = vsub.f32 %v6197_v49, %v6403_v37 }
 0x2ac   :  { %8082 = vst [vmem:[#allocation5_spill] sm:$0xff] %v6413_v5  ;;  %v6417_v31 = vpop.eup %5413  ;;  %v1174_v28 = vmul.f32 1.442695, %v1078_v26  ;;  %1254 = vadd.xlane.f32.xlu0 %v1253_v33  ;;  %v1259_v45 = vadd.f32 %v6401_v53, %v1258_v9  ;;  %5423 = vpow2.f32 %v1166_v52  ;;  %v1176_v0 = vmul.f32 1.442695, %v1079_v17 }
 0x2ad   :  { %v6422_v14 = vpop.eup %5415  ;;  %5425 = vpow2.f32 %v1168_v34  ;;  %v1083_v26 = vsub.f32 %v6211_v4, %v6403_v37  ;;  %v1084_v34 = vsub.f32 %v6217_v55, %v6403_v37  ;;  %v1178_v17 = vmul.f32 1.442695, %v1080_v40  ;;  %v8088_v55 = vld [vmem:[#allocation14_spill] sm:$0xff] }
 0x2ae   :  { %8085 = vst [vmem:[#allocation4_spill] sm:$0xff] %v6422_v14  ;;  %v6426_v29 = vpop.eup %5417  ;;  %v1260_v13 = vadd.f32 %v6405_v39, %v1259_v45  ;;  %5427 = vpow2.f32 %v1170_v43  ;;  %v1180_v9 = vmul.f32 1.442695, %v1081_v12  ;;  %v1182_v45 = vmul.f32 1.442695, %v1082_v27 }
 0x2af   :  { %8086 = vst [vmem:[#allocation6_spill] sm:$0xff] %v6426_v29  ;;  %v6431_v33 = vpop.eup %5419  ;;  %5429 = vpow2.f32 %v1172_v15  ;;  %v1265_v52 = vadd.f32 %v6426_v29, %v6422_v14  ;;  %v1186_v14 = vmul.f32 1.442695, %v1084_v34 }
 0x2b0   :  { %8087 = vst [vmem:[#allocation8_spill] sm:$0xff] %v6431_v33  ;;  %v1261_v49 = vadd.f32 %v6413_v5, %v1260_v13  ;;  %5431 = vpow2.f32 %v1174_v28  ;;  %v1184_v28 = vmul.f32 1.442695, %v1083_v26 }
 0x2b1   :  { %v6438_v21 = vpop.eup %5421  ;;  %v6440_v43 = vpop.xlane.xlu2 %1026  ;;  %v1266_v4 = vadd.f32 %v6431_v33, %v1265_v52  ;;  %5433 = vpow2.f32 %v1176_v0  ;;  %v8089_v0 = vld [vmem:[#allocation15_spill] sm:$0xff] }
 0x2b2   :  { %v6443_v15 = vpop.eup %5423  ;;  %v1086_v29 = vsub.f32 %v6194_v62, %v6440_v43  ;;  %v1087_v40 = vsub.f32 %v8088_v55, %v6440_v43  ;;  %v1262_v13 = vadd.f32 %v6417_v31, %v1261_v49  ;;  %5435 = vpow2.f32 %v1178_v17  ;;  %v8090_v17 = vld [vmem:[#allocation16_spill] sm:$0xff] }
 0x2b3   :  { %v6450_v12 = vpop.eup %5425  ;;  %v1267_v5 = vadd.f32 %v6438_v21, %v1266_v4  ;;  %v1088_v27 = vsub.f32 %v8089_v0, %v6440_v43  ;;  %v1085_v62 = vsub.f32 %v6226_v35, %v6403_v37  ;;  %5437 = vpow2.f32 %v1180_v9 }
 0x2b4   :  { %v6455_v52 = vpop.eup %5427  ;;  %v1190_v33 = vmul.f32 1.442695, %v1086_v29  ;;  %1263 = vadd.xlane.f32.xlu1 %v1262_v13  ;;  %v1192_v26 = vmul.f32 1.442695, %v1087_v40  ;;  %5439 = vpow2.f32 %v1182_v45  ;;  %v1089_v34 = vsub.f32 %v8090_v17, %v6440_v43 }
 0x2b5   :  { %v6459_v55 = vpop.eup %5429  ;;  %v1268_v49 = vadd.f32 %v6443_v15, %v1267_v5  ;;  %5441 = vpow2.f32 %v1184_v28  ;;  %v1090_v29 = vsub.f32 %v6233_v3, %v6440_v43  ;;  %v1091_v37 = vsub.f32 %v6247_v8, %v6440_v43 }
 0x2b6   :  { %v6464_v4 = vpop.eup %5431  ;;  %5443 = vpow2.f32 %v1186_v14  ;;  %v1194_v9 = vmul.f32 1.442695, %v1088_v27  ;;  %v1188_v5 = vmul.f32 1.442695, %v1085_v62  ;;  %v1092_v40 = vsub.f32 %v6253_v59, %v6440_v43 }
 0x2b7   :  { %8091 = vst [vmem:[#allocation9_spill] sm:$0xff] %v6464_v4  ;;  %v6468_v13 = vpop.eup %5433  ;;  %v1269_v35 = vadd.f32 %v6450_v12, %v1268_v49  ;;  %5445 = vpow2.f32 %v1190_v33  ;;  %v1093_v28 = vsub.f32 %v6262_v63, %v6440_v43  ;;  %v1196_v0 = vmul.f32 1.442695, %v1089_v34  ;;  %v8093_v33 = vld [vmem:[#allocation17_spill] sm:$0xff] }
 0x2b8   :  { %8092 = vst [vmem:[#allocation11_spill] sm:$0xff] %v6468_v13  ;;  %v1274_v45 = vadd.f32 %v6468_v13, %v6464_v4  ;;  %v6482_v3 = vpop.eup %5435  ;;  %5447 = vpow2.f32 %v1192_v26  ;;  %v1198_v17 = vmul.f32 1.442695, %v1090_v29  ;;  %v1200_v4 = vmul.f32 1.442695, %v1091_v37  ;;  %v8096_v29 = vld [vmem:[#allocation18_spill] sm:$0xff] }
 0x2b9   :  { %v6484_v14 = vpop.xlane.xlu0 %1035  ;;  %v1270_v8 = vadd.f32 %v6455_v52, %v1269_v35  ;;  %v6489_v27 = vpop.eup %5437  ;;  %5449 = vpow2.f32 %v1194_v9 }
 0x2ba   :  { %v1094_v59 = vsub.f32 %v6230_v60, %v6484_v14  ;;  %v1095_v62 = vsub.f32 %v8093_v33, %v6484_v14  ;;  %v1275_v49 = vadd.f32 %v6482_v3, %v1274_v45  ;;  %v6496_v13 = vpop.eup %5439  ;;  %v1096_v63 = vsub.f32 %v6236_v32, %v6484_v14 }
 0x2bb   :  { %8094 = vst [vmem:[#allocation10_spill] sm:$0xff] %v6496_v13  ;;  %v1271_v35 = vadd.f32 %v6459_v55, %v1270_v8  ;;  %v6501_v43 = vpop.eup %5441  ;;  %5451 = vpow2.f32 %v1188_v5  ;;  %v1097_v9 = vsub.f32 %v8096_v29, %v6484_v14  ;;  %v1202_v45 = vmul.f32 1.442695, %v1092_v40  ;;  %v5217_v40 = vld [vmem:[%s6480_s3 + $0x78] sm:$0xff] }
 0x2bc   :  { %8095 = vst [vmem:[#allocation12_spill] sm:$0xff] %v6501_v43  ;;  %v1206_v26 = vmul.f32 1.442695, %v1094_v59  ;;  %v1276_v60 = vadd.f32 %v6489_v27, %v1275_v49  ;;  %v6504_v34 = vpop.eup %5443  ;;  %v1208_v33 = vmul.f32 1.442695, %v1095_v62  ;;  %5453 = vpow2.f32 %v1196_v0  ;;  %2059 = vmatpush.bf16.msrb.mxu3 %v5217_v40 }
 0x2bd   :  { %1272 = vadd.xlane.f32.xlu2 %v1271_v35  ;;  %v6508_v37 = vpop.eup %5445  ;;  %5455 = vpow2.f32 %v1198_v17  ;;  %v1204_v8 = vmul.f32 1.442695, %v1093_v28  ;;  %v1098_v59 = vsub.f32 %v6269_v41, %v6484_v14  ;;  %v1210_v0 = vmul.f32 1.442695, %v1096_v63  ;;  %v5209_v17 = vld [vmem:[%s6480_s3 + $0x38] sm:$0xff] }
 0x2be   :  { %v1277_v32 = vadd.f32 %v6496_v13, %v1276_v60  ;;  %v6511_v5 = vpop.eup %5447  ;;  %5457 = vpow2.f32 %v1200_v4  ;;  %v1099_v35 = vsub.f32 %v6282_v20, %v6484_v14  ;;  %v5225_v60 = vld [vmem:[%s6480_s3 + $0xb8] sm:$0xff]  ;;  %v1100_v41 = vsub.f32 %v6286_v54, %v6484_v14  ;;  %2030 = vmatpush.bf16.msra.mxu2 %v5209_v17  ;;  %v8098_v17 = vld [vmem:[#allocation19_spill] sm:$0xff] }
 0x2bf   :  { %8097 = vst [vmem:[#allocation13_spill] sm:$0xff] %v6511_v5  ;;  %v1283_v49 = vadd.f32 %v6511_v5, %v6508_v37  ;;  %5459 = vpow2.f32 %v1206_v26  ;;  %v6523_v29 = vpop.eup %5449  ;;  %v1212_v28 = vmul.f32 1.442695, %v1097_v9  ;;  %v5233_v63 = vld [vmem:[%s6480_s3 + $0xf8] sm:$0xff]  ;;  %v1101_v54 = vsub.f32 %v6290_v42, %v6484_v14  ;;  %2088 = vmatpush.bf16.msra.mxu1 %v5225_v60 }
 0x2c0   :  { %v1278_v62 = vadd.f32 %v6501_v43, %v1277_v32  ;;  %5461 = vpow2.f32 %v1208_v33  ;;  %v1214_v33 = vmul.f32 1.442695, %v1098_v59  ;;  %2117 = vmatpush.bf16.msrb.mxu0 %v5233_v63 }
 0x2c1   :  { %v6525_v4 = vpop.xlane.xlu1 %1044  ;;  %v6530_v32 = vpop.eup %5451  ;;  %5463 = vpow2.f32 %v1202_v45  ;;  %v1284_v26 = vadd.f32 %v6523_v29, %v1283_v49 }
 0x2c2   :  { %v1102_v43 = vsub.f32 %v6266_v6, %v6525_v4  ;;  %v1279_v20 = vadd.f32 %v6504_v34, %v1278_v62  ;;  %v6536_v13 = vpop.eup %5453  ;;  %v1103_v5 = vsub.f32 %v6257_v48, %v6525_v4  ;;  %5465 = vpow2.f32 %v1210_v0 }
 0x2c3   :  { %v6542_v9 = vpop.eup %5455  ;;  %5467 = vpow2.f32 %v1204_v8  ;;  %v1285_v45 = vadd.f32 %v6536_v13, %v1284_v26  ;;  %v1216_v62 = vmul.f32 1.442695, %v1099_v35  ;;  %v1218_v48 = vmul.f32 1.442695, %v1100_v41 }
 0x2c4   :  { %v1280_v6 = vadd.f32 %v6530_v32, %v1279_v20  ;;  %v6546_v49 = vpop.eup %5457  ;;  %5469 = vpow2.f32 %v1212_v28  ;;  %v1104_v42 = vsub.f32 %v8098_v17, %v6525_v4  ;;  %v1222_v59 = vmul.f32 1.442695, %v1102_v43 }
 0x2c5   :  { %v6550_v14 = vpop.eup %5459  ;;  %v1286_v0 = vadd.f32 %v6542_v9, %v1285_v45  ;;  %v1224_v8 = vmul.f32 1.442695, %v1103_v5  ;;  %5471 = vpow2.f32 %v1214_v33  ;;  %v1105_v35 = vsub.f32 %v6279_v56, %v6525_v4 }
 0x2c6   :  { %1281 = vadd.xlane.f32.xlu0 %v1280_v6  ;;  %v6553_v40 = vpop.eup %5461  ;;  %5473 = vpow2.f32 %v1216_v62  ;;  %v1220_v28 = vmul.f32 1.442695, %v1101_v54  ;;  %v1106_v20 = vsub.f32 %v6295_v24, %v6525_v4  ;;  %v1226_v5 = vmul.f32 1.442695, %v1104_v42 }
 0x2c7   :  { %v6557_v60 = vpop.eup %5463  ;;  %v1287_v41 = vadd.f32 %v6546_v49, %v1286_v0  ;;  %v1292_v63 = vadd.f32 %v6553_v40, %v6550_v14  ;;  %5475 = vpow2.f32 %v1218_v48  ;;  %v1107_v54 = vsub.f32 %v6300_v11, %v6525_v4 }
 0x2c8   :  { %v6562_v43 = vpop.eup %5465  ;;  %5477 = vpow2.f32 %v1222_v59  ;;  %v1228_v45 = vmul.f32 1.442695, %v1105_v35  ;;  %v1108_v17 = vsub.f32 %v6303_v57, %v6525_v4  ;;  %v1230_v42 = vmul.f32 1.442695, %v1106_v20 }
 0x2c9   :  { %v6566_v26 = vpop.eup %5467  ;;  %v1288_v56 = vadd.f32 %v6557_v60, %v1287_v41  ;;  %v1293_v33 = vadd.f32 %v6562_v43, %v1292_v63  ;;  %5479 = vpow2.f32 %v1224_v8  ;;  %v1109_v8 = vsub.f32 %v6307_v2, %v6525_v4 }
 0x2ca   :  { %v6570_v6 = vpop.eup %5469  ;;  %5481 = vpow2.f32 %v1220_v28  ;;  %v1232_v35 = vmul.f32 1.442695, %v1107_v54  ;;  %v1234_v57 = vmul.f32 1.442695, %v1108_v17 }
 0x2cb   :  { %v1289_v62 = vadd.f32 %v6566_v26, %v1288_v56  ;;  %v1294_v24 = vadd.f32 %v6570_v6, %v1293_v33  ;;  %v6576_v48 = vpop.eup %5471  ;;  %5483 = vpow2.f32 %v1226_v5  ;;  %v1236_v2 = vmul.f32 1.442695, %v1109_v8 }
 0x2cc   :  { %8099 = vst [vmem:[#allocation14_spill] sm:$0xff] %v6576_v48  ;;  %v6580_v59 = vpop.eup %5473  ;;  %5485 = vpow2.f32 %v1228_v45 }
 0x2cd   :  { %8100 = vst [vmem:[#allocation15_spill] sm:$0xff] %v6580_v59  ;;  %1290 = vadd.xlane.f32.xlu1 %v1289_v62  ;;  %v1295_v0 = vadd.f32 %v6576_v48, %v1294_v24  ;;  %v6583_v11 = vpop.eup %5475  ;;  %5487 = vpow2.f32 %v1230_v42 }
 0x2ce   :  { %8101 = vst [vmem:[#allocation16_spill] sm:$0xff] %v6583_v11  ;;  %v6587_v41 = vpop.eup %5477  ;;  %5489 = vpow2.f32 %v1232_v35 }
 0x2cf   :  { %8102 = vst [vmem:[#allocation17_spill] sm:$0xff] %v6587_v41  ;;  %v1296_v28 = vadd.f32 %v6580_v59, %v1295_v0  ;;  %v6590_v63 = vpop.eup %5479  ;;  %5491 = vpow2.f32 %v1234_v57 }
 0x2d0   :  { %8103 = vst [vmem:[#allocation18_spill] sm:$0xff] %v6590_v63  ;;  %v6592_v20 = vpop.eup %5481  ;;  %v1301_v56 = vadd.f32 %v6590_v63, %v6587_v41  ;;  %5493 = vpow2.f32 %v1236_v2  ;;  %v5224_v2 = vld [vmem:[%s6480_s3 + $0xb0] sm:$0xff] }
 0x2d1   :  { %8104 = vst [vmem:[#allocation19_spill] sm:$0xff] %v6592_v20  ;;  %v1297_v5 = vadd.f32 %v6583_v11, %v1296_v28  ;;  %v6597_v33 = vpop.eup %5483  ;;  %2089 = vmatpush.bf16.msra.mxu1 %v5224_v2  ;;  %v5205_v2 = vld [vmem:[%s6480_s3 + $0x18] sm:$0xff] }
 0x2d2   :  { %8105 = vst [vmem:[#allocation20_spill] sm:$0xff] %v6597_v33  ;;  %v1302_v54 = vadd.f32 %v6597_v33, %v1301_v56  ;;  %v6601_v45 = vpop.eup %5485  ;;  %v5216_v56 = vld [vmem:[%s6480_s3 + $0x70] sm:$0xff] }
 0x2d3   :  { %v1298_v4 = vadd.f32 %v6592_v20, %v1297_v5  ;;  %8106 = vst [vmem:[#allocation21_spill] sm:$0xff] %v6601_v45  ;;  %v6604_v24 = vpop.eup %5487  ;;  %v5208_v5 = vld [vmem:[%s6480_s3 + $0x30] sm:$0xff]  ;;  %2060 = vmatpush.bf16.msrb.mxu3 %v5216_v56  ;;  %v5230_v56 = vld [vmem:[%s6480_s3 + $0xe0] sm:$0xff] }
 0x2d4   :  { %v1303_v62 = vadd.f32 %v6601_v45, %v1302_v54  ;;  %8107 = vst [vmem:[#allocation22_spill] sm:$0xff] %v6604_v24  ;;  %v6607_v42 = vpop.eup %5489  ;;  %2031 = vmatpush.bf16.msra.mxu2 %v5208_v5  ;;  %v5207_v54 = vld [vmem:[%s6480_s3 + $0x28] sm:$0xff]  ;;  %v5222_v5 = vld [vmem:[%s6480_s3 + $0xa0] sm:$0xff] }
 0x2d5   :  { %1299 = vadd.xlane.f32.xlu2 %v1298_v4  ;;  %8108 = vst [vmem:[#allocation23_spill] sm:$0xff] %v6607_v42  ;;  %v6610_v8 = vpop.eup %5491  ;;  %v5232_v4 = vld [vmem:[%s6480_s3 + $0xf0] sm:$0xff] }
 0x2d6   :  { %v1304_v17 = vadd.f32 %v6604_v24, %v1303_v62  ;;  %8109 = vst [vmem:[#allocation24_spill] sm:$0xff] %v6610_v8  ;;  %v6613_v28 = vpop.eup %5493  ;;  %2118 = vmatpush.bf16.msrb.mxu0 %v5232_v4  ;;  %v5215_v62 = vld [vmem:[%s6480_s3 + $0x68] sm:$0xff]  ;;  %v5213_v4 = vld [vmem:[%s6480_s3 + $0x58] sm:$0xff] }
 0x2d7   :  { %8110 = vst [vmem:[#allocation25_spill] sm:$0xff] %v6613_v28  ;;  %2061 = vmatpush.bf16.msrb.mxu3 %v5215_v62  ;;  %v5229_v62 = vld [vmem:[%s6480_s3 + $0xd8] sm:$0xff] }
 0x2d8   :  { %v1305_v0 = vadd.f32 %v6607_v42, %v1304_v17  ;;  %v5223_v17 = vld [vmem:[%s6480_s3 + $0xa8] sm:$0xff]  ;;  %2032 = vmatpush.bf16.msra.mxu2 %v5207_v54  ;;  %v5221_v54 = vld [vmem:[%s6480_s3 + $0x98] sm:$0xff]  ;;  %v5226_v42 = vld [vmem:[%s6480_s3 + $0xc0] sm:$0xff] }
 0x2d9   :  { %2090 = vmatpush.bf16.msra.mxu1 %v5223_v17  ;;  %v5204_v17 = vld [vmem:[%s6480_s3 + $0x10] sm:$0xff] }
 0x2da   :  { %v1306_v35 = vadd.f32 %v6610_v8, %v1305_v0  ;;  %v5231_v0 = vld [vmem:[%s6480_s3 + $0xe8] sm:$0xff] }
 0x2db   :  { %2119 = vmatpush.bf16.msrb.mxu0 %v5231_v0  ;;  %v5212_v0 = vld [vmem:[%s6480_s3 + $0x50] sm:$0xff]  ;;  %v5227_v8 = vld [vmem:[%s6480_s3 + $0xc8] sm:$0xff] }
 0x2dc   :  { %v1307_v57 = vadd.f32 %v6613_v28, %v1306_v35  ;;  %v5206_v35 = vld [vmem:[%s6480_s3 + $0x20] sm:$0xff]  ;;  %v5220_v28 = vld [vmem:[%s6480_s3 + $0x90] sm:$0xff] }
 0x2dd   :  { %2033 = vmatpush.bf16.msra.mxu2 %v5206_v35  ;;  %2091 = vmatpush.bf16.msra.mxu1 %v5222_v5  ;;  %v5228_v35 = vld [vmem:[%s6480_s3 + $0xd0] sm:$0xff]  ;;  %v5211_v5 = vld [vmem:[%s6480_s3 + $0x48] sm:$0xff] }
 0x2de   :  { %1308 = vadd.xlane.f32.xlu0 %v1307_v57  ;;  %v5214_v57 = vld [vmem:[%s6480_s3 + $0x60] sm:$0xff] }
 0x2df   :  { %2062 = vmatpush.bf16.msrb.mxu3 %v5214_v57  ;;  %2120 = vmatpush.bf16.msrb.mxu0 %v5230_v56  ;;  %v5203_v57 = vld [vmem:[%s6480_s3 + $0x8] sm:$0xff] }
 0x2e0   :  { %v5219_v56 = vld [vmem:[%s6480_s3 + $0x88] sm:$0xff] }
 0x2e1   :  { %2034 = vmatpush.bf16.msra.mxu2 %v5205_v2  ;;  %2092 = vmatpush.bf16.msra.mxu1 %v5221_v54  ;;  %v5210_v54 = vld [vmem:[%s6480_s3 + $0x40] sm:$0xff] }
 0x2e3   :  { %2063 = vmatpush.bf16.msrb.mxu3 %v5213_v4  ;;  %2121 = vmatpush.bf16.msrb.mxu0 %v5229_v62  ;;  %v5202_v4 = vld [vmem:[%s6480_s3] sm:$0xff] }
 0x2e4   :  { %v5218_v62 = vld [vmem:[%s6480_s3 + $0x80] sm:$0xff] }
 0x2e5   :  { %2035 = vmatpush.bf16.msra.mxu2 %v5204_v17  ;;  %2093 = vmatpush.bf16.msra.mxu1 %v5220_v28 }
 0x2e7   :  { %2064 = vmatpush.bf16.msrb.mxu3 %v5212_v0  ;;  %2122 = vmatpush.bf16.msrb.mxu0 %v5228_v35 }
 0x2e9   :  { %2036 = vmatpush.bf16.msra.mxu2 %v5203_v57  ;;  %2094 = vmatpush.bf16.msra.mxu1 %v5219_v56 }
 0x2eb   :  { %2065 = vmatpush.bf16.msrb.mxu3 %v5211_v5  ;;  %2123 = vmatpush.bf16.msrb.mxu0 %v5227_v8 }
 0x2ed   :  { %2037 = vmatpush.bf16.msra.mxu2 %v5202_v4  ;;  %2095 = vmatpush.bf16.msra.mxu1 %v5218_v62 }
 0x2ef   :  { %2066 = vmatpush.bf16.msrb.mxu3 %v5210_v54  ;;  %2124 = vmatpush.bf16.msrb.mxu0 %v5226_v42 }
 0x317   :  { %v1246_v2 = vpop.xlane.xlu2 %1245 }
 0x318   :  { %5495 = vrcp.f32 %v1246_v2  ;;  %v1321_v57 = vand.u32 2147483648, %v1246_v2  ;;  %vm1315_vm3 = vweird.f32 %v1246_v2  ;;  %v1319_v56 = vand.u32 2147483647, %v1246_v2 }
 0x31a   :  { %v1322_v62 = vor.u32 1.1754944e-38, %v1321_v57  ;;  %vm1320_vm6 = vcmp.eq.f32.partialorder %v1319_v56, 8.507059e+37 }
 0x31e   :  { %v5496_v28 = vpop.eup %5495 }
 0x31f   :  { %v1311_v17 = vmul.f32 %v5496_v28, %v1246_v2  ;;  %v1255_v0 = vpop.xlane.xlu0 %1254  ;;  %vm1316_vm2 = vweird.f32 %v5496_v28 }
 0x320   :  { %5497 = vrcp.f32 %v1255_v0  ;;  %vm1317_vm4 = vmor %vm1315_vm3, %vm1316_vm2  ;;  %v1343_v54 = vand.u32 2147483648, %v1255_v0  ;;  %vm1337_vm7 = vweird.f32 %v1255_v0 }
 0x321   :  { %v1312_v35 = vsub.f32 1.0, %v1311_v17  ;;  %v1341_v17 = vand.u32 2147483647, %v1255_v0 }
 0x322   :  { %v1344_v20 = vor.u32 1.1754944e-38, %v1343_v54 }
 0x323   :  { %v1313_v24 = vmul.f32 %v5496_v28, %v1312_v35  ;;  %vm1342_vm9 = vcmp.eq.f32.partialorder %v1341_v17, 8.507059e+37 }
 0x325   :  { %v1314_v33 = vadd.f32 %v5496_v28, %v1313_v24 }
 0x326   :  { %v5498_v45 = vpop.eup %5497 }
 0x327   :  { %v1333_v5 = vmul.f32 %v5498_v45, %v1255_v0  ;;  %v6644_v8 = vpop.xlane.xlu1 %1263  ;;  %v1318_v42 = vsel %vm1317_vm4, %v5496_v28, %v1314_v33  ;;  %vm1338_vm5 = vweird.f32 %v5498_v45 }
 0x328   :  { %5499 = vrcp.f32 %v6644_v8  ;;  %v1323_v35 = vsel %vm1320_vm6, %v1322_v62, %v1318_v42  ;;  %vm1339_vm8 = vmor %vm1337_vm7, %vm1338_vm5  ;;  %v1365_v62 = vand.u32 2147483648, %v6644_v8  ;;  %vm1359_vm11 = vweird.f32 %v6644_v8 }
 0x329   :  { %v1334_v4 = vsub.f32 1.0, %v1333_v5  ;;  %v1324_v33 = vmul.f32 %v6325_v51, %v1323_v35  ;;  %v1325_v57 = vmul.f32 %v6328_v38, %v1323_v35  ;;  %v1326_v5 = vmul.f32 %v6331_v61, %v1323_v35 }
 0x32a   :  { %v1363_v17 = vand.u32 2147483647, %v6644_v8 }
 0x32b   :  { %v1335_v63 = vmul.f32 %v5498_v45, %v1334_v4 }
 0x32c   :  { %vm1364_vm13 = vcmp.eq.f32.partialorder %v1363_v17, 8.507059e+37 }
 0x32d   :  { %v1336_v24 = vadd.f32 %v5498_v45, %v1335_v63 }
 0x32e   :  { %v5500_v41 = vpop.eup %5499 }
 0x32f   :  { %v1340_v11 = vsel %vm1339_vm8, %v5498_v45, %v1336_v24  ;;  %v1355_v2 = vmul.f32 %v5500_v41, %v6644_v8  ;;  %v1327_v45 = vmul.f32 %v6335_v58, %v1323_v35  ;;  %vm1360_vm10 = vweird.f32 %v5500_v41 }
 0x330   :  { %v1345_v59 = vsel %vm1342_vm9, %v1344_v20, %v1340_v11  ;;  %v1273_v48 = vpop.xlane.xlu2 %1272  ;;  %v6657_v20 = vmul.f32 %v6337_v46, %v1323_v35  ;;  %v6671_v46 = vmul.f32 %v6342_v19, %v1323_v35  ;;  %vm1361_vm12 = vmor %vm1359_vm11, %vm1360_vm10  ;;  %v1366_v8 = vor.u32 1.1754944e-38, %v1365_v62 }
 0x331   :  { %v1356_v28 = vsub.f32 1.0, %v1355_v2  ;;  %5501 = vrcp.f32 %v1273_v48  ;;  %v1346_v63 = vmul.f32 %v6352_v44, %v1345_v59  ;;  %v1347_v0 = vmul.f32 %v6355_v1, %v1345_v59 }
 0x332   :  { %v1348_v56 = vmul.f32 %v6360_v30, %v1345_v59  ;;  %v1349_v11 = vmul.f32 %v6365_v18, %v1345_v59  ;;  %v6660_v51 = vmul.f32 %v6367_v16, %v1345_v59  ;;  %v6665_v1 = vmul.f32 %v6340_v10, %v1323_v35 }
 0x333   :  { %v1357_v4 = vmul.f32 %v5500_v41, %v1356_v28  ;;  %v1486_v38 = vpack.c.bf16 %v1346_v63, %v1324_v33  ;;  %v1487_v42 = vpack.c.bf16 %v1347_v0, %v1325_v57  ;;  %v6668_v58 = vmul.f32 %v6371_v22, %v1345_v59 }
 0x334   :  { %v1488_v61 = vpack.c.bf16 %v1348_v56, %v1326_v5  ;;  %v1489_v54 = vpack.c.bf16 %v1349_v11, %v1327_v45  ;;  %v1490_v44 = vpack.c.bf16 %v6660_v51, %v6657_v20  ;;  %v6674_v18 = vmul.f32 %v6373_v36, %v1345_v59  ;;  %v5257_v56 = vld [vmem:[%s6480_s3 + $0x1b8] sm:$0xff] }
 0x335   :  { %v1358_v30 = vadd.f32 %v5500_v41, %v1357_v4  ;;  %2038 = vmatmul.bf16.vlgmr.msra.gmra.mxu2 %v1486_v38  ;;  %2067 = vmatmul.bf16.vlgmr.msrb.gmra.mxu3 %v1487_v42  ;;  %v1491_v10 = vpack.c.bf16 %v6668_v58, %v6665_v1  ;;  %v6680_v22 = vmul.f32 %v6379_v23, %v1345_v59  ;;  %v1387_v33 = vand.u32 2147483648, %v1273_v48  ;;  %v5265_v45 = vld [vmem:[%s6480_s3 + $0x1f8] sm:$0xff] }
 0x336   :  { %2096 = vmatmul.bf16.vlgmr.msra.gmra.mxu1 %v1488_v61  ;;  %2125 = vmatmul.bf16.vlgmr.msrb.gmra.mxu0 %v1489_v54  ;;  %v1492_v36 = vpack.c.bf16 %v6674_v18, %v6671_v46  ;;  %v6690_v2 = vmul.f32 %v6347_v25, %v1323_v35  ;;  %v1385_v5 = vand.u32 2147483647, %v1273_v48  ;;  %vm1381_vm15 = vweird.f32 %v1273_v48  ;;  %v5241_v25 = vld [vmem:[%s6480_s3 + $0x138] sm:$0xff] }
 0x337   :  { %v5502_v16 = vpop.eup %5501  ;;  %v1362_v23 = vsel %vm1361_vm12, %v5500_v41, %v1358_v30  ;;  %v5249_v35 = vld [vmem:[%s6480_s3 + $0x178] sm:$0xff]  ;;  %v1388_v41 = vor.u32 1.1754944e-38, %v1387_v33  ;;  %2146 = vmatpush.bf16.msrb.mxu2 %v5241_v25  ;;  %v8111_v30 = vld [vmem:[#allocation7_spill] sm:$0xff]  ;;  %2204 = vmatpush.bf16.msrb.mxu1 %v5257_v56  ;;  %v8113_v33 = vld [vmem:[#allocation6_spill] sm:$0xff] }
 0x338   :  { %v1377_v19 = vmul.f32 %v5502_v16, %v1273_v48  ;;  %v1493_v28 = vpack.c.bf16 %v6680_v22, %v6690_v2  ;;  %vm1382_vm14 = vweird.f32 %v5502_v16  ;;  %v1367_v63 = vsel %vm1364_vm13, %v1366_v8, %v1362_v23  ;;  %2175 = vmatpush.bf16.msra.mxu3 %v5249_v35  ;;  %2233 = vmatpush.bf16.msra.mxu0 %v5265_v45  ;;  %v5256_v25 = vld [vmem:[%s6480_s3 + $0x1b0] sm:$0xff] }
 0x339   :  { %v6687_v24 = vpop.xlane.xlu0 %1281  ;;  %vm1383_vm1 = vmor %vm1381_vm15, %vm1382_vm14  ;;  %vm1386_vm2 = vcmp.eq.f32.partialorder %v1385_v5, 8.507059e+37  ;;  %v1368_v38 = vmul.f32 %v6384_v7, %v1367_v63  ;;  %v1369_v42 = vmul.f32 %v6387_v50, %v1367_v63  ;;  %v1370_v62 = vmul.f32 %v8111_v30, %v1367_v63  ;;  %v5248_v50 = vld [vmem:[%s6480_s3 + $0x170] sm:$0xff]  ;;  %v5239_v30 = vld [vmem:[%s6480_s3 + $0x128] sm:$0xff] }
 0x33a   :  { %v1378_v59 = vsub.f32 1.0, %v1377_v19  ;;  %5503 = vrcp.f32 %v6687_v24  ;;  %v1371_v7 = vmul.f32 %v6396_v47, %v1367_v63  ;;  %v6713_v17 = vmul.f32 %v6401_v53, %v1367_v63  ;;  %v8114_v5 = vld [vmem:[#allocation8_spill] sm:$0xff] }
 0x33b   :  { %v6716_v19 = vmul.f32 %v6405_v39, %v1367_v63  ;;  %v5264_v35 = vld [vmem:[%s6480_s3 + $0x1f0] sm:$0xff]  ;;  %v8115_v39 = vld [vmem:[#allocation5_spill] sm:$0xff]  ;;  %2205 = vmatpush.bf16.msrb.mxu1 %v5256_v25  ;;  %vm1403_vm4 = vweird.f32 %v6687_v24 }
 0x33c   :  { %v1379_v57 = vmul.f32 %v5502_v16, %v1378_v59  ;;  %v8112_v59 = vld [vmem:[#allocation4_spill] sm:$0xff]  ;;  %2176 = vmatpush.bf16.msra.mxu3 %v5248_v50  ;;  %v6729_v56 = vmul.f32 %v8115_v39, %v1367_v63  ;;  %2234 = vmatpush.bf16.msra.mxu0 %v5264_v35  ;;  %v5254_v25 = vld [vmem:[%s6480_s3 + $0x1a0] sm:$0xff] }
 0x33d   :  { %v5262_v35 = vld [vmem:[%s6480_s3 + $0x1e0] sm:$0xff] }
 0x33e   :  { %v1380_v0 = vadd.f32 %v5502_v16, %v1379_v57 }
 0x340   :  { %v6699_v4 = vpop.eup %5503  ;;  %v1384_v11 = vsel %vm1383_vm1, %v5502_v16, %v1380_v0  ;;  %v6705_v54 = vpop.xlane.xlu1 %1290  ;;  %v5240_v16 = vld [vmem:[%s6480_s3 + $0x130] sm:$0xff] }
 0x341   :  { %v1389_v61 = vsel %vm1386_vm2, %v1388_v41, %v1384_v11  ;;  %v1399_v48 = vmul.f32 %v6699_v4, %v6687_v24  ;;  %5505 = vrcp.f32 %v6705_v54  ;;  %vm1404_vm3 = vweird.f32 %v6699_v4  ;;  %2147 = vmatpush.bf16.msrb.mxu2 %v5240_v16 }
 0x342   :  { %v1390_v8 = vmul.f32 %v8112_v59, %v1389_v61  ;;  %v1391_v57 = vmul.f32 %v8113_v33, %v1389_v61  ;;  %v1392_v0 = vmul.f32 %v8114_v5, %v1389_v61  ;;  %v1393_v47 = vmul.f32 %v6438_v21, %v1389_v61  ;;  %v5247_v59 = vld [vmem:[%s6480_s3 + $0x168] sm:$0xff]  ;;  %vm6760_vm5 = vmor %vm1403_vm4, %vm1404_vm3 }
 0x343   :  { %v1400_v23 = vsub.f32 1.0, %v1399_v48  ;;  %v6726_v53 = vmul.f32 %v6443_v15, %v1389_v61  ;;  %v5255_v5 = vld [vmem:[%s6480_s3 + $0x1a8] sm:$0xff]  ;;  %v6739_v15 = vmul.f32 %v6450_v12, %v1389_v61  ;;  %v6742_v50 = vmul.f32 %v6455_v52, %v1389_v61  ;;  %2177 = vmatpush.bf16.msra.mxu3 %v5247_v59  ;;  %v5253_v59 = vld [vmem:[%s6480_s3 + $0x198] sm:$0xff] }
 0x344   :  { %v1494_v45 = vpack.c.bf16 %v1390_v8, %v1368_v38  ;;  %v1495_v11 = vpack.c.bf16 %v1391_v57, %v1369_v42  ;;  %v1496_v48 = vpack.c.bf16 %v1392_v0, %v1370_v62  ;;  %v1497_v33 = vpack.c.bf16 %v1393_v47, %v1371_v7  ;;  %v5263_v21 = vld [vmem:[%s6480_s3 + $0x1e8] sm:$0xff]  ;;  %2206 = vmatpush.bf16.msrb.mxu1 %v5255_v5 }
 0x345   :  { %v1401_v41 = vmul.f32 %v6699_v4, %v1400_v23  ;;  %v1498_v16 = vpack.c.bf16 %v6726_v53, %v6713_v17  ;;  %v1409_v42 = vand.u32 2147483648, %v6687_v24  ;;  %v6747_v62 = vmul.f32 %v6417_v31, %v1367_v63  ;;  %2148 = vmatpush.bf16.msrb.mxu2 %v5239_v30  ;;  %2235 = vmatpush.bf16.msra.mxu0 %v5263_v21  ;;  %v5245_v30 = vld [vmem:[%s6480_s3 + $0x158] sm:$0xff] }
 0x346   :  { %2043 = vmatmul.bf16.gmra.mxu2 %v1494_v45  ;;  %2072 = vmatmul.bf16.gmra.mxu3 %v1495_v11  ;;  %v6750_v7 = vmul.f32 %v6459_v55, %v1389_v61  ;;  %v1407_v12 = vand.u32 2147483647, %v6687_v24  ;;  %v1499_v52 = vpack.c.bf16 %v6739_v15, %v6716_v19  ;;  %v1500_v8 = vpack.c.bf16 %v6742_v50, %v6729_v56  ;;  %v5238_v24 = vld [vmem:[%s6480_s3 + $0x120] sm:$0xff] }
 0x347   :  { %v1402_v38 = vadd.f32 %v6699_v4, %v1401_v41  ;;  %v5506_v23 = vpop.eup %5505  ;;  %2101 = vmatmul.bf16.gmra.mxu1 %v1496_v48  ;;  %2130 = vmatmul.bf16.gmra.mxu0 %v1497_v33  ;;  %v5246_v61 = vld [vmem:[%s6480_s3 + $0x160] sm:$0xff]  ;;  %v1410_v47 = vor.u32 1.1754944e-38, %v1409_v42  ;;  %v1431_v41 = vand.u32 2147483648, %v6705_v54  ;;  %v5237_v48 = vld [vmem:[%s6480_s3 + $0x118] sm:$0xff]  ;;  %vm1425_vm8 = vweird.f32 %v6705_v54 }
 0x348   :  { %v1421_v55 = vmul.f32 %v5506_v23, %v6705_v54  ;;  %v6765_v63 = vpop.xlane.xlu2 %1299  ;;  %v1501_v57 = vpack.c.bf16 %v6750_v7, %v6747_v62  ;;  %vm1408_vm6 = vcmp.eq.f32.partialorder %v1407_v12, 8.507059e+37  ;;  %vm1426_vm7 = vweird.f32 %v5506_v23  ;;  %2178 = vmatpush.bf16.msra.mxu3 %v5246_v61  ;;  %2207 = vmatpush.bf16.msrb.mxu1 %v5254_v25  ;;  %v5261_v33 = vld [vmem:[%s6480_s3 + $0x1d8] sm:$0xff] }
 0x349   :  { %v1406_v0 = vsel %vm6760_vm5, %v6699_v4, %v1402_v38  ;;  %5507 = vrcp.f32 %v6765_v63  ;;  %v1429_v4 = vand.u32 2147483647, %v6705_v54  ;;  %2149 = vmatpush.bf16.msrb.mxu2 %v5238_v24  ;;  %2236 = vmatpush.bf16.msra.mxu0 %v5262_v35  ;;  %vm1427_vm9 = vmor %vm1425_vm8, %vm1426_vm7  ;;  %v1432_v38 = vor.u32 1.1754944e-38, %v1431_v41  ;;  %v8118_v42 = vld [vmem:[#allocation9_spill] sm:$0xff]  ;;  %v8119_v24 = vld [vmem:[#allocation11_spill] sm:$0xff] }
 0x34a   :  { %v1422_v39 = vsub.f32 1.0, %v1421_v55  ;;  %v1411_v45 = vsel %vm1408_vm6, %v1410_v47, %v1406_v0  ;;  %v5236_v0 = vld [vmem:[%s6480_s3 + $0x110] sm:$0xff]  ;;  %vm1447_vm12 = vweird.f32 %v6765_v63  ;;  %vm2360_vm4 = vcmask 523264  }
 0x34b   :  { %v1412_v12 = vmul.f32 %v8118_v42, %v1411_v45  ;;  %vm1430_vm10 = vcmp.eq.f32.partialorder %v1429_v4, 8.507059e+37  ;;  %v1413_v61 = vmul.f32 %v8119_v24, %v1411_v45  ;;  %v1414_v25 = vmul.f32 %v6482_v3, %v1411_v45  ;;  %v5244_v47 = vld [vmem:[%s6480_s3 + $0x150] sm:$0xff]  ;;  %v8120_v4 = vld [vmem:[#allocation13_spill] sm:$0xff] }
 0x34c   :  { %v1423_v11 = vmul.f32 %v5506_v23, %v1422_v39  ;;  %2179 = vmatpush.bf16.msra.mxu3 %v5245_v30  ;;  %v1415_v35 = vmul.f32 %v6489_v27, %v1411_v45  ;;  %2208 = vmatpush.bf16.msrb.mxu1 %v5253_v59  ;;  %v5252_v39 = vld [vmem:[%s6480_s3 + $0x190] sm:$0xff]  ;;  %vm2362_vm6 = vcmask 519168   ;;  %vm2366_vm7 = vcmask 523268  }
 0x34d   :  { %2150 = vmatpush.bf16.msrb.mxu2 %v5237_v48  ;;  %2237 = vmatpush.bf16.msra.mxu0 %v5261_v33  ;;  %v5260_v3 = vld [vmem:[%s6480_s3 + $0x1d0] sm:$0xff] }
 0x34e   :  { %v1424_v5 = vadd.f32 %v5506_v23, %v1423_v11  ;;  %v8122_v59 = vld [vmem:[#allocation12_spill] sm:$0xff] }
 0x34f   :  { %v6784_v21 = vpop.eup %5507  ;;  %v6806_v33 = vmul.f32 %v8122_v59, %v1411_v45 }
 0x350   :  { %v1428_v31 = vsel %vm1427_vm9, %v5506_v23, %v1424_v5  ;;  %v1443_v55 = vmul.f32 %v6784_v21, %v6765_v63  ;;  %v8121_v5 = vld [vmem:[#allocation10_spill] sm:$0xff]  ;;  %2180 = vmatpush.bf16.msra.mxu3 %v5244_v47  ;;  %2209 = vmatpush.bf16.msrb.mxu1 %v5252_v39  ;;  %vm1448_vm11 = vweird.f32 %v6784_v21  ;;  %v1451_v39 = vand.u32 2147483647, %v6765_v63 }
 0x351   :  { %v1433_v54 = vsel %vm1430_vm10, %v1432_v38, %v1428_v31  ;;  %v6795_v41 = vpop.xlane.xlu0 %1308  ;;  %v6803_v27 = vmul.f32 %v8121_v5, %v1411_v45  ;;  %v6809_v38 = vmul.f32 %v6504_v34, %v1411_v45  ;;  %2151 = vmatpush.bf16.msrb.mxu2 %v5236_v0  ;;  %v6819_v34 = vmul.f32 %v6530_v32, %v1411_v45  ;;  %v5259_v32 = vld [vmem:[%s6480_s3 + $0x1c8] sm:$0xff]  ;;  %vm1449_vm13 = vmor %vm1447_vm12, %vm1448_vm11 }
 0x352   :  { %v1444_v23 = vsub.f32 1.0, %v1443_v55  ;;  %v1434_v11 = vmul.f32 %v6508_v37, %v1433_v54  ;;  %v1435_v48 = vmul.f32 %v8120_v4, %v1433_v54  ;;  %v1436_v30 = vmul.f32 %v6523_v29, %v1433_v54  ;;  %v5235_v29 = vld [vmem:[%s6480_s3 + $0x108] sm:$0xff]  ;;  %2238 = vmatpush.bf16.msra.mxu0 %v5260_v3  ;;  %v5258_v3 = vld [vmem:[%s6480_s3 + $0x1c0] sm:$0xff] }
 0x353   :  { %5509 = vrcp.f32 %v6795_v41  ;;  %v1437_v24 = vmul.f32 %v6536_v13, %v1433_v54  ;;  %v5243_v4 = vld [vmem:[%s6480_s3 + $0x148] sm:$0xff]  ;;  %v6816_v5 = vmul.f32 %v6542_v9, %v1433_v54  ;;  %v6827_v13 = vmul.f32 %v6557_v60, %v1433_v54 }
 0x354   :  { %v1445_v37 = vmul.f32 %v6784_v21, %v1444_v23  ;;  %v1502_v42 = vpack.c.bf16 %v1434_v11, %v1412_v12  ;;  %v1503_v31 = vpack.c.bf16 %v1435_v48, %v1413_v61  ;;  %v1504_v55 = vpack.c.bf16 %v1436_v30, %v1414_v25  ;;  %v5251_v12 = vld [vmem:[%s6480_s3 + $0x188] sm:$0xff]  ;;  %v5234_v25 = vld [vmem:[%s6480_s3 + $0x100] sm:$0xff]  ;;  %2181 = vmatpush.bf16.msra.mxu3 %v5243_v4 }
 0x355   :  { %v6824_v61 = vmul.f32 %v6546_v49, %v1433_v54  ;;  %v1505_v9 = vpack.c.bf16 %v1437_v24, %v1415_v35  ;;  %v1506_v45 = vpack.c.bf16 %v6816_v5, %v6803_v27  ;;  %v6834_v0 = vmul.f32 %v6566_v26, %v1433_v54  ;;  %2152 = vmatpush.bf16.msrb.mxu2 %v5235_v29  ;;  %v5242_v26 = vld [vmem:[%s6480_s3 + $0x140] sm:$0xff] }
 0x356   :  { %v1446_v23 = vadd.f32 %v6784_v21, %v1445_v37  ;;  %2048 = vmatmul.bf16.gmra.mxu2 %v1502_v42  ;;  %2077 = vmatmul.bf16.gmra.mxu3 %v1503_v31  ;;  %v1453_v49 = vand.u32 2147483648, %v6765_v63  ;;  %v5250_v48 = vld [vmem:[%s6480_s3 + $0x180] sm:$0xff]  ;;  %vm1452_vm14 = vcmp.eq.f32.partialorder %v1451_v39, 8.507059e+37  ;;  %v1473_v63 = vand.u32 2147483647, %v6795_v41  ;;  %v8124_v39 = vld [vmem:[#allocation15_spill] sm:$0xff] }
 0x357   :  { %2106 = vmatmul.bf16.gmra.mxu1 %v1504_v55  ;;  %2135 = vmatmul.bf16.gmra.mxu0 %v1505_v9  ;;  %v1475_v42 = vand.u32 2147483648, %v6795_v41  ;;  %vm1469_vm1 = vweird.f32 %v6795_v41  ;;  %v8135_v20 = vpack.c.bf16 %v6824_v61, %v6806_v33  ;;  %v8136_v51 = vpack.c.bf16 %v6827_v13, %v6809_v38 }
 0x358   :  { %2210 = vmatpush.bf16.msrb.mxu1 %v5251_v12  ;;  %v1450_v30 = vsel %vm1449_vm13, %v6784_v21, %v1446_v23  ;;  %2239 = vmatpush.bf16.msra.mxu0 %v5259_v32  ;;  %v1454_v59 = vor.u32 1.1754944e-38, %v1453_v49  ;;  %vm1474_vm3 = vcmp.eq.f32.partialorder %v1473_v63, 8.507059e+37  ;;  %v8123_v32 = vld [vmem:[#allocation14_spill] sm:$0xff]  ;;  %v8129_v63 = vld [vmem:[#allocation20_spill] sm:$0xff] }
 0x359   :  { %v5510_v47 = vpop.eup %5509  ;;  %2153 = vmatpush.bf16.msrb.mxu2 %v5234_v25  ;;  %2182 = vmatpush.bf16.msra.mxu3 %v5242_v26  ;;  %v1476_v21 = vor.u32 1.1754944e-38, %v1475_v42 }
 0x35a   :  { %v1465_v11 = vmul.f32 %v5510_v47, %v6795_v41  ;;  %v1455_v31 = vsel %vm1452_vm14, %v1454_v59, %v1450_v30  ;;  %vm1470_vm15 = vweird.f32 %v5510_v47  ;;  %v8126_v41 = vld [vmem:[#allocation19_spill] sm:$0xff] }
 0x35b   :  { %vm1471_vm2 = vmor %vm1469_vm1, %vm1470_vm15  ;;  %v1456_v24 = vmul.f32 %v6550_v14, %v1455_v31  ;;  %v1457_v4 = vmul.f32 %v6553_v40, %v1455_v31  ;;  %v1458_v12 = vmul.f32 %v6562_v43, %v1455_v31  ;;  %v1459_v9 = vmul.f32 %v6570_v6, %v1455_v31  ;;  %v8131_v43 = vld [vmem:[#allocation22_spill] sm:$0xff]  ;;  %v8132_v6 = vld [vmem:[#allocation23_spill] sm:$0xff] }
 0x35c   :  { %v1466_v37 = vsub.f32 1.0, %v1465_v11  ;;  %2211 = vmatpush.bf16.msrb.mxu1 %v5250_v48  ;;  %2240 = vmatpush.bf16.msra.mxu0 %v5258_v3  ;;  %v1460_v49 = vmul.f32 %v8123_v32, %v1455_v31  ;;  %v1461_v26 = vmul.f32 %v8124_v39, %v1455_v31  ;;  %v8125_v11 = vld [vmem:[#allocation16_spill] sm:$0xff]  ;;  %v1463_v30 = vmul.f32 %v8126_v41, %v1455_v31  ;;  %v8127_v3 = vld [vmem:[#allocation17_spill] sm:$0xff] }
 0x35d   :  { %v1462_v48 = vmul.f32 %v8125_v11, %v1455_v31  ;;  %v8133_v32 = vld [vmem:[#allocation24_spill] sm:$0xff] }
 0x35e   :  { %v1467_v55 = vmul.f32 %v5510_v47, %v1466_v37  ;;  %v8128_v37 = vld [vmem:[#allocation18_spill] sm:$0xff] }
 0x360   :  { %v1468_v29 = vadd.f32 %v5510_v47, %v1467_v55 }
 0x362   :  { %v1472_v23 = vsel %vm1471_vm2, %v5510_v47, %v1468_v29  ;;  %v8130_v47 = vld [vmem:[#allocation21_spill] sm:$0xff] }
 0x363   :  { %v1477_v25 = vsel %vm1474_vm3, %v1476_v21, %v1472_v23  ;;  %v8134_v23 = vld [vmem:[#allocation25_spill] sm:$0xff] }
 0x364   :  { %v1478_v59 = vmul.f32 %v8127_v3, %v1477_v25  ;;  %v1479_v14 = vmul.f32 %v8128_v37, %v1477_v25  ;;  %v1480_v40 = vmul.f32 %v8129_v63, %v1477_v25  ;;  %v1481_v42 = vmul.f32 %v8130_v47, %v1477_v25 }
 0x365   :  { %v1482_v55 = vmul.f32 %v8131_v43, %v1477_v25  ;;  %v1483_v29 = vmul.f32 %v8132_v6, %v1477_v25  ;;  %v1484_v21 = vmul.f32 %v8133_v32, %v1477_v25  ;;  %v1485_v39 = vmul.f32 %v8134_v23, %v1477_v25 }
 0x366   :  { %v1510_v54 = vpack.c.bf16 %v1478_v59, %v1456_v24  ;;  %v1511_v11 = vpack.c.bf16 %v1479_v14, %v1457_v4  ;;  %v1512_v35 = vpack.c.bf16 %v1480_v40, %v1458_v12  ;;  %v1513_v31 = vpack.c.bf16 %v1481_v42, %v1459_v9 }
 0x367   :  { %v1514_v41 = vpack.c.bf16 %v1482_v55, %v1460_v49  ;;  %v1515_v3 = vpack.c.bf16 %v1483_v29, %v1461_v26  ;;  %v1516_v60 = vpack.c.bf16 %v1484_v21, %v1462_v48  ;;  %v1517_v37 = vpack.c.bf16 %v1485_v39, %v1463_v30  ;;  %v5273_v39 = vld [vmem:[%s6951_s7 + $0x38] sm:$0xff] }
 0x368   :  { %2053 = vmatmul.bf16.gmra.mxu2 %v1510_v54  ;;  %2082 = vmatmul.bf16.gmra.mxu3 %v1511_v11 }
 0x369   :  { %2111 = vmatmul.bf16.gmra.mxu1 %v1512_v35  ;;  %2140 = vmatmul.bf16.gmra.mxu0 %v1513_v31 }
 0x36a   :  { %2345 = vmatpush.bf16.msra.mxu1 %v5273_v39 }
 0x378   :  { %2154 = vmatmul.bf16.vlgmr.msrb.gmra.mxu2 %v1490_v44  ;;  %2183 = vmatmul.bf16.vlgmr.msra.gmra.mxu3 %v1491_v10  ;;  %v8137_v44 = vpack.c.bf16 %v6834_v0, %v6819_v34 }
 0x379   :  { %2212 = vmatmul.bf16.vlgmr.msrb.gmra.mxu1 %v1492_v36  ;;  %2241 = vmatmul.bf16.vlgmr.msra.gmra.mxu0 %v1493_v28 }
 0x388   :  { %2159 = vmatmul.bf16.gmra.mxu2 %v1498_v16  ;;  %2188 = vmatmul.bf16.gmra.mxu3 %v1499_v52 }
 0x389   :  { %2217 = vmatmul.bf16.gmra.mxu1 %v1500_v8  ;;  %2246 = vmatmul.bf16.gmra.mxu0 %v1501_v57 }
 0x398   :  { %2164 = vmatmul.bf16.gmra.mxu2 %v1506_v45  ;;  %2193 = vmatmul.bf16.gmra.mxu3 %v8135_v20 }
 0x399   :  { %2222 = vmatmul.bf16.gmra.mxu1 %v8136_v51  ;;  %2251 = vmatmul.bf16.gmra.mxu0 %v8137_v44 }
 0x3a8   :  { %2169 = vmatmul.bf16.gmra.mxu2 %v1514_v41  ;;  %2198 = vmatmul.bf16.gmra.mxu3 %v1515_v3  ;;  %v5272_v3 = vld [vmem:[%s6951_s7 + $0x30] sm:$0xff] }
 0x3a9   :  { %2227 = vmatmul.bf16.gmra.mxu1 %v1516_v60  ;;  %2256 = vmatmul.bf16.gmra.mxu0 %v1517_v37 }
 0x3aa   :  { %2346 = vmatpush.bf16.msra.mxu1 %v5272_v3 }
 0x3b3   :  { %v2097_v1 = vpop.f32.mrf.mxu1  ;;  %v2126_v58 = vpop.f32.mrf.mxu0 }
 0x3b8   :  { %v2039_v46 = vpop.f32.mrf.mxu2  ;;  %v2068_v18 = vpop.f32.mrf.mxu3 }
 0x3b9   :  { %v2069_v10 = vadd.f32 %v2068_v18, %v2039_v46 }
 0x3bb   :  { %v2098_v22 = vadd.f32 %v2097_v1, %v2069_v10  ;;  %v6908_v36 = vpop.f32.mrf.mxu1  ;;  %v6910_v2 = vpop.f32.mrf.mxu0  ;;  %v5271_v1 = vld [vmem:[%s6951_s7 + $0x28] sm:$0xff] }
 0x3bc   :  { %2347 = vmatpush.bf16.msra.mxu1 %v5271_v1 }
 0x3bd   :  { %v2127_v28 = vadd.f32 %v2126_v58, %v2098_v22 }
 0x3c0   :  { %v6912_v17 = vpop.f32.mrf.mxu2  ;;  %v6914_v19 = vpop.f32.mrf.mxu3 }
 0x3c4   :  { %v2102_v53 = vpop.f32.mrf.mxu1  ;;  %v2131_v56 = vpop.f32.mrf.mxu0 }
 0x3c9   :  { %v2044_v16 = vpop.f32.mrf.mxu2  ;;  %v2073_v15 = vpop.f32.mrf.mxu3 }
 0x3ca   :  { %v2074_v50 = vadd.f32 %v2073_v15, %v2044_v16  ;;  %v5654_v15 = vld [vmem:[%s5853_s25 + $0x10] sm:$0xff] }
 0x3cc   :  { %v2103_v62 = vadd.f32 %v2102_v53, %v2074_v50  ;;  %v6916_v7 = vpop.f32.mrf.mxu1  ;;  %v6918_v52 = vpop.f32.mrf.mxu0  ;;  %v5270_v53 = vld [vmem:[%s6951_s7 + $0x20] sm:$0xff] }
 0x3cd   :  { %2348 = vmatpush.bf16.msra.mxu1 %v5270_v53 }
 0x3ce   :  { %v2132_v8 = vadd.f32 %v2131_v56, %v2103_v62  ;;  %v5653_v56 = vld [vmem:[%s5853_s25] sm:$0xff] }
 0x3d1   :  { %v6920_v57 = vpop.f32.mrf.mxu2  ;;  %v6922_v27 = vpop.f32.mrf.mxu3 }
 0x3d4   :  { %v2107_v33 = vpop.f32.mrf.mxu1  ;;  %v2136_v38 = vpop.f32.mrf.mxu0 }
 0x3d9   :  { %v2049_v5 = vpop.f32.mrf.mxu2  ;;  %v2078_v34 = vpop.f32.mrf.mxu3 }
 0x3da   :  { %v2079_v61 = vadd.f32 %v2078_v34, %v2049_v5  ;;  %v2359_v5 = vld [vmem:[%s6967_s11] sm:$0xff] }
 0x3db   :  { %2361 = vst.msk [vmem:[#allocation2] sm:$0xff] %vm2360_vm4, %v2359_v5 }
 0x3dc   :  { %v2108_v13 = vadd.f32 %v2107_v33, %v2079_v61  ;;  %v6924_v45 = vpop.f32.mrf.mxu1  ;;  %v6926_v0 = vpop.f32.mrf.mxu0 }
 0x3de   :  { %v6928_v60 = vadd.f32 %v2136_v38, %v2108_v13  ;;  %v5268_v13 = vld [vmem:[%s6951_s7 + $0x10] sm:$0xff] }
 0x3e1   :  { %v6930_v35 = vpop.f32.mrf.mxu2  ;;  %v6932_v54 = vpop.f32.mrf.mxu3 }
 0x3e6   :  { %v2112_v24 = vpop.f32.mrf.mxu1  ;;  %v2141_v4 = vpop.f32.mrf.mxu0 }
 0x3eb   :  { %v2054_v12 = vpop.f32.mrf.mxu2  ;;  %v2083_v9 = vpop.f32.mrf.mxu3 }
 0x3ec   :  { %v2084_v49 = vadd.f32 %v2083_v9, %v2054_v12  ;;  %v2071_v12 = vadd.f32 %v6914_v19, %v6912_v17  ;;  %v2081_v9 = vadd.f32 %v6932_v54, %v6930_v35  ;;  %v6993_v35 = vld [vmem:[#allocation2] sm:$0xff]  ;;  %v2368_v54 = vld [vmem:[%s6967_s11 + $0x10] sm:$0xff] }
 0x3ed   :  { %2369 = vst.msk [vmem:[#allocation2 + $0x18] sm:$0xff] %vm2360_vm4, %v2368_v54 }
 0x3ee   :  { %v2113_v25 = vadd.f32 %v2112_v24, %v2084_v49  ;;  %v6934_v26 = vpop.f32.mrf.mxu1  ;;  %v6936_v48 = vpop.f32.mrf.mxu0  ;;  %v2076_v24 = vadd.f32 %v6922_v27, %v6920_v57  ;;  %v5266_v57 = vld [vmem:[%s6951_s7] sm:$0xff]  ;;  %v2100_v27 = vadd.f32 %v6908_v36, %v2071_v12  ;;  %v2110_v17 = vadd.f32 %v6924_v45, %v2081_v9 }
 0x3f0   :  { %v6938_v30 = vadd.f32 %v2141_v4, %v2113_v25  ;;  %v5267_v25 = vld [vmem:[%s6951_s7 + $0x8] sm:$0xff]  ;;  %v2129_v45 = vadd.f32 %v6910_v2, %v2100_v27  ;;  %v5703_v27 = vmov 64.0  }
 0x3f1   :  { %5511 = vrcp.f32 %v5703_v27  ;;  %v5278_v27 = vld [vmem:[%s7086_s27 + $0x24] sm:$0xf] }
 0x3f3   :  { %v6940_v59 = vpop.f32.mrf.mxu2  ;;  %v6942_v14 = vpop.f32.mrf.mxu3 }
 0x3f6   :  { %v2213_v63 = vpop.f32.mrf.mxu1  ;;  %v2242_v40 = vpop.f32.mrf.mxu0 }
 0x3fb   :  { %v2155_v47 = vpop.f32.mrf.mxu2  ;;  %v2184_v42 = vpop.f32.mrf.mxu3 }
 0x3fc   :  { %v2156_v32 = vadd.f32 %v2155_v47, %v2127_v28 }
 0x3fe   :  { %v6944_v43 = vpop.f32.mrf.mxu1  ;;  %v6946_v55 = vpop.f32.mrf.mxu0  ;;  %v2185_v11 = vadd.f32 %v2184_v42, %v2156_v32  ;;  %v2382_v42 = vsel %vm2360_vm4, %v6993_v35, 0.0 }
 0x3ff   :  { %2383 = vadd.xlane.f32.xlu1 %v2382_v42 }
 0x400   :  { %v2214_v37 = vadd.f32 %v2213_v63, %v2185_v11  ;;  %v2105_v63 = vadd.f32 %v6916_v7, %v2076_v24  ;;  %v5659_v24 = vld [vmem:[%s5853_s25 + $0x28] sm:$0xff] }
 0x402   :  { %v2243_v58 = vadd.f32 %v2242_v40, %v2214_v37  ;;  %v2134_v32 = vadd.f32 %v6918_v52, %v2105_v63  ;;  %v2086_v37 = vadd.f32 %v6942_v14, %v6940_v59 }
 0x403   :  { %v6953_v6 = vpop.f32.mrf.mxu2  ;;  %v6955_v29 = vpop.f32.mrf.mxu3 }
 0x404   :  { %v2262_v16 = vmul.f32 %v5653_v56, %v2243_v58 }
 0x406   :  { %v2218_v21 = vpop.f32.mrf.mxu1  ;;  %v2247_v23 = vpop.f32.mrf.mxu0 }
 0x40b   :  { %v2160_v31 = vpop.f32.mrf.mxu2  ;;  %v2189_v41 = vpop.f32.mrf.mxu3 }
 0x40c   :  { %v2161_v20 = vadd.f32 %v2160_v31, %v2132_v8  ;;  %v5269_v8 = vld [vmem:[%s6951_s7 + $0x18] sm:$0xff]  ;;  %v2139_v31 = vadd.f32 %v6926_v0, %v2110_v17  ;;  %v5512_v17 = vpop.eup %5511  ;;  %s5708_s7 = smov 16  }
 0x40d   :  { %2349 = vmatpush.bf16.msra.mxu1 %v5269_v8  ;;  %vm2405_vm5 = vweird.f32 %v5512_v17  ;;  %s7278_s10 = sld [smem:[%s8018_s0 + %s5708_s7]]  }
 0x40e   :  { %v2190_v51 = vadd.f32 %v2189_v41, %v2161_v20  ;;  %v6959_v44 = vpop.f32.mrf.mxu1  ;;  %v6962_v18 = vpop.f32.mrf.mxu0  ;;  %v2158_v41 = vadd.f32 %v6953_v6, %v2129_v45  ;;  %v2115_v6 = vadd.f32 %v6934_v26, %v2086_v37  ;;  %v5356_v37 = vld [vmem:[%s6988_s15] ss:$0 sm:$0xff]  ;;  %s5710_s15 = smov 18  }
 0x40f   :  { %s7794_s18 = sld [smem:[%s8018_s0 + %s5710_s15]]  }
 0x410   :  { %v2219_v46 = vadd.f32 %v2218_v21, %v2190_v51  ;;  %v5655_v21 = vld [vmem:[%s5853_s25 + $0x20] sm:$0xff]  ;;  %v7006_v51 = vld [vmem:[#allocation2 + $0x18] sm:$0xff]  ;;  %v2187_v2 = vadd.f32 %v6955_v29, %v2158_v41 }
 0x411   :  { %2350 = vmatpush.bf16.msra.mxu1 %v5268_v13  ;;  %v2391_v58 = vsel %vm2360_vm4, %v7006_v51, 0.0  ;;  %v5658_v13 = vld [vmem:[%s5853_s25 + $0x8] sm:$0xff] }
 0x412   :  { %v2248_v10 = vadd.f32 %v2247_v23, %v2219_v46  ;;  %2392 = vadd.xlane.f32.xlu1 %v2391_v58 }
 0x413   :  { %v2162_v22 = vpop.f32.mrf.mxu2  ;;  %v2191_v28 = vpop.f32.mrf.mxu3 }
 0x414   :  { %v2264_v50 = vmul.f32 %v5654_v15, %v2248_v10  ;;  %v2163_v39 = vadd.f32 %v2162_v22, %v2134_v32 }
 0x415   :  { %2351 = vmatpush.bf16.msra.mxu1 %v5267_v25  ;;  %v5660_v25 = vld [vmem:[%s5853_s25 + $0x38] sm:$0xff] }
 0x416   :  { %v2270_v62 = vadd.f32 %v2264_v50, %v2262_v16  ;;  %v2223_v33 = vpop.f32.mrf.mxu1  ;;  %v2252_v38 = vpop.f32.mrf.mxu0  ;;  %v2192_v20 = vadd.f32 %v2191_v28, %v2163_v39  ;;  %v2216_v28 = vadd.f32 %v6944_v43, %v2187_v2 }
 0x418   :  { %v2221_v59 = vadd.f32 %v6959_v44, %v2192_v20  ;;  %v2245_v50 = vadd.f32 %v6946_v55, %v2216_v28 }
 0x419   :  { %2352 = vmatpush.bf16.msra.mxu1 %v5266_v57 }
 0x41a   :  { %v2250_v29 = vadd.f32 %v6962_v18, %v2221_v59  ;;  %v2263_v18 = vmul.f32 %v5658_v13, %v2245_v50 }
 0x41b   :  { %v2165_v34 = vpop.f32.mrf.mxu2  ;;  %v2194_v61 = vpop.f32.mrf.mxu3 }
 0x41c   :  { %v2166_v4 = vadd.f32 %v2165_v34, %v6928_v60 }
 0x41e   :  { %v2195_v49 = vadd.f32 %v2194_v61, %v2166_v4  ;;  %v2225_v60 = vpop.f32.mrf.mxu1  ;;  %v2254_v36 = vpop.f32.mrf.mxu0 }
 0x420   :  { %v2224_v40 = vadd.f32 %v2223_v33, %v2195_v49 }
 0x422   :  { %v2253_v19 = vadd.f32 %v2252_v38, %v2224_v40  ;;  %v5657_v38 = vld [vmem:[%s5853_s25 + $0x18] sm:$0xff] }
 0x423   :  { %v2167_v7 = vpop.f32.mrf.mxu2  ;;  %v2196_v47 = vpop.f32.mrf.mxu3  ;;  %v2265_v43 = vmul.f32 %v5657_v38, %v2250_v29 }
 0x424   :  { %v2266_v23 = vmul.f32 %v5655_v21, %v2253_v19  ;;  %v2168_v3 = vadd.f32 %v2167_v7, %v2139_v31  ;;  %v2401_v19 = vmul.f32 64.0, %v5512_v17  ;;  %v2364_v31 = vld [vmem:[%s6967_s11 + $0x8] sm:$0xff] }
 0x425   :  { %v2273_v9 = vadd.f32 %v2265_v43, %v2263_v18  ;;  %2365 = vst.msk [vmem:[#allocation2 + $0xc] sm:$0xff] %vm2360_vm4, %v2364_v31 }
 0x426   :  { %v2271_v11 = vadd.f32 %v2270_v62, %v2266_v23  ;;  %v2197_v46 = vadd.f32 %v2196_v47, %v2168_v3  ;;  %v2228_v0 = vpop.f32.mrf.mxu1  ;;  %v2257_v22 = vpop.f32.mrf.mxu0  ;;  %v5656_v62 = vld [vmem:[%s5853_s25 + $0x30] sm:$0xff] }
 0x428   :  { %v2226_v53 = vadd.f32 %v2225_v60, %v2197_v46  ;;  %v2402_v60 = vsub.f32 1.0, %v2401_v19  ;;  %v4993_v19 = vld [vmem:[%s7086_s27 + $0x28] sm:$0xf0] }
 0x42a   :  { %v2255_v26 = vadd.f32 %v2254_v36, %v2226_v53  ;;  %v2403_v54 = vmul.f32 %v5512_v17, %v2402_v60 }
 0x42b   :  { %v2170_v52 = vpop.f32.mrf.mxu2  ;;  %v2199_v1 = vpop.f32.mrf.mxu3 }
 0x42c   :  { %v2171_v10 = vadd.f32 %v2170_v52, %v6938_v30  ;;  %v2144_v30 = vadd.f32 %v6936_v48, %v2115_v6  ;;  %v2267_v4 = vmul.f32 %v5659_v24, %v2255_v26  ;;  %v2404_v7 = vadd.f32 %v5512_v17, %v2403_v54 }
 0x42d   :  { %v4996_v54 = vor.u32 %v5278_v27, %v4993_v19  ;;  %v5358_v27 = vld [vmem:[%s7031_s23] ss:$0 sm:$0xff]  ;;  %s5712_s23 = smov 20  }
 0x42e   :  { %v2200_v14 = vadd.f32 %v2199_v1, %v2171_v10  ;;  %v2230_v61 = vpop.f32.mrf.mxu1  ;;  %v2259_v48 = vpop.f32.mrf.mxu0  ;;  %v2274_v55 = vadd.f32 %v2273_v9, %v2267_v4  ;;  %v7033_v47 = vsel %vm2405_vm5, %v5512_v17, %v2404_v7  ;;  %v5280_v9 = vld [vmem:[%s7086_s27 + $0x34] sm:$0xf]  ;;  %s7843_s26 = sld [smem:[%s8018_s0 + %s5712_s23]]   ;;  %s5720_s23 = smov 96  }
 0x430   :  { %v2229_v56 = vadd.f32 %v2228_v0, %v2200_v14 }
 0x432   :  { %v2258_v16 = vadd.f32 %v2257_v22, %v2229_v56 }
 0x433   :  { %v2172_v15 = vpop.f32.mrf.mxu2  ;;  %v2201_v33 = vpop.f32.mrf.mxu3 }
 0x434   :  { %v2268_v44 = vmul.f32 %v5656_v62, %v2258_v16  ;;  %v2173_v8 = vadd.f32 %v2172_v15, %v2144_v30 }
 0x436   :  { %v2272_v5 = vadd.f32 %v2271_v11, %v2268_v44  ;;  %v2202_v34 = vadd.f32 %v2201_v33, %v2173_v8 }
 0x438   :  { %v2231_v12 = vadd.f32 %v2230_v61, %v2202_v34 }
 0x43a   :  { %v2260_v49 = vadd.f32 %v2259_v48, %v2231_v12  ;;  %v4999_v12 = vld [vmem:[%s7086_s27 + $0x30] sm:$0xf]  ;;  %v5281_v48 = vld [vmem:[%s7086_s27 + $0x34] sm:$0xf0] }
 0x43c   :  { %v2269_v63 = vmul.f32 %v5660_v25, %v2260_v49  ;;  %v5000_v49 = vor.u32 %v5281_v48, %v4999_v12  ;;  %v5357_v48 = vld [vmem:[%s7026_s19] ss:$0 sm:$0xff]  ;;  %s5711_s19 = smov 19  }
 0x43d   :  { %s7836_s22 = sld [smem:[%s8018_s0 + %s5711_s19]]  }
 0x43e   :  { %v2275_v40 = vadd.f32 %v2274_v55, %v2269_v63  ;;  %v5001_v55 = vld [vmem:[%s7086_s27 + $0x38] sm:$0xf0]  ;;  %2609 = vmatpush.bf16.msrb.mxu3 %v5000_v49 }
 0x43f   :  { %v5004_v25 = vor.u32 %v5280_v9, %v5001_v55 }
 0x440   :  { %v2276_v57 = vpack.c.bf16 %v2275_v40, %v2272_v5  ;;  %v4991_v40 = vld [vmem:[%s7086_s27 + $0x20] sm:$0xf] }
 0x441   :  { %2633 = vmatpush.bf16.msrb.mxu1 %v5004_v25 }
 0x442   :  { %2353 = vmatmul.bf16.vlgmr.msra.gmra.mxu1 %v2276_v57  ;;  %v5279_v57 = vld [vmem:[%s7086_s27 + $0x24] sm:$0xf0] }
 0x443   :  { %v4992_v17 = vor.u32 %v5279_v57, %v4991_v40 }
 0x445   :  { %2610 = vmatpush.bf16.msrb.mxu3 %v4992_v17  ;;  %2634 = vmatpush.bf16.msrb.mxu1 %v4996_v54 }
 0x472   :  { %v2384_v42 = vpop.xlane.xlu1 %2383 }
 0x473   :  { %v2407_v32 = vmul.f32 %v7033_v47, %v2384_v42  ;;  %v4983_v42 = vld [vmem:[%s7086_s27 + $0x10] sm:$0xf] }
 0x475   :  { %v7037_v21 = vsub.f32 %v6993_v35, %v2407_v32  ;;  %v2371_v35 = vld [vmem:[%s6967_s11 + $0x18] sm:$0xff]  ;;  %s5709_s11 = smov 17  }
 0x476   :  { %2372 = vst.msk [vmem:[#allocation2 + $0x24] sm:$0xff] %vm2360_vm4, %v2371_v35  ;;  %v5277_v32 = vld [vmem:[%s7086_s27 + $0x14] sm:$0xf0]  ;;  %v4975_v35 = vld [vmem:[%s7086_s27] sm:$0xf]  ;;  %s4409_s14 = sld [smem:[%s8018_s0 + %s5709_s11]]  }
 0x477   :  { %v2419_v23 = vmul.f32 %v7037_v21, %v7037_v21 }
 0x479   :  { %v2425_v36 = vsel %vm2360_vm4, %v2419_v23, 0.0  ;;  %v5276_v23 = vld [vmem:[%s7086_s27 + $0x14] sm:$0xf] }
 0x47a   :  { %2426 = vadd.xlane.f32.xlu1 %v2425_v36 }
 0x485   :  { %v2393_v45 = vpop.xlane.xlu1 %2392 }
 0x486   :  { %v2410_v39 = vmul.f32 %v7033_v47, %v2393_v45  ;;  %v4984_v45 = vor.u32 %v5277_v32, %v4983_v42 }
 0x488   :  { %v7044_v11 = vsub.f32 %v7006_v51, %v2410_v39  ;;  %v4985_v39 = vld [vmem:[%s7086_s27 + $0x18] sm:$0xf0]  ;;  %2611 = vmatpush.bf16.msrb.mxu3 %v4984_v45 }
 0x489   :  { %v4988_v31 = vor.u32 %v5276_v23, %v4985_v39 }
 0x48a   :  { %v2422_v41 = vmul.f32 %v7044_v11, %v7044_v11 }
 0x48b   :  { %2635 = vmatpush.bf16.msrb.mxu1 %v4988_v31 }
 0x48c   :  { %v2434_v3 = vsel %vm2360_vm4, %v2422_v41, 0.0 }
 0x48d   :  { %2435 = vadd.xlane.f32.xlu1 %v2434_v3  ;;  %v5275_v3 = vld [vmem:[%s7086_s27 + $0x4] sm:$0xf0] }
 0x4bf   :  { %v2354_v20 = vpop.f32.mrf.mxu1 }
 0x4c0   :  { %v2355_v52 = vadd.f32 %v5356_v37, %v2354_v20 }
 0x4c2   :  { %2363 = vst.msk [vmem:[#allocation2 + $0x8] sm:$0xf] %vm2362_vm6, %v2355_v52 }
 0x4c3   :  { %2367 = vst.msk [vmem:[#allocation2 + $0x10] sm:$0xf0] %vm2366_vm7, %v2355_v52 }
 0x4c7   :  { %v2356_v51 = vpop.f32.mrf.mxu1 }
 0x4c8   :  { %v2357_v1 = vadd.f32 %v5356_v37, %v2356_v51  ;;  %v5274_v37 = vld [vmem:[%s7086_s27 + $0x4] sm:$0xf]  ;;  %v4976_v51 = vor.u32 %v5275_v3, %v4975_v35 }
 0x4c9   :  { %v2375_v58 = vld [vmem:[#allocation2 + $0x8] sm:$0xff] }
 0x4ca   :  { %2370 = vst.msk [vmem:[#allocation2 + $0x20] sm:$0xf] %vm2362_vm6, %v2357_v1  ;;  %v2376_v2 = vld [vmem:[#allocation2 + $0x10] sm:$0xff]  ;;  %v2385_v46 = vsel %vm2360_vm4, %v2375_v58, 0.0  ;;  %2612 = vmatpush.bf16.msrb.mxu3 %v4976_v51 }
 0x4cb   :  { %2373 = vst.msk [vmem:[#allocation2 + $0x28] sm:$0xf0] %vm2366_vm7, %v2357_v1  ;;  %v2388_v10 = vsel %vm2360_vm4, %v2376_v2, 0.0  ;;  %2386 = vadd.xlane.f32.xlu2 %v2385_v46  ;;  %v4977_v1 = vld [vmem:[%s7086_s27 + $0x8] sm:$0xf0]  ;;  %s5713_s27 = smov 22  }
 0x4cc   :  { %2389 = vadd.xlane.f32.xlu0 %v2388_v10  ;;  %v4980_v46 = vor.u32 %v5274_v37, %v4977_v1  ;;  %s7890_s30 = sld [smem:[%s8018_s0 + %s5713_s27]]  }
 0x4cd   :  { %s7998_s27 = sld [smem:[%s8018_s0 + %s5721_s24]]  }
 0x4ce   :  { %2636 = vmatpush.bf16.msrb.mxu1 %v4980_v46 }
 0x4d1   :  { %v2378_v0 = vld [vmem:[#allocation2 + $0x20] sm:$0xff] }
 0x4d2   :  { %v2379_v6 = vld [vmem:[#allocation2 + $0x28] sm:$0xff]  ;;  %v2394_v59 = vsel %vm2360_vm4, %v2378_v0, 0.0 }
 0x4d3   :  { %v2397_v14 = vsel %vm2360_vm4, %v2379_v6, 0.0  ;;  %2395 = vadd.xlane.f32.xlu2 %v2394_v59 }
 0x4d4   :  { %2398 = vadd.xlane.f32.xlu0 %v2397_v14 }
 0x4ed   :  { %v2427_v18 = vpop.xlane.xlu1 %2426 }
 0x4ee   :  { %v2443_v24 = vmul.f32 %v2427_v18, %v7033_v47 }
 0x4f0   :  { %v7088_v4 = vadd.f32 1e-05, %v2443_v24 }
 0x4f2   :  { %5513 = vrsqrt.f32 %v7088_v4  ;;  %vm2461_vm8 = vweird.f32 %v7088_v4 }
 0x4f8   :  { %v7099_v60 = vpop.eup %5513 }
 0x4f9   :  { %v2456_v36 = vmul.f32 %v7099_v60, %v7088_v4  ;;  %vm2462_vm9 = vweird.f32 %v7099_v60 }
 0x4fa   :  { %vm2463_vm10 = vmor %vm2461_vm8, %vm2462_vm9 }
 0x4fb   :  { %v2457_v20 = vmul.f32 %v7099_v60, %v2456_v36 }
 0x500   :  { %v2436_v63 = vpop.xlane.xlu1 %2435 }
 0x501   :  { %v2446_v7 = vmul.f32 %v2436_v63, %v7033_v47 }
 0x503   :  { %v7108_v41 = vadd.f32 1e-05, %v2446_v7 }
 0x505   :  { %5515 = vrsqrt.f32 %v7108_v41  ;;  %vm2491_vm14 = vweird.f32 %v7108_v41 }
 0x53e   :  { %v2387_v22 = vpop.xlane.xlu2 %2386 }
 0x53f   :  { %v2390_v28 = vpop.xlane.xlu0 %2389  ;;  %v2408_v53 = vmul.f32 %v7033_v47, %v2387_v22 }
 0x540   :  { %v2409_v56 = vmul.f32 %v7033_v47, %v2390_v28  ;;  %v7118_v28 = vpop.eup %5515 }
 0x541   :  { %v7060_v29 = vsub.f32 %v2375_v58, %v2408_v53  ;;  %vm2492_vm15 = vweird.f32 %v7118_v28 }
 0x542   :  { %v7062_v16 = vsub.f32 %v2376_v2, %v2409_v56  ;;  %vm2493_vm2 = vmor %vm2491_vm14, %vm2492_vm15 }
 0x543   :  { %v2420_v30 = vmul.f32 %v7060_v29, %v7060_v29 }
 0x544   :  { %v2421_v15 = vmul.f32 %v7062_v16, %v7062_v16 }
 0x545   :  { %v2428_v50 = vsel %vm2360_vm4, %v2420_v30, 0.0 }
 0x546   :  { %v2431_v26 = vsel %vm2360_vm4, %v2421_v15, 0.0  ;;  %2429 = vadd.xlane.f32.xlu2 %v2428_v50  ;;  %v2396_v62 = vpop.xlane.xlu2 %2395 }
 0x547   :  { %2432 = vadd.xlane.f32.xlu0 %v2431_v26  ;;  %v2399_v44 = vpop.xlane.xlu0 %2398  ;;  %v2411_v8 = vmul.f32 %v7033_v47, %v2396_v62  ;;  %v2486_v62 = vmul.f32 %v7118_v28, %v7108_v41 }
 0x548   :  { %v2412_v33 = vmul.f32 %v7033_v47, %v2399_v44 }
 0x549   :  { %v7072_v38 = vsub.f32 %v2378_v0, %v2411_v8  ;;  %v2487_v18 = vmul.f32 %v7118_v28, %v2486_v62 }
 0x54a   :  { %v7074_v43 = vsub.f32 %v2379_v6, %v2412_v33  ;;  %v2458_v6 = vmul.f32 0.5, %v2457_v20 }
 0x54b   :  { %v2423_v5 = vmul.f32 %v7072_v38, %v7072_v38  ;;  %v2488_v49 = vmul.f32 0.5, %v2487_v18  ;;  %v2672_v18 = vld [vmem:[%s7160_s5 + $0x68] sm:$0xff] }
 0x54c   :  { %v2424_v34 = vmul.f32 %v7074_v43, %v7074_v43  ;;  %v2459_v14 = vsub.f32 1.5, %v2458_v6 }
 0x54d   :  { %v2437_v61 = vsel %vm2360_vm4, %v2423_v5, 0.0 }
 0x54e   :  { %v2440_v13 = vsel %vm2360_vm4, %v2424_v34, 0.0  ;;  %2438 = vadd.xlane.f32.xlu2 %v2437_v61  ;;  %v2460_v26 = vmul.f32 %v7099_v60, %v2459_v14 }
 0x54f   :  { %2441 = vadd.xlane.f32.xlu0 %v2440_v13 }
 0x550   :  { %v2464_v13 = vsel %vm2463_vm10, %v7099_v60, %v2460_v26  ;;  %v2489_v60 = vsub.f32 1.5, %v2488_v49 }
 0x551   :  { %v2515_v9 = vmul.f32 %v2464_v13, %v7037_v21 }
 0x552   :  { %v2490_v36 = vmul.f32 %v7118_v28, %v2489_v60 }
 0x553   :  { %v2524_v17 = vmul.f32 %v5357_v48, %v2515_v9 }
 0x554   :  { %v2494_v41 = vsel %vm2493_vm2, %v7118_v28, %v2490_v36 }
 0x555   :  { %v2533_v32 = vadd.f32 %v5358_v27, %v2524_v17  ;;  %v2518_v20 = vmul.f32 %v2494_v41, %v7044_v11  ;;  %v2674_v41 = vld [vmem:[%s7160_s5 + $0x78] sm:$0xff] }
 0x5b9   :  { %v2430_v52 = vpop.xlane.xlu2 %2429 }
 0x5ba   :  { %v2433_v58 = vpop.xlane.xlu0 %2432  ;;  %v2444_v2 = vmul.f32 %v2430_v52, %v7033_v47 }
 0x5bb   :  { %v2445_v10 = vmul.f32 %v2433_v58, %v7033_v47  ;;  %v2527_v58 = vmul.f32 %v5357_v48, %v2518_v20 }
 0x5bc   :  { %v2450_v0 = vadd.f32 1e-05, %v2444_v2 }
 0x5bd   :  { %v2451_v59 = vadd.f32 1e-05, %v2445_v10 }
 0x5be   :  { %5517 = vrsqrt.f32 %v2450_v0  ;;  %vm2471_vm12 = vweird.f32 %v2450_v0 }
 0x5bf   :  { %5519 = vrsqrt.f32 %v2451_v59  ;;  %vm2481_vm3 = vweird.f32 %v2451_v59 }
 0x5c1   :  { %v2439_v22 = vpop.xlane.xlu2 %2438 }
 0x5c2   :  { %v2442_v53 = vpop.xlane.xlu0 %2441  ;;  %v2447_v56 = vmul.f32 %v2439_v22, %v7033_v47 }
 0x5c3   :  { %v2448_v30 = vmul.f32 %v2442_v53, %v7033_v47 }
 0x5c4   :  { %v5518_v15 = vpop.eup %5517  ;;  %v7127_v8 = vadd.f32 1e-05, %v2447_v56 }
 0x5c5   :  { %v5520_v50 = vpop.eup %5519  ;;  %v2466_v44 = vmul.f32 %v5518_v15, %v2450_v0  ;;  %v2454_v5 = vadd.f32 1e-05, %v2448_v30  ;;  %vm2472_vm11 = vweird.f32 %v5518_v15  ;;  %v2536_v0 = vadd.f32 %v5358_v27, %v2527_v58 }
 0x5c6   :  { %v2476_v33 = vmul.f32 %v5520_v50, %v2451_v59  ;;  %5521 = vrsqrt.f32 %v7127_v8  ;;  %vm2473_vm13 = vmor %vm2471_vm12, %vm2472_vm11  ;;  %vm2482_vm1 = vweird.f32 %v5520_v50  ;;  %vm2501_vm8 = vweird.f32 %v7127_v8 }
 0x5c7   :  { %v2467_v34 = vmul.f32 %v5518_v15, %v2466_v44  ;;  %5523 = vrsqrt.f32 %v2454_v5  ;;  %vm2483_vm5 = vmor %vm2481_vm3, %vm2482_vm1  ;;  %vm2511_vm9 = vweird.f32 %v2454_v5  ;;  %v2659_v44 = vld [vmem:[%s7160_s5] sm:$0xff] }
 0x5c8   :  { %v2477_v61 = vmul.f32 %v5520_v50, %v2476_v33 }
 0x5c9   :  { %v2468_v24 = vmul.f32 0.5, %v2467_v34  ;;  %v2666_v34 = vld [vmem:[%s7160_s5 + $0x38] sm:$0xff] }
 0x5ca   :  { %v2478_v4 = vmul.f32 0.5, %v2477_v61  ;;  %v2671_v61 = vld [vmem:[%s7160_s5 + $0x60] sm:$0xff] }
 0x5cb   :  { %v2469_v12 = vsub.f32 1.5, %v2468_v24  ;;  %v2677_v24 = vld [vmem:[%s7160_s5 + $0x90] sm:$0xff] }
 0x5cc   :  { %v5522_v25 = vpop.eup %5521  ;;  %v2479_v63 = vsub.f32 1.5, %v2478_v4  ;;  %v2678_v4 = vld [vmem:[%s7160_s5 + $0x98] sm:$0xff] }
 0x5cd   :  { %v2470_v55 = vmul.f32 %v5518_v15, %v2469_v12  ;;  %v5524_v57 = vpop.eup %5523  ;;  %v2496_v42 = vmul.f32 %v5522_v25, %v7127_v8  ;;  %vm2502_vm6 = vweird.f32 %v5522_v25  ;;  %v2665_v8 = vld [vmem:[%s7160_s5 + $0x30] sm:$0xff] }
 0x5ce   :  { %v2480_v7 = vmul.f32 %v5520_v50, %v2479_v63  ;;  %v2506_v21 = vmul.f32 %v5524_v57, %v2454_v5  ;;  %vm2512_vm7 = vweird.f32 %v5524_v57  ;;  %vm2503_vm10 = vmor %vm2501_vm8, %vm2502_vm6  ;;  %v2660_v5 = vld [vmem:[%s7160_s5 + $0x8] sm:$0xff] }
 0x5cf   :  { %v2474_v40 = vsel %vm2473_vm13, %v5518_v15, %v2470_v55  ;;  %v2497_v31 = vmul.f32 %v5522_v25, %v2496_v42  ;;  %vm2513_vm11 = vmor %vm2511_vm9, %vm2512_vm7 }
 0x5d0   :  { %v2516_v19 = vmul.f32 %v2474_v40, %v7060_v29  ;;  %v2484_v29 = vsel %vm2483_vm5, %v5520_v50, %v2480_v7  ;;  %v2507_v39 = vmul.f32 %v5524_v57, %v2506_v21 }
 0x5d1   :  { %v2517_v35 = vmul.f32 %v2484_v29, %v7062_v16  ;;  %v2498_v37 = vmul.f32 0.5, %v2497_v31  ;;  %v2668_v29 = vld [vmem:[%s7160_s5 + $0x48] sm:$0xff] }
 0x5d2   :  { %v2525_v54 = vmul.f32 %v5357_v48, %v2516_v19  ;;  %v2508_v3 = vmul.f32 0.5, %v2507_v39  ;;  %v2673_v39 = vld [vmem:[%s7160_s5 + $0x70] sm:$0xff] }
 0x5d3   :  { %v2526_v52 = vmul.f32 %v5357_v48, %v2517_v35  ;;  %v2499_v1 = vsub.f32 1.5, %v2498_v37  ;;  %v2679_v35 = vld [vmem:[%s7160_s5 + $0xa0] sm:$0xff] }
 0x5d4   :  { %v2534_v23 = vadd.f32 %v5358_v27, %v2525_v54  ;;  %v2509_v51 = vsub.f32 1.5, %v2508_v3  ;;  %v2680_v3 = vld [vmem:[%s7160_s5 + $0xa8] sm:$0xff] }
 0x5d5   :  { %v2535_v2 = vadd.f32 %v5358_v27, %v2526_v52  ;;  %v2500_v10 = vmul.f32 %v5522_v25, %v2499_v1 }
 0x5d6   :  { %v2539_v45 = vpack.c.bf16 %v2534_v23, %v2533_v32  ;;  %v2510_v46 = vmul.f32 %v5524_v57, %v2509_v51  ;;  %v2661_v32 = vld [vmem:[%s7160_s5 + $0x10] sm:$0xff]  ;;  %v2667_v23 = vld [vmem:[%s7160_s5 + $0x40] sm:$0xff] }
 0x5d7   :  { %v2540_v16 = vpack.c.bf16 %v2536_v0, %v2535_v2  ;;  %v2504_v59 = vsel %vm2503_vm10, %v5522_v25, %v2500_v10 }
 0x5d8   :  { %5005 = vmatmul.msk.bf16.vlgmr.msrb.gmra.mxu3 %vm2360_vm4, %v2539_v45  ;;  %5008 = vmatmul.msk.bf16.vlgmr.msrb.gmra.mxu1 %vm2360_vm4, %v2539_v45  ;;  %v2514_v6 = vsel %vm2513_vm11, %v5524_v57, %v2510_v46  ;;  %v2519_v14 = vmul.f32 %v2504_v59, %v7072_v38  ;;  %v2662_v45 = vld [vmem:[%s7160_s5 + $0x18] sm:$0xff] }
 0x5d9   :  { %v2520_v11 = vmul.f32 %v2514_v6, %v7074_v43  ;;  %v2550_v43 = vld [vmem:[%s4406_s1] sm:$0x3]  ;;  %s5714_s1 = smov 21  }
 0x5da   :  { %v2528_v22 = vmul.f32 %v5357_v48, %v2519_v14  ;;  %v7162_v50 = vperm.slane %v2550_v43, 0  ;;  %s4413_s4 = sld [smem:[%s8018_s0 + %s5714_s1]]  }
 0x5db   :  { %v2529_v28 = vmul.f32 %v5357_v48, %v2520_v11  ;;  %s4419_s1 = sld [smem:[%s8018_s0 + %s5722_s28]]  }
 0x5dc   :  { %v2537_v53 = vadd.f32 %v5358_v27, %v2528_v22  ;;  %v2553_v22 = vperm.slane %v2550_v43, 1 }
 0x5dd   :  { %v2538_v56 = vadd.f32 %v5358_v27, %v2529_v28 }
 0x5df   :  { %v2541_v30 = vpack.c.bf16 %v2538_v56, %v2537_v53 }
 0x5e8   :  { %5006 = vmatmul.msk.bf16.gmra.mxu3 %vm2360_vm4, %v2540_v16  ;;  %5009 = vmatmul.msk.bf16.gmra.mxu1 %vm2360_vm4, %v2540_v16 }
 0x5f8   :  { %5007 = vmatmul.msk.bf16.gmra.mxu3 %vm2360_vm4, %v2541_v30  ;;  %5010 = vmatmul.msk.bf16.gmra.mxu1 %vm2360_vm4, %v2541_v30 }
 0x655   :  { %v7155_v15 = vpop.f32.mrf.mxu1 }
 0x65b   :  { %v2614_v38 = vpop.f32.mrf.mxu3 }
 0x65c   :  { %v2615_v62 = vadd.f32 %v2614_v38, %v7162_v50 }
 0x65d   :  { %v7164_v26 = vpop.f32.mrf.mxu1 }
 0x65e   :  { %v7176_v12 = vmul.f32 %v2659_v44, %v2615_v62  ;;  %v7180_v55 = vmul.f32 %v2665_v8, %v2615_v62  ;;  %v7184_v63 = vmul.f32 %v2671_v61, %v2615_v62  ;;  %v7188_v57 = vmul.f32 %v2677_v24, %v2615_v62  ;;  %v2663_v8 = vld [vmem:[%s7160_s5 + $0x20] sm:$0xff]  ;;  %v2664_v61 = vld [vmem:[%s7160_s5 + $0x28] sm:$0xff] }
 0x65f   :  { %v2641_v43 = vadd.f32 %v7164_v26, %v2553_v22 }
 0x663   :  { %v2616_v33 = vpop.f32.mrf.mxu3 }
 0x664   :  { %v2617_v13 = vadd.f32 %v2616_v33, %v7162_v50  ;;  %v2669_v33 = vld [vmem:[%s7160_s5 + $0x50] sm:$0xff] }
 0x665   :  { %v2643_v48 = vpop.f32.mrf.mxu1 }
 0x666   :  { %v7178_v9 = vmul.f32 %v2660_v5, %v2617_v13  ;;  %v2653_v49 = vpack.c.bf16 %v2617_v13, %v2615_v62  ;;  %v7182_v25 = vmul.f32 %v2666_v34, %v2617_v13  ;;  %v7186_v40 = vmul.f32 %v2672_v18, %v2617_v13  ;;  %v2675_v5 = vld [vmem:[%s7160_s5 + $0x80] sm:$0xff]  ;;  %v2676_v18 = vld [vmem:[%s7160_s5 + $0x88] sm:$0xff] }
 0x667   :  { %v7190_v27 = vmul.f32 %v2678_v4, %v2617_v13  ;;  %v2644_v44 = vadd.f32 %v2643_v48, %v2553_v22  ;;  %v2670_v13 = vld [vmem:[%s7160_s5 + $0x58] sm:$0xff] }
 0x668   :  { %v2707_v17 = vpack.c.bf16 %v7178_v9, %v7176_v12  ;;  %2722 = vrot.lane.b32.xlu0 %v2653_v49, %s5707_s6  ;;  %v2710_v19 = vpack.c.bf16 %v7182_v25, %v7180_v55  ;;  %v2713_v60 = vpack.c.bf16 %v7186_v40, %v7184_v63  ;;  %v2681_v49 = vld [vmem:[%s7160_s5 + $0xb0] sm:$0xff]  ;;  %v2866_v9 = vld [vmem:[%s7278_s10] sm:$0xff] }
 0x669   :  { %v2716_v54 = vpack.c.bf16 %v7190_v27, %v7188_v57 }
 0x66b   :  { %v2619_v7 = vpop.f32.mrf.mxu3 }
 0x66c   :  { %v2620_v42 = vadd.f32 %v2619_v7, %v7162_v50  ;;  %v2682_v7 = vld [vmem:[%s7160_s5 + $0xb8] sm:$0xff] }
 0x66d   :  { %v2645_v21 = vpop.f32.mrf.mxu1 }
 0x66e   :  { %v7211_v20 = vmul.f32 %v2661_v32, %v2620_v42  ;;  %v7215_v1 = vmul.f32 %v2667_v23, %v2620_v42  ;;  %v7219_v2 = vmul.f32 %v2673_v39, %v2620_v42  ;;  %v7223_v10 = vmul.f32 %v2679_v35, %v2620_v42 }
 0x66f   :  { %v2646_v30 = vadd.f32 %v2645_v21, %v2553_v22  ;;  %v2639_v21 = vadd.f32 %v7155_v15, %v2553_v22 }
 0x671   :  { %v2657_v24 = vpack.c.bf16 %v2646_v30, %v2644_v44  ;;  %v2656_v26 = vpack.c.bf16 %v2641_v43, %v2639_v21  ;;  %v2871_v44 = vld [vmem:[%s7278_s10 + $0x28] sm:$0xff] }
 0x673   :  { %v2621_v36 = vpop.f32.mrf.mxu3 }
 0x674   :  { %v2622_v31 = vadd.f32 %v2621_v36, %v7162_v50 }
 0x675   :  { %v2648_v37 = vpop.f32.mrf.mxu1 }
 0x676   :  { %v2654_v52 = vpack.c.bf16 %v2622_v31, %v2620_v42  ;;  %v7213_v51 = vmul.f32 %v2662_v45, %v2622_v31  ;;  %v7217_v58 = vmul.f32 %v2668_v29, %v2622_v31  ;;  %v7221_v46 = vmul.f32 %v2674_v41, %v2622_v31 }
 0x677   :  { %v7225_v0 = vmul.f32 %v2680_v3, %v2622_v31  ;;  %v2649_v53 = vadd.f32 %v2648_v37, %v2553_v22 }
 0x678   :  { %2724 = vrot.lane.b32.xlu2 %v2654_v52, %s5707_s6  ;;  %v2708_v16 = vpack.c.bf16 %v7213_v51, %v7211_v20  ;;  %v2711_v6 = vpack.c.bf16 %v7217_v58, %v7215_v1  ;;  %v2714_v59 = vpack.c.bf16 %v7221_v46, %v7219_v2  ;;  %v2868_v46 = vld [vmem:[%s7278_s10 + $0x10] sm:$0xff] }
 0x679   :  { %v2717_v11 = vpack.c.bf16 %v7225_v0, %v7223_v10  ;;  %v2872_v0 = vld [vmem:[%s7278_s10 + $0x30] sm:$0xff] }
 0x67b   :  { %v2624_v14 = vpop.f32.mrf.mxu3 }
 0x67c   :  { %v2625_v62 = vadd.f32 %v2624_v14, %v7162_v50 }
 0x67d   :  { %v2650_v28 = vpop.f32.mrf.mxu1 }
 0x67e   :  { %v2651_v56 = vadd.f32 %v2650_v28, %v2553_v22  ;;  %v2687_v42 = vmul.f32 %v2663_v8, %v2625_v62  ;;  %v2693_v32 = vmul.f32 %v2669_v33, %v2625_v62  ;;  %v2699_v48 = vmul.f32 %v2675_v5, %v2625_v62  ;;  %v2869_v22 = vld [vmem:[%s7278_s10 + $0x18] sm:$0xff] }
 0x67f   :  { %v7248_v39 = vmul.f32 %v2681_v49, %v2625_v62 }
 0x680   :  { %v2658_v38 = vpack.c.bf16 %v2651_v56, %v2649_v53 }
 0x682   :  { %3543 = vmatpush.bf16.msra.mxu2 %v2658_v38  ;;  %v2870_v38 = vld [vmem:[%s7278_s10 + $0x20] sm:$0xff] }
 0x683   :  { %v2626_v34 = vpop.f32.mrf.mxu3 }
 0x684   :  { %v2627_v4 = vadd.f32 %v2626_v34, %v7162_v50 }
 0x686   :  { %3544 = vmatpush.bf16.msra.mxu2 %v2657_v24  ;;  %v2655_v23 = vpack.c.bf16 %v2627_v4, %v2625_v62  ;;  %v2688_v36 = vmul.f32 %v2664_v61, %v2627_v4  ;;  %v2694_v45 = vmul.f32 %v2670_v13, %v2627_v4  ;;  %v2700_v29 = vmul.f32 %v2676_v18, %v2627_v4  ;;  %v2873_v18 = vld [vmem:[%s7278_s10 + $0x38] sm:$0xff] }
 0x687   :  { %v7250_v31 = vmul.f32 %v2682_v7, %v2627_v4  ;;  %v2874_v7 = vld [vmem:[%s7278_s10 + $0x40] sm:$0xff] }
 0x688   :  { %2726 = vrot.lane.b32.xlu1 %v2655_v23, %s5707_s6  ;;  %v2709_v50 = vpack.c.bf16 %v2688_v36, %v2687_v42  ;;  %v2712_v41 = vpack.c.bf16 %v2694_v45, %v2693_v32  ;;  %v2715_v35 = vpack.c.bf16 %v2700_v29, %v2699_v48 }
 0x689   :  { %v2718_v15 = vpack.c.bf16 %v7250_v31, %v7248_v39 }
 0x68a   :  { %3545 = vmatpush.bf16.msra.mxu2 %v2656_v26 }
 0x6d2   :  { %v2725_v20 = vpop.permute.xlu2 %2724 }
 0x6d3   :  { %v2768_v52 = vsel %vm2360_vm4, %v2725_v20, 0 }
 0x6da   :  { %v2723_v51 = vpop.permute.xlu0 %2722 }
 0x6db   :  { %v2765_v1 = vsel %vm2360_vm4, %v2723_v51, 0 }
 0x6fa   :  { %v2727_v3 = vpop.permute.xlu1 %2726 }
 0x6fb   :  { %v2771_v37 = vsel %vm2360_vm4, %v2727_v3, 0  ;;  %v2875_v3 = vld [vmem:[%s7278_s10 + $0x48] sm:$0xff] }
 0x6fc   :  { %2778 = vmatpush.bf16.xpose.msrb.mxu0 %v2771_v37 }
 0x704   :  { %2779 = vmatpush.bf16.xpose.msrb.mxu0 %v2768_v52 }
 0x70c   :  { %2780 = vmatpush.bf16.xpose.msrb.mxu0 %v2765_v1 }
 0x713   :  { %5011 = vmatmul.msk.bf16.vlgmr.msrb.gmra.mxu0 %vm2360_vm4, %v2707_v17  ;;  %v2867_v17 = vld [vmem:[%s7278_s10 + $0x8] sm:$0xff] }
 0x723   :  { %5012 = vmatmul.msk.bf16.gmra.mxu0 %vm2360_vm4, %v2708_v16 }
 0x733   :  { %5013 = vmatmul.msk.bf16.gmra.mxu0 %vm2360_vm4, %v2709_v50 }
 0x743   :  { %5014 = vmatmul.msk.bf16.gmra.mxu0 %vm2360_vm4, %v2710_v19 }
 0x753   :  { %5015 = vmatmul.msk.bf16.gmra.mxu0 %vm2360_vm4, %v2711_v6 }
 0x763   :  { %5016 = vmatmul.msk.bf16.gmra.mxu0 %vm2360_vm4, %v2712_v41 }
 0x773   :  { %5017 = vmatmul.msk.bf16.gmra.mxu0 %vm2360_vm4, %v2713_v60 }
 0x783   :  { %5018 = vmatmul.msk.bf16.gmra.mxu0 %vm2360_vm4, %v2714_v59 }
 0x790   :  { %v2782_v12 = vpop.f32.mrf.mxu0 }
 0x791   :  { %v2842_v55 = vmul.f32 0.25, %v2782_v12 }
 0x793   :  { %5019 = vmatmul.msk.bf16.gmra.mxu0 %vm2360_vm4, %v2715_v35  ;;  %v2890_v25 = vadd.f32 %v2866_v9, %v2842_v55 }
 0x795   :  { %v2914_v63 = vsel %vm131_vm0, %v2890_v25, -inf }
 0x796   :  { %2915 = vmax.xlane.f32.xlu2 %v2914_v63  ;;  %v2876_v63 = vld [vmem:[%s7278_s10 + $0x50] sm:$0xff] }
 0x798   :  { %v2784_v40 = vpop.f32.mrf.mxu0 }
 0x799   :  { %v2843_v19 = vmul.f32 0.25, %v2784_v40 }
 0x79b   :  { %v2891_v60 = vadd.f32 %v2867_v17, %v2843_v19 }
 0x79d   :  { %v2917_v58 = vsel %vm131_vm0, %v2891_v60, -inf }
 0x79e   :  { %2918 = vmax.xlane.f32.xlu1 %v2917_v58 }
 0x7a0   :  { %v2787_v2 = vpop.f32.mrf.mxu0 }
 0x7a1   :  { %v2844_v16 = vmul.f32 0.25, %v2787_v2 }
 0x7a3   :  { %5020 = vmatmul.msk.bf16.gmra.mxu0 %vm2360_vm4, %v2716_v54  ;;  %v2892_v6 = vadd.f32 %v2868_v46, %v2844_v16 }
 0x7a5   :  { %v2920_v59 = vsel %vm131_vm0, %v2892_v6, -inf }
 0x7a6   :  { %2921 = vmax.xlane.f32.xlu0 %v2920_v59 }
 0x7a8   :  { %v2789_v14 = vpop.f32.mrf.mxu0 }
 0x7a9   :  { %v2845_v28 = vmul.f32 0.25, %v2789_v14 }
 0x7ab   :  { %v7292_v53 = vadd.f32 %v2869_v22, %v2845_v28 }
 0x7ad   :  { %v2923_v56 = vsel %vm131_vm0, %v7292_v53, -inf }
 0x7ae   :  { %2924 = vmax.xlane.f32.xlu2 %v2923_v56 }
 0x7b0   :  { %v2792_v30 = vpop.f32.mrf.mxu0 }
 0x7b1   :  { %v2846_v57 = vmul.f32 0.25, %v2792_v30 }
 0x7b3   :  { %5021 = vmatmul.msk.bf16.gmra.mxu0 %vm2360_vm4, %v2717_v11  ;;  %v7301_v27 = vadd.f32 %v2870_v38, %v2846_v57 }
 0x7b5   :  { %v2926_v54 = vsel %vm131_vm0, %v7301_v27, -inf }
 0x7b6   :  { %2927 = vmax.xlane.f32.xlu1 %v2926_v54  ;;  %v2878_v54 = vld [vmem:[%s7278_s10 + $0x60] sm:$0xff] }
 0x7b8   :  { %v2794_v62 = vpop.f32.mrf.mxu0 }
 0x7b9   :  { %v2847_v8 = vmul.f32 0.25, %v2794_v62 }
 0x7bb   :  { %v7306_v33 = vadd.f32 %v2871_v44, %v2847_v8 }
 0x7bd   :  { %v2929_v5 = vsel %vm131_vm0, %v7306_v33, -inf }
 0x7be   :  { %2930 = vmax.xlane.f32.xlu0 %v2929_v5 }
 0x7c0   :  { %v2797_v10 = vpop.f32.mrf.mxu0 }
 0x7c1   :  { %v2848_v11 = vmul.f32 0.25, %v2797_v10 }
 0x7c3   :  { %5022 = vmatmul.msk.bf16.gmra.mxu0 %vm2360_vm4, %v2718_v15  ;;  %v7315_v34 = vadd.f32 %v2872_v0, %v2848_v11 }
 0x7c5   :  { %v2932_v61 = vsel %vm131_vm0, %v7315_v34, -inf }
 0x7c6   :  { %2933 = vmax.xlane.f32.xlu2 %v2932_v61 }
 0x7c8   :  { %v2799_v13 = vpop.f32.mrf.mxu0 }
 0x7c9   :  { %v2849_v43 = vmul.f32 0.25, %v2799_v13  ;;  %v2879_v13 = vld [vmem:[%s7278_s10 + $0x68] sm:$0xff] }
 0x7cb   :  { %v7320_v24 = vadd.f32 %v2873_v18, %v2849_v43 }
 0x7cd   :  { %v2935_v4 = vsel %vm131_vm0, %v7320_v24, -inf }
 0x7ce   :  { %2936 = vmax.xlane.f32.xlu1 %v2935_v4 }
 0x7d0   :  { %v2802_v49 = vpop.f32.mrf.mxu0 }
 0x7d1   :  { %v2850_v21 = vmul.f32 0.25, %v2802_v49 }
 0x7d3   :  { %v7325_v42 = vadd.f32 %v2874_v7, %v2850_v21 }
 0x7d5   :  { %v2938_v32 = vsel %vm131_vm0, %v7325_v42, -inf }
 0x7d6   :  { %2939 = vmax.xlane.f32.xlu1 %v2938_v32 }
 0x7d8   :  { %v2804_v48 = vpop.f32.mrf.mxu0 }
 0x7d9   :  { %v2851_v35 = vmul.f32 0.25, %v2804_v48 }
 0x7db   :  { %v7334_v20 = vadd.f32 %v2875_v3, %v2851_v35 }
 0x7dd   :  { %v2941_v55 = vsel %vm131_vm0, %v7334_v20, -inf }
 0x7e0   :  { %v2807_v36 = vpop.f32.mrf.mxu0 }
 0x7e1   :  { %v2852_v12 = vmul.f32 0.25, %v2807_v36 }
 0x7e3   :  { %v7343_v17 = vadd.f32 %v2876_v63, %v2852_v12 }
 0x7e5   :  { %v2944_v16 = vsel %vm131_vm0, %v7343_v17, -inf }
 0x7e8   :  { %v2809_v50 = vpop.f32.mrf.mxu0 }
 0x7e9   :  { %v2853_v2 = vmul.f32 0.25, %v2809_v50 }
 0x809   :  { %v2916_v23 = vpop.xlane.xlu2 %2915 }
 0x80a   :  { %v2986_v45 = vsub.f32 %v2890_v25, %v2916_v23  ;;  %v2812_v25 = vpop.f32.mrf.mxu0  ;;  %v2880_v23 = vld [vmem:[%s7278_s10 + $0x70] sm:$0xff] }
 0x80b   :  { %v2854_v30 = vmul.f32 0.25, %v2812_v25  ;;  %v2882_v25 = vld [vmem:[%s7278_s10 + $0x80] sm:$0xff] }
 0x80c   :  { %v3010_v29 = vmul.f32 1.442695, %v2986_v45 }
 0x80d   :  { %v7363_v44 = vadd.f32 %v2878_v54, %v2854_v30 }
 0x80e   :  { %5525 = vpow2.f32 %v3010_v29 }
 0x80f   :  { %v2950_v61 = vsel %vm131_vm0, %v7363_v44, -inf }
 0x811   :  { %v2919_v39 = vpop.xlane.xlu1 %2918 }
 0x812   :  { %v2987_v31 = vsub.f32 %v2891_v60, %v2919_v39  ;;  %v2814_v59 = vpop.f32.mrf.mxu0 }
 0x813   :  { %v2855_v0 = vmul.f32 0.25, %v2814_v59 }
 0x814   :  { %v7329_v26 = vpop.eup %5525  ;;  %v3012_v41 = vmul.f32 1.442695, %v2987_v31 }
 0x815   :  { %v3058_v15 = vsel %vm131_vm0, %v7329_v26, 0.0  ;;  %v7373_v43 = vadd.f32 %v2879_v13, %v2855_v0 }
 0x816   :  { %5527 = vpow2.f32 %v3012_v41  ;;  %3059 = vadd.xlane.f32.xlu0 %v3058_v15  ;;  %v2881_v15 = vld [vmem:[%s7278_s10 + $0x78] sm:$0xff] }
 0x817   :  { %v2953_v48 = vsel %vm131_vm0, %v7373_v43, -inf }
 0x819   :  { %v2922_v37 = vpop.xlane.xlu0 %2921 }
 0x81a   :  { %v2988_v52 = vsub.f32 %v2892_v6, %v2922_v37  ;;  %v2877_v6 = vld [vmem:[%s7278_s10 + $0x58] sm:$0xff]  ;;  %v2817_v8 = vpop.f32.mrf.mxu0 }
 0x81b   :  { %v7353_v22 = vadd.f32 %v2877_v6, %v2853_v2  ;;  %v2856_v21 = vmul.f32 0.25, %v2817_v8 }
 0x81c   :  { %v7336_v51 = vpop.eup %5527  ;;  %v3014_v1 = vmul.f32 1.442695, %v2988_v52 }
 0x81d   :  { %v3061_v9 = vsel %vm131_vm0, %v7336_v51, 0.0  ;;  %v2947_v57 = vsel %vm131_vm0, %v7353_v22, -inf  ;;  %v7383_v45 = vadd.f32 %v2880_v23, %v2856_v21 }
 0x81e   :  { %5529 = vpow2.f32 %v3014_v1  ;;  %3062 = vadd.xlane.f32.xlu2 %v3061_v9  ;;  %2942 = vmax.xlane.f32.xlu0 %v2941_v55 }
 0x81f   :  { %v2956_v41 = vsel %vm131_vm0, %v7383_v45, -inf }
 0x821   :  { %v2925_v40 = vpop.xlane.xlu2 %2924 }
 0x822   :  { %v2989_v19 = vsub.f32 %v7292_v53, %v2925_v40  ;;  %v2819_v49 = vpop.f32.mrf.mxu0 }
 0x823   :  { %v2857_v31 = vmul.f32 0.25, %v2819_v49 }
 0x824   :  { %v7346_v60 = vpop.eup %5529  ;;  %v3016_v58 = vmul.f32 1.442695, %v2989_v19 }
 0x825   :  { %v3064_v46 = vsel %vm131_vm0, %v7346_v60, 0.0  ;;  %v7393_v37 = vadd.f32 %v2881_v15, %v2857_v31 }
 0x826   :  { %5531 = vpow2.f32 %v3016_v58  ;;  %3065 = vadd.xlane.f32.xlu2 %v3064_v46  ;;  %2945 = vmax.xlane.f32.xlu0 %v2944_v16  ;;  %v2883_v46 = vld [vmem:[%s7278_s10 + $0x88] sm:$0xff] }
 0x827   :  { %v2959_v55 = vsel %vm131_vm0, %v7393_v37, -inf }
 0x829   :  { %v2928_v14 = vpop.xlane.xlu1 %2927 }
 0x82a   :  { %v2990_v28 = vsub.f32 %v7301_v27, %v2928_v14  ;;  %v2822_v35 = vpop.f32.mrf.mxu0 }
 0x82b   :  { %v2858_v12 = vmul.f32 0.25, %v2822_v35 }
 0x82c   :  { %v7356_v53 = vpop.eup %5531  ;;  %v3018_v56 = vmul.f32 1.442695, %v2990_v28  ;;  %v2884_v28 = vld [vmem:[%s7278_s10 + $0x90] sm:$0xff] }
 0x82d   :  { %v3067_v38 = vsel %vm131_vm0, %v7356_v53, 0.0  ;;  %v7403_v40 = vadd.f32 %v2882_v25, %v2858_v12 }
 0x82e   :  { %5533 = vpow2.f32 %v3018_v56  ;;  %3068 = vadd.xlane.f32.xlu1 %v3067_v38  ;;  %2948 = vmax.xlane.f32.xlu2 %v2947_v57 }
 0x82f   :  { %v2962_v2 = vsel %vm131_vm0, %v7403_v40, -inf }
 0x831   :  { %v2931_v62 = vpop.xlane.xlu0 %2930 }
 0x832   :  { %v2991_v27 = vsub.f32 %v7306_v33, %v2931_v62  ;;  %v2824_v63 = vpop.f32.mrf.mxu0 }
 0x833   :  { %v2859_v19 = vmul.f32 0.25, %v2824_v63 }
 0x834   :  { %v7366_v5 = vpop.eup %5533  ;;  %v3020_v10 = vmul.f32 1.442695, %v2991_v27 }
 0x835   :  { %v3070_v11 = vsel %vm131_vm0, %v7366_v5, 0.0  ;;  %v7412_v16 = vadd.f32 %v2883_v46, %v2859_v19 }
 0x836   :  { %5535 = vpow2.f32 %v3020_v10  ;;  %3071 = vadd.xlane.f32.xlu1 %v3070_v11  ;;  %2951 = vmax.xlane.f32.xlu2 %v2950_v61 }
 0x837   :  { %v2965_v14 = vsel %vm131_vm0, %v7412_v16, -inf }
 0x839   :  { %v2934_v18 = vpop.xlane.xlu2 %2933 }
 0x83a   :  { %v2992_v33 = vsub.f32 %v7315_v34, %v2934_v18  ;;  %v2827_v6 = vpop.f32.mrf.mxu0 }
 0x83b   :  { %v2860_v59 = vmul.f32 0.25, %v2827_v6 }
 0x83c   :  { %v7376_v4 = vpop.eup %5535  ;;  %v3022_v7 = vmul.f32 1.442695, %v2992_v33 }
 0x83d   :  { %v3073_v32 = vsel %vm131_vm0, %v7376_v4, 0.0  ;;  %v7417_v56 = vadd.f32 %v2884_v28, %v2860_v59 }
 0x83e   :  { %5537 = vpow2.f32 %v3022_v7  ;;  %3074 = vadd.xlane.f32.xlu0 %v3073_v32  ;;  %2954 = vmax.xlane.f32.xlu1 %v2953_v48 }
 0x83f   :  { %v2968_v30 = vsel %vm131_vm0, %v7417_v56, -inf }
 0x841   :  { %v2937_v36 = vpop.xlane.xlu1 %2936 }
 0x842   :  { %v2993_v34 = vsub.f32 %v7320_v24, %v2937_v36  ;;  %v2829_v7 = vpop.f32.mrf.mxu0 }
 0x843   :  { %v2861_v6 = vmul.f32 0.25, %v2829_v7 }
 0x844   :  { %v7386_v29 = vpop.eup %5537  ;;  %v3024_v39 = vmul.f32 1.442695, %v2993_v34 }
 0x845   :  { %v3076_v50 = vsel %vm131_vm0, %v7386_v29, 0.0 }
 0x846   :  { %5539 = vpow2.f32 %v3024_v39  ;;  %3077 = vadd.xlane.f32.xlu0 %v3076_v50  ;;  %2957 = vmax.xlane.f32.xlu1 %v2956_v41 }
 0x849   :  { %v2940_v3 = vpop.xlane.xlu1 %2939 }
 0x84a   :  { %v2994_v24 = vsub.f32 %v7325_v42, %v2940_v3  ;;  %v2832_v59 = vpop.f32.mrf.mxu0 }
 0x84c   :  { %v7396_v52 = vpop.eup %5539  ;;  %v3026_v1 = vmul.f32 1.442695, %v2994_v24 }
 0x84d   :  { %v3079_v9 = vsel %vm131_vm0, %v7396_v52, 0.0 }
 0x84e   :  { %5541 = vpow2.f32 %v3026_v1  ;;  %3080 = vadd.xlane.f32.xlu2 %v3079_v9  ;;  %2960 = vmax.xlane.f32.xlu0 %v2959_v55 }
 0x854   :  { %v7405_v42 = vpop.eup %5541 }
 0x855   :  { %v3082_v58 = vsel %vm131_vm0, %v7405_v42, 0.0 }
 0x856   :  { %3083 = vadd.xlane.f32.xlu2 %v3082_v58  ;;  %2963 = vmax.xlane.f32.xlu0 %v2962_v2 }
 0x85e   :  { %2966 = vmax.xlane.f32.xlu2 %v2965_v14 }
 0x866   :  { %2969 = vmax.xlane.f32.xlu2 %v2968_v30 }
 0x889   :  { %v3060_v38 = vpop.xlane.xlu0 %3059 }
 0x88a   :  { %5543 = vrcp.f32 %v3060_v38  ;;  %v3141_v21 = vand.u32 2147483648, %v3060_v38  ;;  %vm3135_vm13 = vweird.f32 %v3060_v38  ;;  %v3139_v32 = vand.u32 2147483647, %v3060_v38 }
 0x88c   :  { %v3142_v35 = vor.u32 1.1754944e-38, %v3141_v21  ;;  %vm3140_vm1 = vcmp.eq.f32.partialorder %v3139_v32, 8.507059e+37 }
 0x890   :  { %v5544_v57 = vpop.eup %5543 }
 0x891   :  { %v3131_v54 = vmul.f32 %v5544_v57, %v3060_v38  ;;  %v3063_v62 = vpop.xlane.xlu2 %3062  ;;  %v2943_v8 = vpop.xlane.xlu0 %2942  ;;  %vm3136_vm12 = vweird.f32 %v5544_v57  ;;  %v2885_v38 = vld [vmem:[%s7278_s10 + $0x98] sm:$0xff] }
 0x892   :  { %5545 = vrcp.f32 %v3063_v62  ;;  %v2995_v10 = vsub.f32 %v7334_v20, %v2943_v8  ;;  %vm7426_vm14 = vmor %vm3135_vm13, %vm3136_vm12  ;;  %v3154_v36 = vand.u32 2147483647, %v3063_v62  ;;  %v3156_v34 = vand.u32 2147483648, %v3063_v62 }
 0x893   :  { %v3132_v27 = vsub.f32 1.0, %v3131_v54  ;;  %vm3150_vm2 = vweird.f32 %v3063_v62 }
 0x894   :  { %v3028_v11 = vmul.f32 1.442695, %v2995_v10  ;;  %v3157_v1 = vor.u32 1.1754944e-38, %v3156_v34  ;;  %vm3155_vm5 = vcmp.eq.f32.partialorder %v3154_v36, 8.507059e+37 }
 0x895   :  { %v3133_v0 = vmul.f32 %v5544_v57, %v3132_v27 }
 0x896   :  { %5547 = vpow2.f32 %v3028_v11 }
 0x897   :  { %v3134_v13 = vadd.f32 %v5544_v57, %v3133_v0 }
 0x898   :  { %v5546_v61 = vpop.eup %5545 }
 0x899   :  { %v3146_v18 = vmul.f32 %v5546_v61, %v3063_v62  ;;  %v7422_v33 = vpop.xlane.xlu2 %3065  ;;  %v2946_v49 = vpop.xlane.xlu0 %2945  ;;  %v3138_v31 = vsel %vm7426_vm14, %v5544_v57, %v3134_v13  ;;  %vm3151_vm15 = vweird.f32 %v5546_v61 }
 0x89a   :  { %5549 = vrcp.f32 %v7422_v33  ;;  %v2996_v23 = vsub.f32 %v7343_v17, %v2946_v49  ;;  %v3143_v24 = vsel %vm3140_vm1, %v3142_v35, %v3138_v31  ;;  %vm3152_vm3 = vmor %vm3150_vm2, %vm3151_vm15  ;;  %v3171_v10 = vand.u32 2147483648, %v7422_v33  ;;  %v2886_v31 = vld [vmem:[%s7278_s10 + $0xa0] sm:$0xff] }
 0x89b   :  { %v3147_v48 = vsub.f32 1.0, %v3146_v18  ;;  %v3144_v19 = vmul.f32 %v7329_v26, %v3143_v24  ;;  %vm3165_vm7 = vweird.f32 %v7422_v33 }
 0x89c   :  { %v7430_v39 = vpop.eup %5547  ;;  %v3030_v41 = vmul.f32 1.442695, %v2996_v23  ;;  %v3172_v36 = vor.u32 1.1754944e-38, %v3171_v10 }
 0x89d   :  { %v3148_v50 = vmul.f32 %v5546_v61, %v3147_v48  ;;  %v3085_v15 = vsel %vm131_vm0, %v7430_v39, 0.0  ;;  %v2862_v48 = vmul.f32 0.25, %v2832_v59 }
 0x89e   :  { %5551 = vpow2.f32 %v3030_v41  ;;  %3086 = vadd.xlane.f32.xlu1 %v3085_v15 }
 0x89f   :  { %v3149_v17 = vadd.f32 %v5546_v61, %v3148_v50 }
 0x8a0   :  { %v7436_v3 = vpop.eup %5549 }
 0x8a1   :  { %v3153_v12 = vsel %vm3152_vm3, %v5546_v61, %v3149_v17  ;;  %v3161_v9 = vmul.f32 %v7436_v3, %v7422_v33  ;;  %v3069_v55 = vpop.xlane.xlu1 %3068  ;;  %v2949_v25 = vpop.xlane.xlu2 %2948  ;;  %vm3166_vm6 = vweird.f32 %v7436_v3  ;;  %v3169_v61 = vand.u32 2147483647, %v7422_v33 }
 0x8a2   :  { %v3158_v63 = vsel %vm3155_vm5, %v3157_v1, %v3153_v12  ;;  %5553 = vrcp.f32 %v3069_v55  ;;  %v2997_v46 = vsub.f32 %v7353_v22, %v2949_v25  ;;  %vm7465_vm8 = vmor %vm3165_vm7, %vm3166_vm6  ;;  %v3186_v21 = vand.u32 2147483648, %v3069_v55 }
 0x8a3   :  { %v3159_v58 = vmul.f32 %v7336_v51, %v3158_v63  ;;  %v3162_v2 = vsub.f32 1.0, %v3161_v9  ;;  %v7450_v51 = vadd.f32 %v2885_v38, %v2861_v6  ;;  %v3184_v23 = vand.u32 2147483647, %v3069_v55 }
 0x8a4   :  { %v7443_v14 = vpop.eup %5551  ;;  %v3032_v30 = vmul.f32 1.442695, %v2997_v46  ;;  %vm3180_vm10 = vweird.f32 %v3069_v55  ;;  %vm3170_vm11 = vcmp.eq.f32.partialorder %v3169_v61, 8.507059e+37  ;;  %v3187_v35 = vor.u32 1.1754944e-38, %v3186_v21  ;;  %v2887_v46 = vld [vmem:[%s7278_s10 + $0xa8] sm:$0xff] }
 0x8a5   :  { %v3490_v28 = vpack.c.bf16 %v3159_v58, %v3144_v19  ;;  %v3163_v57 = vmul.f32 %v7436_v3, %v3162_v2  ;;  %v3088_v54 = vsel %vm131_vm0, %v7443_v14, 0.0  ;;  %v2971_v13 = vsel %vm131_vm0, %v7450_v51, -inf }
 0x8a6   :  { %5555 = vpow2.f32 %v3032_v30  ;;  %3089 = vadd.xlane.f32.xlu1 %v3088_v54  ;;  %vm3185_vm13 = vcmp.eq.f32.partialorder %v3184_v23, 8.507059e+37  ;;  %v7483_v1 = vadd.f32 %v2886_v31, %v2862_v48 }
 0x8a7   :  { %5023 = vmatmul.msk.bf16.vlgmr.msra.gmra.mxu2 %vm131_vm0, %v3490_v28  ;;  %v3164_v27 = vadd.f32 %v7436_v3, %v3163_v57 }
 0x8a8   :  { %v5554_v26 = vpop.eup %5553  ;;  %v2974_v28 = vsel %vm131_vm0, %v7483_v1, -inf }
 0x8a9   :  { %v3176_v22 = vmul.f32 %v5554_v26, %v3069_v55  ;;  %v7452_v62 = vpop.xlane.xlu1 %3071  ;;  %v2952_v8 = vpop.xlane.xlu2 %2951  ;;  %vm3181_vm9 = vweird.f32 %v5554_v26  ;;  %v3168_v33 = vsel %vm7465_vm8, %v7436_v3, %v3164_v27 }
 0x8aa   :  { %5557 = vrcp.f32 %v7452_v62  ;;  %v2998_v11 = vsub.f32 %v7363_v44, %v2952_v8  ;;  %v2834_v44 = vpop.f32.mrf.mxu0  ;;  %vm3182_vm12 = vmor %vm3180_vm10, %vm3181_vm9  ;;  %v3173_v24 = vsel %vm3170_vm11, %v3172_v36, %v3168_v33  ;;  %vm3195_vm15 = vweird.f32 %v7452_v62  ;;  %v2888_v33 = vld [vmem:[%s7278_s10 + $0xb0] sm:$0xff] }
 0x8ab   :  { %v3177_v0 = vsub.f32 1.0, %v3176_v22  ;;  %v2863_v25 = vmul.f32 0.25, %v2834_v44  ;;  %v3174_v63 = vmul.f32 %v7346_v60, %v3173_v24  ;;  %v3201_v22 = vand.u32 2147483648, %v7452_v62 }
 0x8ac   :  { %v7463_v18 = vpop.eup %5555  ;;  %v3034_v32 = vmul.f32 1.442695, %v2998_v11  ;;  %v3199_v10 = vand.u32 2147483647, %v7452_v62 }
 0x8ad   :  { %v3178_v7 = vmul.f32 %v5554_v26, %v3177_v0  ;;  %v3091_v20 = vsel %vm131_vm0, %v7463_v18, 0.0  ;;  %v3202_v48 = vor.u32 1.1754944e-38, %v3201_v22 }
 0x8ae   :  { %5559 = vpow2.f32 %v3034_v32  ;;  %3092 = vadd.xlane.f32.xlu0 %v3091_v20  ;;  %2972 = vmax.xlane.f32.xlu1 %v2971_v13  ;;  %vm3200_vm5 = vcmp.eq.f32.partialorder %v3199_v10, 8.507059e+37 }
 0x8af   :  { %v3179_v34 = vadd.f32 %v5554_v26, %v3178_v7 }
 0x8b0   :  { %v7475_v50 = vpop.eup %5557 }
 0x8b1   :  { %v3183_v41 = vsel %vm3182_vm12, %v5554_v26, %v3179_v34  ;;  %v3191_v15 = vmul.f32 %v7475_v50, %v7452_v62  ;;  %v7480_v17 = vpop.xlane.xlu0 %3074  ;;  %v2955_v3 = vpop.xlane.xlu1 %2954  ;;  %vm3196_vm14 = vweird.f32 %v7475_v50 }
 0x8b2   :  { %5561 = vrcp.f32 %v7480_v17  ;;  %v2999_v9 = vsub.f32 %v7373_v43, %v2955_v3  ;;  %v3188_v55 = vsel %vm3185_vm13, %v3187_v35, %v3183_v41  ;;  %v2837_v60 = vpop.f32.mrf.mxu0  ;;  %vm7513_vm1 = vmor %vm3195_vm15, %vm3196_vm14  ;;  %v3216_v49 = vand.u32 2147483648, %v7480_v17 }
 0x8b3   :  { %v3192_v12 = vsub.f32 1.0, %v3191_v15  ;;  %v3189_v19 = vmul.f32 %v7356_v53, %v3188_v55  ;;  %v7497_v53 = vadd.f32 %v2887_v46, %v2863_v25  ;;  %v3214_v21 = vand.u32 2147483647, %v7480_v17 }
 0x8b4   :  { %v7488_v58 = vpop.eup %5559  ;;  %v3036_v2 = vmul.f32 1.442695, %v2999_v9  ;;  %vm3210_vm3 = vweird.f32 %v7480_v17  ;;  %v3217_v36 = vor.u32 1.1754944e-38, %v3216_v49 }
 0x8b5   :  { %v3193_v6 = vmul.f32 %v7475_v50, %v3192_v12  ;;  %v3094_v59 = vsel %vm131_vm0, %v7488_v58, 0.0  ;;  %v3491_v30 = vpack.c.bf16 %v3189_v19, %v3174_v63  ;;  %v2977_v0 = vsel %vm131_vm0, %v7497_v53, -inf }
 0x8b6   :  { %5563 = vpow2.f32 %v3036_v2  ;;  %3095 = vadd.xlane.f32.xlu0 %v3094_v59  ;;  %2975 = vmax.xlane.f32.xlu1 %v2974_v28  ;;  %vm3215_vm7 = vcmp.eq.f32.partialorder %v3214_v21, 8.507059e+37  ;;  %v2889_v59 = vld [vmem:[%s7278_s10 + $0xb8] sm:$0xff]  ;;  %s5716_s10 = smov 24  }
 0x8b7   :  { %5024 = vmatmul.msk.bf16.gmra.mxu2 %vm131_vm0, %v3491_v30  ;;  %v3194_v26 = vadd.f32 %v7475_v50, %v3193_v6  ;;  %s4416_s13 = sld [smem:[%s8018_s0 + %s5716_s10]]  }
 0x8b8   :  { %v5562_v43 = vpop.eup %5561 }
 0x8b9   :  { %v3206_v38 = vmul.f32 %v5562_v43, %v7480_v17  ;;  %v7500_v57 = vpop.xlane.xlu0 %3077  ;;  %v2958_v54 = vpop.xlane.xlu1 %2957  ;;  %vm3211_vm2 = vweird.f32 %v5562_v43  ;;  %v3198_v62 = vsel %vm7513_vm1, %v7475_v50, %v3194_v26 }
 0x8ba   :  { %5565 = vrcp.f32 %v7500_v57  ;;  %v3000_v27 = vsub.f32 %v7383_v45, %v2958_v54  ;;  %v2864_v45 = vmul.f32 0.25, %v2837_v60  ;;  %vm3212_vm6 = vmor %vm3210_vm3, %vm3211_vm2  ;;  %v3203_v41 = vsel %vm3200_vm5, %v3202_v48, %v3198_v62  ;;  %v2839_v15 = vpop.f32.mrf.mxu0 }
 0x8bb   :  { %v3207_v8 = vsub.f32 1.0, %v3206_v38  ;;  %v3204_v12 = vmul.f32 %v7366_v5, %v3203_v41  ;;  %v2865_v19 = vmul.f32 0.25, %v2839_v15  ;;  %v3231_v60 = vand.u32 2147483648, %v7500_v57 }
 0x8bc   :  { %v7511_v11 = vpop.eup %5563  ;;  %v3038_v7 = vmul.f32 1.442695, %v3000_v27  ;;  %v7531_v35 = vadd.f32 %v2888_v33, %v2864_v45  ;;  %vm3225_vm9 = vweird.f32 %v7500_v57  ;;  %v3229_v38 = vand.u32 2147483647, %v7500_v57 }
 0x8bd   :  { %v3208_v13 = vmul.f32 %v5562_v43, %v3207_v8  ;;  %v3097_v32 = vsel %vm131_vm0, %v7511_v11, 0.0  ;;  %v3232_v49 = vor.u32 1.1754944e-38, %v3231_v60 }
 0x8be   :  { %5567 = vpow2.f32 %v3038_v7  ;;  %3098 = vadd.xlane.f32.xlu2 %v3097_v32  ;;  %2978 = vmax.xlane.f32.xlu0 %v2977_v0  ;;  %v2980_v46 = vsel %vm131_vm0, %v7531_v35, -inf  ;;  %vm3230_vm12 = vcmp.eq.f32.partialorder %v3229_v38, 8.507059e+37 }
 0x8bf   :  { %v3209_v44 = vadd.f32 %v5562_v43, %v3208_v13 }
 0x8c0   :  { %v7526_v23 = vpop.eup %5565 }
 0x8c1   :  { %v3213_v20 = vsel %vm3212_vm6, %v5562_v43, %v3209_v44  ;;  %v3221_v34 = vmul.f32 %v7526_v23, %v7500_v57  ;;  %v3081_v31 = vpop.xlane.xlu2 %3080  ;;  %v2961_v50 = vpop.xlane.xlu0 %2960  ;;  %vm3226_vm8 = vweird.f32 %v7526_v23  ;;  %v7549_v43 = vadd.f32 %v2889_v59, %v2865_v19 }
 0x8c2   :  { %5569 = vrcp.f32 %v3081_v31  ;;  %v3001_v3 = vsub.f32 %v7393_v37, %v2961_v50  ;;  %v3218_v24 = vsel %vm3215_vm7, %v3217_v36, %v3213_v20  ;;  %vm7555_vm10 = vmor %vm3225_vm9, %vm3226_vm8  ;;  %v3244_v8 = vand.u32 2147483647, %v3081_v31 }
 0x8c3   :  { %v3222_v17 = vsub.f32 1.0, %v3221_v34  ;;  %v3219_v9 = vmul.f32 %v7376_v4, %v3218_v24  ;;  %v3246_v27 = vand.u32 2147483648, %v3081_v31  ;;  %vm3240_vm13 = vweird.f32 %v3081_v31 }
 0x8c4   :  { %v7536_v55 = vpop.eup %5567  ;;  %v3040_v63 = vmul.f32 1.442695, %v3001_v3  ;;  %vm3245_vm15 = vcmp.eq.f32.partialorder %v3244_v8, 8.507059e+37 }
 0x8c5   :  { %v3223_v25 = vmul.f32 %v7526_v23, %v3222_v17  ;;  %v3100_v2 = vsel %vm131_vm0, %v7536_v55, 0.0  ;;  %v3492_v6 = vpack.c.bf16 %v3219_v9, %v3204_v12  ;;  %v3247_v45 = vor.u32 1.1754944e-38, %v3246_v27 }
 0x8c6   :  { %5571 = vpow2.f32 %v3040_v63  ;;  %3101 = vadd.xlane.f32.xlu2 %v3100_v2  ;;  %2981 = vmax.xlane.f32.xlu0 %v2980_v46 }
 0x8c7   :  { %5025 = vmatmul.msk.bf16.gmra.mxu2 %vm131_vm0, %v3492_v6  ;;  %v3224_v4 = vadd.f32 %v7526_v23, %v3223_v25 }
 0x8c8   :  { %v5570_v5 = vpop.eup %5569 }
 0x8c9   :  { %v3236_v37 = vmul.f32 %v5570_v5, %v3081_v31  ;;  %v7547_v28 = vpop.xlane.xlu2 %3083  ;;  %v2964_v30 = vpop.xlane.xlu0 %2963  ;;  %v3228_v0 = vsel %vm7555_vm10, %v7526_v23, %v3224_v4  ;;  %vm3241_vm11 = vweird.f32 %v5570_v5 }
 0x8ca   :  { %v3002_v26 = vsub.f32 %v7403_v40, %v2964_v30  ;;  %v2983_v40 = vsel %vm131_vm0, %v7549_v43, -inf  ;;  %vm3242_vm14 = vmor %vm3240_vm13, %vm3241_vm11  ;;  %v3233_v62 = vsel %vm3230_vm12, %v3232_v49, %v3228_v0  ;;  %v3261_v46 = vand.u32 2147483648, %v7547_v28 }
 0x8cb   :  { %v3237_v54 = vsub.f32 1.0, %v3236_v37  ;;  %v3234_v33 = vmul.f32 %v7386_v29, %v3233_v62  ;;  %vm3255_vm2 = vweird.f32 %v7547_v28  ;;  %v3259_v59 = vand.u32 2147483647, %v7547_v28 }
 0x8cc   :  { %v7559_v10 = vpop.eup %5571  ;;  %v3042_v13 = vmul.f32 1.442695, %v3002_v26  ;;  %v3262_v38 = vor.u32 1.1754944e-38, %v3261_v46 }
 0x8cd   :  { %v3238_v61 = vmul.f32 %v5570_v5, %v3237_v54  ;;  %v3103_v57 = vsel %vm131_vm0, %v7559_v10, 0.0  ;;  %vm3260_vm7 = vcmp.eq.f32.partialorder %v3259_v59, 8.507059e+37 }
 0x8ce   :  { %5573 = vpow2.f32 %v3042_v13  ;;  %3104 = vadd.xlane.f32.xlu1 %v3103_v57  ;;  %2984 = vmax.xlane.f32.xlu2 %v2983_v40 }
 0x8cf   :  { %v3239_v7 = vadd.f32 %v5570_v5, %v3238_v61 }
 0x8d1   :  { %v3243_v21 = vsel %vm3242_vm14, %v5570_v5, %v3239_v7  ;;  %v2967_v32 = vpop.xlane.xlu2 %2966 }
 0x8d2   :  { %v3003_v48 = vsub.f32 %v7412_v16, %v2967_v32  ;;  %v3248_v44 = vsel %vm3245_vm15, %v3247_v45, %v3243_v21 }
 0x8d3   :  { %v3249_v23 = vmul.f32 %v7396_v52, %v3248_v44 }
 0x8d4   :  { %v3044_v20 = vmul.f32 1.442695, %v3003_v48  ;;  %v7571_v36 = vpop.eup %5573 }
 0x8d5   :  { %v3493_v34 = vpack.c.bf16 %v3249_v23, %v3234_v33  ;;  %v3106_v31 = vsel %vm131_vm0, %v7571_v36, 0.0 }
 0x8d6   :  { %5575 = vpow2.f32 %v3044_v20  ;;  %3107 = vadd.xlane.f32.xlu1 %v3106_v31 }
 0x8d7   :  { %5026 = vmatmul.msk.bf16.gmra.mxu2 %vm131_vm0, %v3493_v34 }
 0x8d9   :  { %v2970_v50 = vpop.xlane.xlu2 %2969 }
 0x8da   :  { %v3004_v41 = vsub.f32 %v7417_v56, %v2970_v50 }
 0x8dc   :  { %v7577_v16 = vpop.eup %5575  ;;  %v3046_v15 = vmul.f32 1.442695, %v3004_v41 }
 0x8dd   :  { %v3109_v29 = vsel %vm131_vm0, %v7577_v16, 0.0 }
 0x8de   :  { %5577 = vpow2.f32 %v3046_v15  ;;  %3110 = vadd.xlane.f32.xlu0 %v3109_v29 }
 0x8df   :  { %5579 = vrcp.f32 %v7547_v28 }
 0x8e4   :  { %v7581_v52 = vpop.eup %5577 }
 0x8e5   :  { %v3112_v17 = vsel %vm131_vm0, %v7581_v52, 0.0  ;;  %v5580_v3 = vpop.eup %5579 }
 0x8e6   :  { %3113 = vadd.xlane.f32.xlu2 %v3112_v17  ;;  %v3251_v24 = vmul.f32 %v5580_v3, %v7547_v28  ;;  %vm3256_vm1 = vweird.f32 %v5580_v3 }
 0x8e7   :  { %vm7593_vm3 = vmor %vm3255_vm2, %vm3256_vm1 }
 0x8e8   :  { %v3252_v12 = vsub.f32 1.0, %v3251_v24 }
 0x8ea   :  { %v3253_v9 = vmul.f32 %v5580_v3, %v3252_v12 }
 0x8ec   :  { %v3254_v2 = vadd.f32 %v5580_v3, %v3253_v9 }
 0x8ee   :  { %v3258_v30 = vsel %vm7593_vm3, %v5580_v3, %v3254_v2 }
 0x8ef   :  { %v3263_v61 = vsel %vm3260_vm7, %v3262_v38, %v3258_v30 }
 0x8f0   :  { %v3264_v40 = vmul.f32 %v7405_v42, %v3263_v61 }
 0x911   :  { %v3087_v56 = vpop.xlane.xlu1 %3086 }
 0x912   :  { %5581 = vrcp.f32 %v3087_v56  ;;  %v3276_v37 = vand.u32 2147483648, %v3087_v56  ;;  %v3274_v60 = vand.u32 2147483647, %v3087_v56  ;;  %vm3270_vm6 = vweird.f32 %v3087_v56 }
 0x914   :  { %v3277_v8 = vor.u32 1.1754944e-38, %v3276_v37  ;;  %vm3275_vm9 = vcmp.eq.f32.partialorder %v3274_v60, 8.507059e+37 }
 0x918   :  { %v5582_v25 = vpop.eup %5581 }
 0x919   :  { %v3266_v63 = vmul.f32 %v5582_v25, %v3087_v56  ;;  %v7587_v19 = vpop.xlane.xlu1 %3089  ;;  %vm3271_vm5 = vweird.f32 %v5582_v25 }
 0x91a   :  { %5583 = vrcp.f32 %v7587_v19  ;;  %vm3272_vm8 = vmor %vm3270_vm6, %vm3271_vm5  ;;  %v3291_v42 = vand.u32 2147483648, %v7587_v19  ;;  %vm3285_vm11 = vweird.f32 %v7587_v19  ;;  %v3289_v34 = vand.u32 2147483647, %v7587_v19 }
 0x91b   :  { %v3267_v6 = vsub.f32 1.0, %v3266_v63 }
 0x91c   :  { %v3292_v24 = vor.u32 1.1754944e-38, %v3291_v42  ;;  %vm3290_vm15 = vcmp.eq.f32.partialorder %v3289_v34, 8.507059e+37 }
 0x91d   :  { %v3268_v4 = vmul.f32 %v5582_v25, %v3267_v6 }
 0x91f   :  { %v3269_v54 = vadd.f32 %v5582_v25, %v3268_v4 }
 0x920   :  { %v5584_v26 = vpop.eup %5583 }
 0x921   :  { %v3273_v22 = vsel %vm3272_vm8, %v5582_v25, %v3269_v54  ;;  %v3281_v28 = vmul.f32 %v5584_v26, %v7587_v19  ;;  %v3093_v27 = vpop.xlane.xlu0 %3092  ;;  %v2973_v0 = vpop.xlane.xlu1 %2972  ;;  %vm3286_vm10 = vweird.f32 %v5584_v26 }
 0x922   :  { %5585 = vrcp.f32 %v3093_v27  ;;  %v3005_v49 = vsub.f32 %v7450_v51, %v2973_v0  ;;  %v3278_v57 = vsel %vm3275_vm9, %v3277_v8, %v3273_v22  ;;  %vm7615_vm12 = vmor %vm3285_vm11, %vm3286_vm10  ;;  %v3306_v15 = vand.u32 2147483648, %v3093_v27 }
 0x923   :  { %v3282_v13 = vsub.f32 1.0, %v3281_v28  ;;  %v3279_v7 = vmul.f32 %v7430_v39, %v3278_v57  ;;  %v3304_v3 = vand.u32 2147483647, %v3093_v27  ;;  %vm3300_vm14 = vweird.f32 %v3093_v27 }
 0x924   :  { %v3048_v45 = vmul.f32 1.442695, %v3005_v49  ;;  %v3307_v25 = vor.u32 1.1754944e-38, %v3306_v15 }
 0x925   :  { %v3283_v62 = vmul.f32 %v5584_v26, %v3282_v13  ;;  %v3494_v21 = vpack.c.bf16 %v3279_v7, %v3264_v40  ;;  %vm3305_vm2 = vcmp.eq.f32.partialorder %v3304_v3, 8.507059e+37 }
 0x926   :  { %5587 = vpow2.f32 %v3048_v45 }
 0x927   :  { %5027 = vmatmul.msk.bf16.gmra.mxu2 %vm131_vm0, %v3494_v21  ;;  %v3284_v23 = vadd.f32 %v5584_v26, %v3283_v62 }
 0x928   :  { %v5586_v32 = vpop.eup %5585 }
 0x929   :  { %v3296_v48 = vmul.f32 %v5586_v32, %v3093_v27  ;;  %v7604_v44 = vpop.xlane.xlu0 %3095  ;;  %v2976_v33 = vpop.xlane.xlu1 %2975  ;;  %vm3301_vm13 = vweird.f32 %v5586_v32  ;;  %v3288_v17 = vsel %vm7615_vm12, %v5584_v26, %v3284_v23 }
 0x92a   :  { %5589 = vrcp.f32 %v7604_v44  ;;  %v7607_v51 = vpop.f32.mrf.mxu2  ;;  %v3006_v20 = vsub.f32 %v7483_v1, %v2976_v33  ;;  %vm3302_vm1 = vmor %vm3300_vm14, %vm3301_vm13  ;;  %v3293_v46 = vsel %vm3290_vm15, %v3292_v24, %v3288_v17  ;;  %v3321_v0 = vand.u32 2147483648, %v7604_v44 }
 0x92b   :  { %v3297_v39 = vsub.f32 1.0, %v3296_v48  ;;  %v3294_v37 = vmul.f32 %v7443_v14, %v3293_v46  ;;  %vm3315_vm5 = vweird.f32 %v7604_v44  ;;  %v3319_v49 = vand.u32 2147483647, %v7604_v44 }
 0x92c   :  { %v7613_v31 = vpop.eup %5587  ;;  %v3050_v29 = vmul.f32 1.442695, %v3006_v20  ;;  %v3322_v48 = vor.u32 1.1754944e-38, %v3321_v0 }
 0x92d   :  { %v3298_v41 = vmul.f32 %v5586_v32, %v3297_v39  ;;  %v3115_v1 = vsel %vm131_vm0, %v7613_v31, 0.0  ;;  %vm3320_vm9 = vcmp.eq.f32.partialorder %v3319_v49, 8.507059e+37 }
 0x92e   :  { %5591 = vpow2.f32 %v3050_v29  ;;  %3116 = vadd.xlane.f32.xlu1 %v3115_v1 }
 0x92f   :  { %v3299_v56 = vadd.f32 %v5586_v32, %v3298_v41 }
 0x930   :  { %v5590_v12 = vpop.eup %5589 }
 0x931   :  { %v3303_v9 = vsel %vm3302_vm1, %v5586_v32, %v3299_v56  ;;  %v3311_v63 = vmul.f32 %v5590_v12, %v7604_v44  ;;  %v3099_v19 = vpop.xlane.xlu2 %3098  ;;  %v2979_v2 = vpop.xlane.xlu0 %2978  ;;  %vm3316_vm3 = vweird.f32 %v5590_v12 }
 0x932   :  { %5593 = vrcp.f32 %v3099_v19  ;;  %v7624_v6 = vpop.f32.mrf.mxu2  ;;  %v3007_v5 = vsub.f32 %v7497_v53, %v2979_v2  ;;  %v3308_v4 = vsel %vm3305_vm2, %v3307_v25, %v3303_v9  ;;  %vm7645_vm6 = vmor %vm3315_vm5, %vm3316_vm3  ;;  %v3336_v45 = vand.u32 2147483648, %v3099_v19 }
 0x933   :  { %v3312_v59 = vsub.f32 1.0, %v3311_v63  ;;  %v3309_v30 = vmul.f32 %v7463_v18, %v3308_v4  ;;  %v3334_v32 = vand.u32 2147483647, %v3099_v19  ;;  %vm3330_vm8 = vweird.f32 %v3099_v19 }
 0x934   :  { %v7629_v60 = vpop.eup %5591  ;;  %v3052_v38 = vmul.f32 1.442695, %v3007_v5  ;;  %v3337_v42 = vor.u32 1.1754944e-38, %v3336_v45 }
 0x935   :  { %v3313_v54 = vmul.f32 %v5590_v12, %v3312_v59  ;;  %v3118_v26 = vsel %vm131_vm0, %v7629_v60, 0.0  ;;  %v3495_v22 = vpack.c.bf16 %v3309_v30, %v3294_v37  ;;  %vm3335_vm11 = vcmp.eq.f32.partialorder %v3334_v32, 8.507059e+37 }
 0x936   :  { %5595 = vpow2.f32 %v3052_v38  ;;  %3119 = vadd.xlane.f32.xlu0 %v3118_v26 }
 0x937   :  { %5028 = vmatmul.msk.bf16.gmra.mxu2 %vm131_vm0, %v3495_v22  ;;  %v3314_v14 = vadd.f32 %v5590_v12, %v3313_v54 }
 0x938   :  { %v5594_v8 = vpop.eup %5593 }
 0x939   :  { %v3326_v28 = vmul.f32 %v5594_v8, %v3099_v19  ;;  %v7634_v53 = vpop.xlane.xlu2 %3101  ;;  %v2982_v27 = vpop.xlane.xlu0 %2981  ;;  %vm3331_vm7 = vweird.f32 %v5594_v8  ;;  %v3318_v21 = vsel %vm7645_vm6, %v5590_v12, %v3314_v14 }
 0x93a   :  { %5597 = vrcp.f32 %v7634_v53  ;;  %v7637_v18 = vpop.f32.mrf.mxu2  ;;  %v3008_v13 = vsub.f32 %v7531_v35, %v2982_v27  ;;  %vm3332_vm10 = vmor %vm3330_vm8, %vm3331_vm7  ;;  %v3323_v50 = vsel %vm3320_vm9, %v3322_v48, %v3318_v21  ;;  %vm3345_vm13 = vweird.f32 %v7634_v53 }
 0x93b   :  { %v3327_v61 = vsub.f32 1.0, %v3326_v28  ;;  %v3324_v3 = vmul.f32 %v7488_v58, %v3323_v50  ;;  %v3351_v58 = vand.u32 2147483648, %v7634_v53  ;;  %v3349_v46 = vand.u32 2147483647, %v7634_v53 }
 0x93c   :  { %v7643_v57 = vpop.eup %5595  ;;  %v3054_v62 = vmul.f32 1.442695, %v3008_v13 }
 0x93d   :  { %v3328_v7 = vmul.f32 %v5594_v8, %v3327_v61  ;;  %v3121_v35 = vsel %vm131_vm0, %v7643_v57, 0.0  ;;  %v3352_v26 = vor.u32 1.1754944e-38, %v3351_v58  ;;  %vm3350_vm1 = vcmp.eq.f32.partialorder %v3349_v46, 8.507059e+37 }
 0x93e   :  { %5599 = vpow2.f32 %v3054_v62  ;;  %3122 = vadd.xlane.f32.xlu2 %v3121_v35 }
 0x93f   :  { %v3329_v33 = vadd.f32 %v5594_v8, %v3328_v7 }
 0x940   :  { %v5598_v44 = vpop.eup %5597 }
 0x941   :  { %v3333_v23 = vsel %vm3332_vm10, %v5594_v8, %v3329_v33  ;;  %v3341_v39 = vmul.f32 %v5598_v44, %v7634_v53  ;;  %v3105_v20 = vpop.xlane.xlu1 %3104  ;;  %v2985_v34 = vpop.xlane.xlu2 %2984  ;;  %vm3346_vm12 = vweird.f32 %v5598_v44  ;;  %v5661_v33 = vld [vmem:[%s7160_s5] sm:$0xff] }
 0x942   :  { %5601 = vrcp.f32 %v3105_v20  ;;  %v7654_v41 = vpop.f32.mrf.mxu2  ;;  %v3009_v29 = vsub.f32 %v7549_v43, %v2985_v34  ;;  %v3338_v17 = vsel %vm3335_vm11, %v3337_v42, %v3333_v23  ;;  %vm7669_vm14 = vmor %vm3345_vm13, %vm3346_vm12  ;;  %v3366_v4 = vand.u32 2147483648, %v3105_v20  ;;  %v5662_v34 = vld [vmem:[%s7160_s5 + $0x30] sm:$0xff] }
 0x943   :  { %v3342_v15 = vsub.f32 1.0, %v3341_v39  ;;  %v3339_v1 = vmul.f32 %v7511_v11, %v3338_v17  ;;  %v3364_v54 = vand.u32 2147483647, %v3105_v20  ;;  %vm3360_vm2 = vweird.f32 %v3105_v20 }
 0x944   :  { %v7659_v24 = vpop.eup %5599  ;;  %v3056_v12 = vmul.f32 1.442695, %v3009_v29  ;;  %v3367_v53 = vor.u32 1.1754944e-38, %v3366_v4 }
 0x945   :  { %v3343_v56 = vmul.f32 %v5598_v44, %v3342_v15  ;;  %v3124_v9 = vsel %vm131_vm0, %v7659_v24, 0.0  ;;  %v3496_v25 = vpack.c.bf16 %v3339_v1, %v3324_v3  ;;  %vm3365_vm5 = vcmp.eq.f32.partialorder %v3364_v54, 8.507059e+37 }
 0x946   :  { %5603 = vpow2.f32 %v3056_v12  ;;  %3125 = vadd.xlane.f32.xlu1 %v3124_v9 }
 0x947   :  { %5029 = vmatmul.msk.bf16.gmra.mxu2 %vm131_vm0, %v3496_v25  ;;  %v3344_v19 = vadd.f32 %v5598_v44, %v3343_v56 }
 0x948   :  { %v5602_v63 = vpop.eup %5601 }
 0x949   :  { %v3356_v43 = vmul.f32 %v5602_v63, %v3105_v20  ;;  %v3108_v2 = vpop.xlane.xlu1 %3107  ;;  %v3348_v30 = vsel %vm7669_vm14, %v5598_v44, %v3344_v19  ;;  %vm3361_vm15 = vweird.f32 %v5602_v63  ;;  %v3607_v44 = vmul.f32 %v5661_v33, %v7607_v51 }
 0x94a   :  { %5605 = vrcp.f32 %v3108_v2  ;;  %v7665_v11 = vpop.f32.mrf.mxu2  ;;  %vm3362_vm3 = vmor %vm3360_vm2, %vm3361_vm15  ;;  %v3353_v14 = vsel %vm3350_vm1, %v3352_v26, %v3348_v30  ;;  %v3381_v23 = vand.u32 2147483648, %v3108_v2  ;;  %vm3375_vm7 = vweird.f32 %v3108_v2 }
 0x94b   :  { %v3357_v59 = vsub.f32 1.0, %v3356_v43  ;;  %v3354_v7 = vmul.f32 %v7536_v55, %v3353_v14  ;;  %v3379_v42 = vand.u32 2147483647, %v3108_v2  ;;  %v3631_v51 = vsel %vm2360_vm4, %v3607_v44, 0.0 }
 0x94c   :  { %v7673_v37 = vpop.eup %5603  ;;  %v3382_v3 = vor.u32 1.1754944e-38, %v3381_v23  ;;  %v5665_v23 = vld [vmem:[%s7160_s5 + $0x18] sm:$0xff] }
 0x94d   :  { %v3358_v38 = vmul.f32 %v5602_v63, %v3357_v59  ;;  %v3127_v22 = vsel %vm131_vm0, %v7673_v37, 0.0  ;;  %vm3380_vm10 = vcmp.eq.f32.partialorder %v3379_v42, 8.507059e+37  ;;  %v3610_v42 = vmul.f32 %v5665_v23, %v7654_v41 }
 0x94e   :  { %3128 = vadd.xlane.f32.xlu0 %v3127_v22  ;;  %v5663_v22 = vld [vmem:[%s7160_s5 + $0x10] sm:$0xff] }
 0x94f   :  { %v3359_v8 = vadd.f32 %v5602_v63, %v3358_v38 }
 0x950   :  { %v5606_v28 = vpop.eup %5605 }
 0x951   :  { %v3111_v27 = vpop.xlane.xlu0 %3110  ;;  %v3363_v0 = vsel %vm3362_vm3, %v5602_v63, %v3359_v8  ;;  %v3371_v61 = vmul.f32 %v5606_v28, %v3108_v2  ;;  %vm3376_vm6 = vweird.f32 %v5606_v28 }
 0x952   :  { %5607 = vrcp.f32 %v3111_v27  ;;  %v7679_v13 = vpop.f32.mrf.mxu2  ;;  %v3368_v49 = vsel %vm3365_vm5, %v3367_v53, %v3363_v0  ;;  %vm7686_vm8 = vmor %vm3375_vm7, %vm3376_vm6  ;;  %v3394_v17 = vand.u32 2147483647, %v3111_v27  ;;  %vm3390_vm11 = vweird.f32 %v3111_v27  ;;  %v5664_v0 = vld [vmem:[%s7160_s5 + $0x40] sm:$0xff] }
 0x953   :  { %v3372_v40 = vsub.f32 1.0, %v3371_v61  ;;  %v3369_v45 = vmul.f32 %v7559_v10, %v3368_v49  ;;  %v3396_v10 = vand.u32 2147483648, %v3111_v27 }
 0x954   :  { %vm3395_vm13 = vcmp.eq.f32.partialorder %v3394_v17, 8.507059e+37 }
 0x955   :  { %v3373_v62 = vmul.f32 %v5606_v28, %v3372_v40  ;;  %v3497_v21 = vpack.c.bf16 %v3369_v45, %v3354_v7  ;;  %v3397_v9 = vor.u32 1.1754944e-38, %v3396_v10 }
 0x957   :  { %v3374_v35 = vadd.f32 %v5606_v28, %v3373_v62  ;;  %5030 = vmatmul.msk.bf16.gmra.mxu2 %vm131_vm0, %v3497_v21 }
 0x958   :  { %v5608_v32 = vpop.eup %5607 }
 0x959   :  { %v3386_v48 = vmul.f32 %v5608_v32, %v3111_v27  ;;  %v3378_v15 = vsel %vm7686_vm8, %v5606_v28, %v3374_v35  ;;  %vm3391_vm9 = vweird.f32 %v5608_v32  ;;  %v3114_v46 = vpop.xlane.xlu2 %3113 }
 0x95a   :  { %v3562_v20 = vpop.f32.mrf.mxu2  ;;  %vm3392_vm12 = vmor %vm3390_vm11, %vm3391_vm9  ;;  %v3383_v25 = vsel %vm3380_vm10, %v3382_v3, %v3378_v15  ;;  %5609 = vrcp.f32 %v3114_v46  ;;  %v3411_v27 = vand.u32 2147483648, %v3114_v46  ;;  %vm3405_vm15 = vweird.f32 %v3114_v46 }
 0x95b   :  { %v3387_v39 = vsub.f32 1.0, %v3386_v48  ;;  %v3613_v50 = vmul.f32 %v5662_v34, %v3562_v20  ;;  %v3384_v43 = vmul.f32 %v7571_v36, %v3383_v25  ;;  %v3609_v36 = vmul.f32 %v5663_v22, %v7637_v18 }
 0x95c   :  { %v3409_v40 = vand.u32 2147483647, %v3114_v46  ;;  %v3412_v48 = vor.u32 1.1754944e-38, %v3411_v27 }
 0x95d   :  { %v3388_v29 = vmul.f32 %v5608_v32, %v3387_v39  ;;  %v3632_v1 = vsel %vm2360_vm4, %v3613_v50, 0.0  ;;  %v3645_v49 = vsel %vm2360_vm4, %v3609_v36, 0.0 }
 0x95e   :  { %v7695_v12 = vadd.f32 %v3632_v1, %v3631_v51  ;;  %vm3410_vm5 = vcmp.eq.f32.partialorder %v3409_v40, 8.507059e+37  ;;  %v3652_v1 = vsel %vm2360_vm4, %v3610_v42, 0.0 }
 0x95f   :  { %v3389_v56 = vadd.f32 %v5608_v32, %v3388_v29  ;;  %v5666_v29 = vld [vmem:[%s7160_s5 + $0x48] sm:$0xff] }
 0x960   :  { %v5610_v59 = vpop.eup %5609 }
 0x961   :  { %v3393_v63 = vsel %vm3392_vm12, %v5608_v32, %v3389_v56  ;;  %v3401_v5 = vmul.f32 %v5610_v59, %v3114_v46  ;;  %vm3406_vm14 = vweird.f32 %v5610_v59 }
 0x962   :  { %v3398_v19 = vsel %vm3395_vm13, %v3397_v9, %v3393_v63  ;;  %v7700_v38 = vpop.f32.mrf.mxu2  ;;  %vm7709_vm1 = vmor %vm3405_vm15, %vm3406_vm14 }
 0x963   :  { %v3399_v2 = vmul.f32 %v7577_v16, %v3398_v19  ;;  %v3402_v30 = vsub.f32 1.0, %v3401_v5 }
 0x965   :  { %v3498_v58 = vpack.c.bf16 %v3399_v2, %v3384_v43  ;;  %v3403_v54 = vmul.f32 %v5610_v59, %v3402_v30  ;;  %v5667_v43 = vld [vmem:[%s7160_s5 + $0x20] sm:$0xff] }
 0x966   :  { %v3611_v2 = vmul.f32 %v5667_v43, %v7665_v11 }
 0x967   :  { %5031 = vmatmul.msk.bf16.gmra.mxu2 %vm131_vm0, %v3498_v58  ;;  %v3404_v28 = vadd.f32 %v5610_v59, %v3403_v54 }
 0x968   :  { %v3659_v11 = vsel %vm2360_vm4, %v3611_v2, 0.0 }
 0x969   :  { %v3408_v21 = vsel %vm7709_vm1, %v5610_v59, %v3404_v28 }
 0x96a   :  { %v3413_v34 = vsel %vm3410_vm5, %v3412_v48, %v3408_v21  ;;  %v5670_v48 = vld [vmem:[%s7160_s5 + $0x58] sm:$0xff] }
 0x96b   :  { %v3414_v3 = vmul.f32 %v7581_v52, %v3413_v34 }
 0x9a1   :  { %v3117_v4 = vpop.xlane.xlu1 %3116 }
 0x9a2   :  { %5611 = vrcp.f32 %v3117_v4  ;;  %v3426_v45 = vand.u32 2147483648, %v3117_v4  ;;  %v3424_v32 = vand.u32 2147483647, %v3117_v4  ;;  %vm3420_vm3 = vweird.f32 %v3117_v4 }
 0x9a4   :  { %v3427_v20 = vor.u32 1.1754944e-38, %v3426_v45  ;;  %vm3425_vm7 = vcmp.eq.f32.partialorder %v3424_v32, 8.507059e+37 }
 0x9a8   :  { %v5612_v26 = vpop.eup %5611 }
 0x9a9   :  { %v3416_v8 = vmul.f32 %v5612_v26, %v3117_v4  ;;  %v7704_v16 = vpop.xlane.xlu0 %3119  ;;  %vm3421_vm2 = vweird.f32 %v5612_v26  ;;  %v5668_v4 = vld [vmem:[%s7160_s5 + $0x50] sm:$0xff] }
 0x9aa   :  { %5613 = vrcp.f32 %v7704_v16  ;;  %v3567_v53 = vpop.f32.mrf.mxu2  ;;  %vm3422_vm6 = vmor %vm3420_vm3, %vm3421_vm2  ;;  %v3441_v59 = vand.u32 2147483648, %v7704_v16  ;;  %vm3435_vm9 = vweird.f32 %v7704_v16  ;;  %v3439_v54 = vand.u32 2147483647, %v7704_v16 }
 0x9ab   :  { %v3417_v14 = vsub.f32 1.0, %v3416_v8  ;;  %v3615_v61 = vmul.f32 %v5664_v0, %v3567_v53 }
 0x9ac   :  { %vm3440_vm13 = vcmp.eq.f32.partialorder %v3439_v54, 8.507059e+37 }
 0x9ad   :  { %v3418_v18 = vmul.f32 %v5612_v26, %v3417_v14  ;;  %v3646_v62 = vsel %vm2360_vm4, %v3615_v61, 0.0  ;;  %v3442_v14 = vor.u32 1.1754944e-38, %v3441_v59  ;;  %v5669_v61 = vld [vmem:[%s7160_s5 + $0x28] sm:$0xff] }
 0x9ae   :  { %v7716_v35 = vadd.f32 %v3646_v62, %v3645_v49  ;;  %v3612_v49 = vmul.f32 %v5669_v61, %v7679_v13 }
 0x9af   :  { %v3419_v33 = vadd.f32 %v5612_v26, %v3418_v18 }
 0x9b0   :  { %v7718_v44 = vpop.eup %5613  ;;  %v3666_v13 = vsel %vm2360_vm4, %v3612_v49, 0.0  ;;  %v5675_v49 = vld [vmem:[%s7160_s5 + $0x90] sm:$0xff] }
 0x9b1   :  { %v3423_v39 = vsel %vm3422_vm6, %v5612_v26, %v3419_v33  ;;  %v3431_v55 = vmul.f32 %v7718_v44, %v7704_v16  ;;  %v3123_v10 = vpop.xlane.xlu2 %3122  ;;  %vm3436_vm8 = vweird.f32 %v7718_v44 }
 0x9b2   :  { %5615 = vrcp.f32 %v3123_v10  ;;  %v3569_v50 = vpop.f32.mrf.mxu2  ;;  %v3428_v51 = vsel %vm3425_vm7, %v3427_v20, %v3423_v39  ;;  %vm7745_vm10 = vmor %vm3435_vm9, %vm3436_vm8  ;;  %v3456_v36 = vand.u32 2147483648, %v3123_v10  ;;  %v3454_v53 = vand.u32 2147483647, %v3123_v10 }
 0x9b3   :  { %v3432_v15 = vsub.f32 1.0, %v3431_v55  ;;  %v3616_v17 = vmul.f32 %v5666_v29, %v3569_v50  ;;  %v3429_v41 = vmul.f32 %v7613_v31, %v3428_v51  ;;  %vm3450_vm12 = vweird.f32 %v3123_v10 }
 0x9b4   :  { %v3457_v7 = vor.u32 1.1754944e-38, %v3456_v36  ;;  %vm3455_vm15 = vcmp.eq.f32.partialorder %v3454_v53, 8.507059e+37  ;;  %v5673_v53 = vld [vmem:[%s7160_s5 + $0x60] sm:$0xff] }
 0x9b5   :  { %v3653_v56 = vsel %vm2360_vm4, %v3616_v17, 0.0  ;;  %v3433_v9 = vmul.f32 %v7718_v44, %v3432_v15  ;;  %v3499_v63 = vpack.c.bf16 %v3429_v41, %v3414_v3 }
 0x9b6   :  { %v7730_v25 = vadd.f32 %v3653_v56, %v3652_v1 }
 0x9b7   :  { %5032 = vmatmul.msk.bf16.gmra.mxu2 %vm131_vm0, %v3499_v63  ;;  %v3434_v31 = vadd.f32 %v7718_v44, %v3433_v9 }
 0x9b8   :  { %v5616_v19 = vpop.eup %5615 }
 0x9b9   :  { %v3446_v58 = vmul.f32 %v5616_v19, %v3123_v10  ;;  %v7735_v52 = vpop.xlane.xlu1 %3125  ;;  %vm3451_vm11 = vweird.f32 %v5616_v19  ;;  %v3438_v28 = vsel %vm7745_vm10, %v7718_v44, %v3434_v31 }
 0x9ba   :  { %5617 = vrcp.f32 %v7735_v52  ;;  %v3572_v46 = vpop.f32.mrf.mxu2  ;;  %vm3452_vm14 = vmor %vm3450_vm12, %vm3451_vm11  ;;  %v3443_v62 = vsel %vm3440_vm13, %v3442_v14, %v3438_v28  ;;  %v3471_v29 = vand.u32 2147483648, %v7735_v52  ;;  %vm3465_vm2 = vweird.f32 %v7735_v52 }
 0x9bb   :  { %v3447_v5 = vsub.f32 1.0, %v3446_v58  ;;  %v3617_v30 = vmul.f32 %v5668_v4, %v3572_v46  ;;  %v3444_v23 = vmul.f32 %v7629_v60, %v3443_v62  ;;  %v3469_v60 = vand.u32 2147483647, %v7735_v52 }
 0x9bc   :  { %v3472_v1 = vor.u32 1.1754944e-38, %v3471_v29 }
 0x9bd   :  { %v3448_v22 = vmul.f32 %v5616_v19, %v3447_v5  ;;  %v3660_v8 = vsel %vm2360_vm4, %v3617_v30, 0.0  ;;  %vm3470_vm6 = vcmp.eq.f32.partialorder %v3469_v60, 8.507059e+37  ;;  %v5285_v5 = vld [vmem:[%s4409_s14 + $0x18] sm:$0xff] }
 0x9be   :  { %v7753_v27 = vadd.f32 %v3660_v8, %v3659_v11  ;;  %3721 = vmatpush.bf16.msra.mxu3 %v5285_v5  ;;  %v5282_v11 = vld [vmem:[%s4409_s14] sm:$0xff]  ;;  %v5672_v8 = vld [vmem:[%s7160_s5 + $0x8] sm:$0xff] }
 0x9bf   :  { %v3449_v0 = vadd.f32 %v5616_v19, %v3448_v22  ;;  %v5671_v22 = vld [vmem:[%s7160_s5 + $0x38] sm:$0xff]  ;;  %v3608_v28 = vmul.f32 %v5672_v8, %v7624_v6  ;;  %v5359_v8 = vld [vmem:[%s7794_s18] ss:$0 sm:$0xff]  ;;  %s5718_s18 = smov 26  }
 0x9c0   :  { %v5618_v16 = vpop.eup %5617  ;;  %v3614_v36 = vmul.f32 %v5671_v22, %v7700_v38  ;;  %s7959_s21 = sld [smem:[%s8018_s0 + %s5718_s18]]  }
 0x9c1   :  { %v3453_v40 = vsel %vm3452_vm14, %v5616_v19, %v3449_v0  ;;  %v3461_v18 = vmul.f32 %v5618_v16, %v7735_v52  ;;  %v3129_v45 = vpop.xlane.xlu0 %3128  ;;  %vm3466_vm1 = vweird.f32 %v5618_v16  ;;  %v5674_v0 = vld [vmem:[%s7160_s5 + $0x68] sm:$0xff] }
 0x9c2   :  { %5619 = vrcp.f32 %v3129_v45  ;;  %v3574_v21 = vpop.f32.mrf.mxu2  ;;  %v3458_v44 = vsel %vm3455_vm15, %v3457_v7, %v3453_v40  ;;  %vm3467_vm3 = vmor %vm3465_vm2, %vm3466_vm1  ;;  %v3486_v17 = vand.u32 2147483648, %v3129_v45  ;;  %v3484_v41 = vand.u32 2147483647, %v3129_v45 }
 0x9c3   :  { %v3462_v32 = vsub.f32 1.0, %v3461_v18  ;;  %v3618_v33 = vmul.f32 %v5670_v48, %v3574_v21  ;;  %v3459_v42 = vmul.f32 %v7643_v57, %v3458_v44  ;;  %vm3480_vm7 = vweird.f32 %v3129_v45  ;;  %v5676_v21 = vld [vmem:[%s7160_s5 + $0x98] sm:$0xff] }
 0x9c4   :  { %v3487_v9 = vor.u32 1.1754944e-38, %v3486_v17  ;;  %vm3485_vm9 = vcmp.eq.f32.partialorder %v3484_v41, 8.507059e+37  ;;  %v3639_v61 = vsel %vm2360_vm4, %v3614_v36, 0.0  ;;  %v3638_v7 = vsel %vm2360_vm4, %v3608_v28, 0.0 }
 0x9c5   :  { %v3463_v39 = vmul.f32 %v5618_v16, %v3462_v32  ;;  %v3667_v20 = vsel %vm2360_vm4, %v3618_v33, 0.0  ;;  %v3500_v10 = vpack.c.bf16 %v3459_v42, %v3444_v23  ;;  %v3640_v38 = vadd.f32 %v3639_v61, %v3638_v7 }
 0x9c6   :  { %v7763_v55 = vadd.f32 %v3667_v20, %v3666_v13  ;;  %v5677_v20 = vld [vmem:[%s7160_s5 + $0x70] sm:$0xff] }
 0x9c7   :  { %5033 = vmatmul.msk.bf16.gmra.mxu2 %vm131_vm0, %v3500_v10  ;;  %v3464_v50 = vadd.f32 %v5618_v16, %v3463_v39 }
 0x9c8   :  { %v5620_v34 = vpop.eup %5619 }
 0x9c9   :  { %v3476_v15 = vmul.f32 %v5620_v34, %v3129_v45  ;;  %v3468_v51 = vsel %vm3467_vm3, %v5618_v16, %v3464_v50  ;;  %vm3481_vm5 = vweird.f32 %v5620_v34  ;;  %v5679_v50 = vld [vmem:[%s7160_s5 + $0xa0] sm:$0xff] }
 0x9ca   :  { %vm3482_vm8 = vmor %vm3480_vm7, %vm3481_vm5  ;;  %v3473_v63 = vsel %vm3470_vm6, %v3472_v1, %v3468_v51  ;;  %v3577_v31 = vpop.f32.mrf.mxu2  ;;  %v5680_v51 = vld [vmem:[%s7160_s5 + $0xa8] sm:$0xff] }
 0x9cb   :  { %v3477_v57 = vsub.f32 1.0, %v3476_v15  ;;  %v3474_v2 = vmul.f32 %v7659_v24, %v3473_v63  ;;  %v5284_v24 = vld [vmem:[%s4409_s14 + $0x10] sm:$0xff]  ;;  %v3619_v14 = vmul.f32 %v5673_v53, %v3577_v31  ;;  %v5685_v53 = vld [vmem:[#allocation2] sm:$0xff] }
 0x9cc   :  { %3722 = vmatpush.bf16.msra.mxu3 %v5284_v24  ;;  %v5684_v24 = vld [vmem:[%s7160_s5 + $0xb8] sm:$0xff] }
 0x9cd   :  { %v3478_v3 = vmul.f32 %v5620_v34, %v3477_v57  ;;  %v3634_v18 = vsel %vm2360_vm4, %v3619_v14, 0.0 }
 0x9ce   :  { %v3635_v48 = vadd.f32 %v3634_v18, %v7695_v12  ;;  %v5687_v18 = vld [vmem:[#allocation2 + $0x10] sm:$0xff] }
 0x9cf   :  { %v3479_v56 = vadd.f32 %v5620_v34, %v3478_v3 }
 0x9d1   :  { %v3483_v19 = vsel %vm3482_vm8, %v5620_v34, %v3479_v56  ;;  %v5678_v34 = vld [vmem:[%s7160_s5 + $0x78] sm:$0xff] }
 0x9d2   :  { %v3488_v43 = vsel %vm3485_vm9, %v3487_v9, %v3483_v19  ;;  %v3579_v46 = vpop.f32.mrf.mxu2 }
 0x9d3   :  { %v3489_v58 = vmul.f32 %v7673_v37, %v3488_v43  ;;  %v5283_v37 = vld [vmem:[%s4409_s14 + $0x8] sm:$0xff]  ;;  %v3620_v16 = vmul.f32 %v5674_v0, %v3579_v46  ;;  %v5683_v46 = vld [vmem:[%s7160_s5 + $0xb0] sm:$0xff]  ;;  %s5717_s14 = smov 25  }
 0x9d4   :  { %3723 = vmatpush.bf16.msra.mxu3 %v5283_v37  ;;  %s7954_s17 = sld [smem:[%s8018_s0 + %s5717_s14]]  }
 0x9d5   :  { %v3501_v52 = vpack.c.bf16 %v3489_v58, %v3474_v2  ;;  %v3641_v45 = vsel %vm2360_vm4, %v3620_v16, 0.0  ;;  %v5681_v2 = vld [vmem:[%s7160_s5 + $0x80] sm:$0xff] }
 0x9d6   :  { %v3642_v33 = vadd.f32 %v3641_v45, %v3640_v38 }
 0x9d7   :  { %5034 = vmatmul.msk.bf16.gmra.mxu2 %vm131_vm0, %v3501_v52  ;;  %v5682_v52 = vld [vmem:[%s7160_s5 + $0x88] sm:$0xff]  ;;  %s5715_s5 = smov 23  }
 0x9d8   :  { %3724 = vmatpush.bf16.msra.mxu3 %v5282_v11  ;;  %s4415_s9 = sld [smem:[%s8018_s0 + %s5715_s5]]  }
 0x9da   :  { %v3582_v59 = vpop.f32.mrf.mxu2 }
 0x9db   :  { %v3621_v10 = vmul.f32 %v5677_v20, %v3582_v59 }
 0x9dd   :  { %v3648_v29 = vsel %vm2360_vm4, %v3621_v10, 0.0  ;;  %v5690_v10 = vld [vmem:[#allocation2 + $0x28] sm:$0xff] }
 0x9de   :  { %v3649_v41 = vadd.f32 %v3648_v29, %v7716_v35 }
 0x9e2   :  { %v3584_v4 = vpop.f32.mrf.mxu2 }
 0x9e3   :  { %v3622_v12 = vmul.f32 %v5678_v34, %v3584_v4 }
 0x9e5   :  { %v3655_v60 = vsel %vm2360_vm4, %v3622_v12, 0.0 }
 0x9e6   :  { %v3656_v1 = vadd.f32 %v3655_v60, %v7730_v25 }
 0x9ea   :  { %v3587_v30 = vpop.f32.mrf.mxu2 }
 0x9eb   :  { %v3623_v58 = vmul.f32 %v5681_v2, %v3587_v30 }
 0x9ed   :  { %v3662_v35 = vsel %vm2360_vm4, %v3623_v58, 0.0 }
 0x9ee   :  { %v3663_v11 = vadd.f32 %v3662_v35, %v7753_v27 }
 0x9f2   :  { %v3589_v54 = vpop.f32.mrf.mxu2 }
 0x9f3   :  { %v3624_v31 = vmul.f32 %v5682_v52, %v3589_v54 }
 0x9f5   :  { %v3669_v25 = vsel %vm2360_vm4, %v3624_v31, 0.0 }
 0xa3a   :  { %v3592_v26 = vpop.f32.mrf.mxu2 }
 0xa3b   :  { %v3625_v40 = vmul.f32 %v5675_v49, %v3592_v26  ;;  %v3670_v26 = vadd.f32 %v3669_v25, %v7763_v55  ;;  %v5686_v49 = vld [vmem:[#allocation2 + $0x8] sm:$0xff] }
 0xa3d   :  { %v3636_v6 = vsel %vm2360_vm4, %v3625_v40, 0.0 }
 0xa3e   :  { %v3637_v23 = vadd.f32 %v3636_v6, %v3635_v48 }
 0xa42   :  { %v3594_v62 = vpop.f32.mrf.mxu2 }
 0xa43   :  { %v3626_v32 = vmul.f32 %v5676_v21, %v3594_v62  ;;  %v5688_v21 = vld [vmem:[#allocation2 + $0x18] sm:$0xff] }
 0xa45   :  { %v3643_v44 = vsel %vm2360_vm4, %v3626_v32, 0.0 }
 0xa46   :  { %v3644_v42 = vadd.f32 %v3643_v44, %v3642_v33 }
 0xa48   :  { %v3673_v13 = vpack.c.bf16 %v3644_v42, %v3637_v23  ;;  %v5689_v23 = vld [vmem:[#allocation2 + $0x20] sm:$0xff] }
 0xa4a   :  { %v3597_v39 = vpop.f32.mrf.mxu2  ;;  %5051 = vmatmul.msk.bf16.vlgmr.msra.gmra.mxu3 %vm2360_vm4, %v3673_v13 }
 0xa4b   :  { %v3627_v15 = vmul.f32 %v5679_v50, %v3597_v39 }
 0xa4d   :  { %v3650_v17 = vsel %vm2360_vm4, %v3627_v15, 0.0 }
 0xa4e   :  { %v3651_v9 = vadd.f32 %v3650_v17, %v3649_v41 }
 0xa52   :  { %v3599_v57 = vpop.f32.mrf.mxu2 }
 0xa53   :  { %v3628_v3 = vmul.f32 %v5680_v51, %v3599_v57 }
 0xa55   :  { %v3657_v56 = vsel %vm2360_vm4, %v3628_v3, 0.0 }
 0xa56   :  { %v3658_v63 = vadd.f32 %v3657_v56, %v3656_v1 }
 0xa58   :  { %v3674_v19 = vpack.c.bf16 %v3658_v63, %v3651_v9 }
 0xa5a   :  { %v3602_v43 = vpop.f32.mrf.mxu2  ;;  %5052 = vmatmul.msk.bf16.gmra.mxu3 %vm2360_vm4, %v3674_v19 }
 0xa5b   :  { %v3629_v59 = vmul.f32 %v5683_v46, %v3602_v43 }
 0xa5d   :  { %v3664_v4 = vsel %vm2360_vm4, %v3629_v59, 0.0 }
 0xa5e   :  { %v3665_v22 = vadd.f32 %v3664_v4, %v3663_v11 }
 0xa62   :  { %v3604_v5 = vpop.f32.mrf.mxu2 }
 0xa63   :  { %v3630_v37 = vmul.f32 %v5684_v24, %v3604_v5 }
 0xa65   :  { %v3671_v30 = vsel %vm2360_vm4, %v3630_v37, 0.0 }
 0xa66   :  { %v3672_v54 = vadd.f32 %v3671_v30, %v3670_v26 }
 0xa68   :  { %v3675_v36 = vpack.c.bf16 %v3672_v54, %v3665_v22  ;;  %v5289_v54 = vld [vmem:[%s4413_s4 + $0x18] sm:$0xff] }
 0xa69   :  { %3961 = vmatpush.bf16.msra.mxu1 %v5289_v54 }
 0xa6a   :  { %5053 = vmatmul.msk.bf16.gmra.mxu3 %vm2360_vm4, %v3675_v36  ;;  %v5288_v36 = vld [vmem:[%s4413_s4 + $0x10] sm:$0xff] }
 0xa6d   :  { %3962 = vmatpush.bf16.msra.mxu1 %v5288_v36 }
 0xacd   :  { %v3726_v28 = vpop.f32.mrf.mxu3 }
 0xace   :  { %v3741_v14 = vadd.f32 %v5685_v53, %v3726_v28  ;;  %v5287_v53 = vld [vmem:[%s4413_s4 + $0x8] sm:$0xff] }
 0xacf   :  { %3963 = vmatpush.bf16.msra.mxu1 %v5287_v53 }
 0xad0   :  { %v3751_v0 = vadd.f32 %v5359_v8, %v3741_v14 }
 0xad2   :  { %v3759_v16 = vsel %vm2360_vm4, %v3751_v0, 0.0 }
 0xad3   :  { %3760 = vadd.xlane.f32.xlu2 %v3759_v16 }
 0xad5   :  { %v3728_v61 = vpop.f32.mrf.mxu3 }
 0xad6   :  { %v3742_v27 = vadd.f32 %v5686_v49, %v3728_v61 }
 0xad8   :  { %v7820_v40 = vadd.f32 %v5359_v8, %v3742_v27 }
 0xada   :  { %v3762_v55 = vsel %vm2360_vm4, %v7820_v40, 0.0 }
 0xadb   :  { %3763 = vadd.xlane.f32.xlu1 %v3762_v55 }
 0xadd   :  { %v3731_v7 = vpop.f32.mrf.mxu3 }
 0xade   :  { %v3743_v45 = vadd.f32 %v5687_v18, %v3731_v7 }
 0xae0   :  { %v7824_v38 = vadd.f32 %v5359_v8, %v3743_v45 }
 0xae2   :  { %v3765_v62 = vsel %vm2360_vm4, %v7824_v38, 0.0 }
 0xae3   :  { %3766 = vadd.xlane.f32.xlu0 %v3765_v62 }
 0xae5   :  { %v3733_v6 = vpop.f32.mrf.mxu3 }
 0xae6   :  { %v3744_v32 = vadd.f32 %v5688_v21, %v3733_v6 }
 0xae8   :  { %v3754_v48 = vadd.f32 %v5359_v8, %v3744_v32 }
 0xaea   :  { %v3768_v33 = vsel %vm2360_vm4, %v3754_v48, 0.0 }
 0xaeb   :  { %3769 = vadd.xlane.f32.xlu2 %v3768_v33 }
 0xaed   :  { %v3736_v44 = vpop.f32.mrf.mxu3 }
 0xaee   :  { %v3745_v42 = vadd.f32 %v5689_v23, %v3736_v44 }
 0xaf0   :  { %v7829_v13 = vadd.f32 %v5359_v8, %v3745_v42 }
 0xaf2   :  { %v3771_v39 = vsel %vm2360_vm4, %v7829_v13, 0.0 }
 0xaf3   :  { %3772 = vadd.xlane.f32.xlu1 %v3771_v39 }
 0xaf5   :  { %v3738_v20 = vpop.f32.mrf.mxu3 }
 0xaf6   :  { %v3746_v34 = vadd.f32 %v5690_v10, %v3738_v20 }
 0xaf8   :  { %v7838_v12 = vadd.f32 %v5359_v8, %v3746_v34 }
 0xafa   :  { %v3774_v50 = vsel %vm2360_vm4, %v7838_v12, 0.0 }
 0xafb   :  { %3775 = vadd.xlane.f32.xlu0 %v3774_v50  ;;  %v7900_v50 = vld [vmem:[%s7836_s22] ss:$0 sm:$0xff]  ;;  %s5719_s22 = smov 32  }
 0xb46   :  { %v3761_v15 = vpop.xlane.xlu2 %3760 }
 0xb47   :  { %v3777_v29 = vmul.f32 %v3761_v15, %v7033_v47 }
 0xb49   :  { %v7848_v60 = vsub.f32 %v3751_v0, %v3777_v29  ;;  %v5286_v0 = vld [vmem:[%s4413_s4] sm:$0xff] }
 0xb4a   :  { %3964 = vmatpush.bf16.msra.mxu1 %v5286_v0 }
 0xb4b   :  { %v3789_v57 = vmul.f32 %v7848_v60, %v7848_v60 }
 0xb4d   :  { %v3795_v17 = vsel %vm2360_vm4, %v3789_v57, 0.0 }
 0xb4e   :  { %v3764_v51 = vpop.xlane.xlu1 %3763  ;;  %3796 = vadd.xlane.f32.xlu2 %v3795_v17 }
 0xb4f   :  { %v3778_v3 = vmul.f32 %v3764_v51, %v7033_v47 }
 0xb51   :  { %v7855_v41 = vsub.f32 %v7820_v40, %v3778_v3 }
 0xb53   :  { %v3790_v1 = vmul.f32 %v7855_v41, %v7855_v41 }
 0xb55   :  { %v3798_v56 = vsel %vm2360_vm4, %v3790_v1, 0.0  ;;  %v7904_v1 = vld [vmem:[%s7843_s26] ss:$0 sm:$0xff] }
 0xb56   :  { %v3767_v9 = vpop.xlane.xlu0 %3766  ;;  %3799 = vadd.xlane.f32.xlu1 %v3798_v56 }
 0xb57   :  { %v3779_v63 = vmul.f32 %v3767_v9, %v7033_v47 }
 0xb59   :  { %v7862_v19 = vsub.f32 %v7824_v38, %v3779_v63 }
 0xb5b   :  { %v3791_v43 = vmul.f32 %v7862_v19, %v7862_v19 }
 0xb5d   :  { %v3801_v2 = vsel %vm2360_vm4, %v3791_v43, 0.0 }
 0xb5e   :  { %3802 = vadd.xlane.f32.xlu0 %v3801_v2  ;;  %v3770_v58 = vpop.xlane.xlu2 %3769 }
 0xb5f   :  { %v3780_v52 = vmul.f32 %v3770_v58, %v7033_v47 }
 0xb61   :  { %v7868_v31 = vsub.f32 %v3754_v48, %v3780_v52 }
 0xb63   :  { %v3792_v46 = vmul.f32 %v7868_v31, %v7868_v31 }
 0xb65   :  { %v3804_v59 = vsel %vm2360_vm4, %v3792_v46, 0.0 }
 0xb66   :  { %v3773_v35 = vpop.xlane.xlu1 %3772  ;;  %3805 = vadd.xlane.f32.xlu2 %v3804_v59 }
 0xb67   :  { %v3781_v25 = vmul.f32 %v3773_v35, %v7033_v47 }
 0xb69   :  { %v7875_v5 = vsub.f32 %v7829_v13, %v3781_v25 }
 0xb6b   :  { %v3793_v4 = vmul.f32 %v7875_v5, %v7875_v5 }
 0xb6d   :  { %v3807_v24 = vsel %vm2360_vm4, %v3793_v4, 0.0 }
 0xb6e   :  { %3808 = vadd.xlane.f32.xlu1 %v3807_v24  ;;  %v3776_v37 = vpop.xlane.xlu0 %3775 }
 0xb6f   :  { %v3782_v11 = vmul.f32 %v3776_v37, %v7033_v47 }
 0xb71   :  { %v7882_v26 = vsub.f32 %v7838_v12, %v3782_v11 }
 0xb73   :  { %v3794_v30 = vmul.f32 %v7882_v26, %v7882_v26 }
 0xb75   :  { %v3810_v22 = vsel %vm2360_vm4, %v3794_v30, 0.0 }
 0xb76   :  { %3811 = vadd.xlane.f32.xlu0 %v3810_v22 }
 0xbc1   :  { %v3797_v8 = vpop.xlane.xlu2 %3796 }
 0xbc2   :  { %v3813_v28 = vmul.f32 %v3797_v8, %v7033_v47 }
 0xbc4   :  { %v3819_v14 = vadd.f32 1e-05, %v3813_v28 }
 0xbc6   :  { %5621 = vrsqrt.f32 %v3819_v14  ;;  %vm3831_vm10 = vweird.f32 %v3819_v14 }
 0xbc9   :  { %v3800_v16 = vpop.xlane.xlu1 %3799 }
 0xbca   :  { %v3814_v61 = vmul.f32 %v3800_v16, %v7033_v47 }
 0xbcc   :  { %v5622_v49 = vpop.eup %5621  ;;  %v3820_v27 = vadd.f32 1e-05, %v3814_v61 }
 0xbcd   :  { %v3826_v55 = vmul.f32 %v5622_v49, %v3819_v14  ;;  %vm3832_vm0 = vweird.f32 %v5622_v49 }
 0xbce   :  { %5623 = vrsqrt.f32 %v3820_v27  ;;  %vm3833_vm11 = vmor %vm3831_vm10, %vm3832_vm0  ;;  %vm3841_vm13 = vweird.f32 %v3820_v27 }
 0xbcf   :  { %v3827_v7 = vmul.f32 %v5622_v49, %v3826_v55 }
 0xbd1   :  { %v3828_v18 = vmul.f32 0.5, %v3827_v7  ;;  %v3803_v45 = vpop.xlane.xlu0 %3802 }
 0xbd2   :  { %v3815_v62 = vmul.f32 %v3803_v45, %v7033_v47 }
 0xbd3   :  { %v3829_v6 = vsub.f32 1.5, %v3828_v18 }
 0xbd4   :  { %v5624_v21 = vpop.eup %5623  ;;  %v3821_v32 = vadd.f32 1e-05, %v3815_v62 }
 0xbd5   :  { %v3830_v48 = vmul.f32 %v5622_v49, %v3829_v6  ;;  %v3836_v33 = vmul.f32 %v5624_v21, %v3820_v27  ;;  %vm3842_vm12 = vweird.f32 %v5624_v21 }
 0xbd6   :  { %5625 = vrsqrt.f32 %v3821_v32  ;;  %vm3843_vm14 = vmor %vm3841_vm13, %vm3842_vm12  ;;  %vm3851_vm1 = vweird.f32 %v3821_v32 }
 0xbd7   :  { %v3837_v44 = vmul.f32 %v5624_v21, %v3836_v33  ;;  %v3834_v23 = vsel %vm3833_vm11, %v5622_v49, %v3830_v48 }
 0xbd8   :  { %v3885_v15 = vmul.f32 %v3834_v23, %v7848_v60 }
 0xbd9   :  { %v3838_v42 = vmul.f32 0.5, %v3837_v44  ;;  %v3806_v39 = vpop.xlane.xlu2 %3805 }
 0xbda   :  { %v3816_v20 = vmul.f32 %v3806_v39, %v7033_v47  ;;  %v3894_v56 = vmul.f32 %v7900_v50, %v3885_v15 }
 0xbdb   :  { %v3839_v10 = vsub.f32 1.5, %v3838_v42 }
 0xbdc   :  { %v5626_v34 = vpop.eup %5625  ;;  %v3822_v29 = vadd.f32 1e-05, %v3816_v20  ;;  %v3903_v46 = vadd.f32 %v7904_v1, %v3894_v56 }
 0xbdd   :  { %v3840_v57 = vmul.f32 %v5624_v21, %v3839_v10  ;;  %v3846_v17 = vmul.f32 %v5626_v34, %v3821_v32  ;;  %vm3852_vm15 = vweird.f32 %v5626_v34 }
 0xbde   :  { %5627 = vrsqrt.f32 %v3822_v29  ;;  %vm3853_vm2 = vmor %vm3851_vm1, %vm3852_vm15  ;;  %vm3861_vm5 = vweird.f32 %v3822_v29  ;;  %vm4240_vm15 = vcmask 253952  }
 0xbdf   :  { %v3844_v51 = vsel %vm3843_vm14, %v5624_v21, %v3840_v57  ;;  %v3847_v3 = vmul.f32 %v5626_v34, %v3846_v17  ;;  %v5295_v57 = vld [vmem:[%s4415_s9 + $0x28] sm:$0xff]  ;;  %v5293_v17 = vld [vmem:[%s4415_s9 + $0x18] sm:$0xff] }
 0xbe0   :  { %v3886_v9 = vmul.f32 %v3844_v51, %v7855_v41  ;;  %v5292_v51 = vld [vmem:[%s4415_s9 + $0x10] sm:$0xff] }
 0xbe1   :  { %v3848_v63 = vmul.f32 0.5, %v3847_v3  ;;  %v3809_v43 = vpop.xlane.xlu1 %3808  ;;  %v5362_v3 = vld [vmem:[%s7890_s30] ss:$0 sm:$0xff] }
 0xbe2   :  { %v3895_v2 = vmul.f32 %v7900_v50, %v3886_v9  ;;  %v3817_v60 = vmul.f32 %v3809_v43, %v7033_v47 }
 0xbe3   :  { %v3849_v58 = vsub.f32 1.5, %v3848_v63  ;;  %v5290_v63 = vld [vmem:[%s4415_s9] sm:$0xff] }
 0xbe4   :  { %v5628_v52 = vpop.eup %5627  ;;  %v3904_v59 = vadd.f32 %v7904_v1, %v3895_v2  ;;  %v3823_v35 = vadd.f32 1e-05, %v3817_v60 }
 0xbe5   :  { %v3850_v25 = vmul.f32 %v5626_v34, %v3849_v58  ;;  %v3856_v4 = vmul.f32 %v5628_v52, %v3822_v29  ;;  %vm3862_vm3 = vweird.f32 %v5628_v52 }
 0xbe6   :  { %v3909_v24 = vpack.c.bf16 %v3904_v59, %v3903_v46  ;;  %5629 = vrsqrt.f32 %v3823_v35  ;;  %vm3863_vm6 = vmor %vm3861_vm5, %vm3862_vm3  ;;  %vm3871_vm8 = vweird.f32 %v3823_v35  ;;  %vm4258_vm3 = vcmask 258052  }
 0xbe7   :  { %v3857_v41 = vmul.f32 %v5628_v52, %v3856_v4  ;;  %v3854_v37 = vsel %vm3853_vm2, %v5626_v34, %v3850_v25 }
 0xbe8   :  { %5070 = vmatmul.msk.bf16.vlgmr.msra.gmra.mxu1 %vm2360_vm4, %v3909_v24  ;;  %v3887_v8 = vmul.f32 %v3854_v37, %v7862_v19 }
 0xbe9   :  { %v3858_v11 = vmul.f32 0.5, %v3857_v41  ;;  %v3812_v30 = vpop.xlane.xlu0 %3811 }
 0xbea   :  { %v3818_v22 = vmul.f32 %v3812_v30, %v7033_v47  ;;  %v3896_v49 = vmul.f32 %v7900_v50, %v3887_v8 }
 0xbeb   :  { %v3859_v54 = vsub.f32 1.5, %v3858_v11 }
 0xbec   :  { %v5630_v36 = vpop.eup %5629  ;;  %v3824_v28 = vadd.f32 1e-05, %v3818_v22  ;;  %v3905_v45 = vadd.f32 %v7904_v1, %v3896_v49 }
 0xbed   :  { %v3860_v53 = vmul.f32 %v5628_v52, %v3859_v54  ;;  %v3866_v14 = vmul.f32 %v5630_v36, %v3823_v35  ;;  %vm3872_vm7 = vweird.f32 %v5630_v36 }
 0xbee   :  { %5631 = vrsqrt.f32 %v3824_v28  ;;  %vm3873_vm9 = vmor %vm3871_vm8, %vm3872_vm7  ;;  %vm3881_vm10 = vweird.f32 %v3824_v28 }
 0xbef   :  { %v3864_v0 = vsel %vm3863_vm6, %v5628_v52, %v3860_v53  ;;  %v3867_v16 = vmul.f32 %v5630_v36, %v3866_v14 }
 0xbf0   :  { %v3888_v61 = vmul.f32 %v3864_v0, %v7868_v31 }
 0xbf1   :  { %v3868_v27 = vmul.f32 0.5, %v3867_v16 }
 0xbf2   :  { %v3897_v55 = vmul.f32 %v7900_v50, %v3888_v61 }
 0xbf3   :  { %v3869_v7 = vsub.f32 1.5, %v3868_v27 }
 0xbf4   :  { %v5632_v18 = vpop.eup %5631  ;;  %v3906_v19 = vadd.f32 %v7904_v1, %v3897_v55 }
 0xbf5   :  { %v3870_v62 = vmul.f32 %v5630_v36, %v3869_v7  ;;  %v3876_v6 = vmul.f32 %v5632_v18, %v3824_v28  ;;  %vm3882_vm0 = vweird.f32 %v5632_v18 }
 0xbf6   :  { %v3910_v21 = vpack.c.bf16 %v3906_v19, %v3905_v45  ;;  %vm3883_vm11 = vmor %vm3881_vm10, %vm3882_vm0  ;;  %vm4264_vm10 = vcmask 521477  }
 0xbf7   :  { %v3877_v32 = vmul.f32 %v5632_v18, %v3876_v6  ;;  %v3874_v31 = vsel %vm3873_vm9, %v5630_v36, %v3870_v62 }
 0xbf8   :  { %5071 = vmatmul.msk.bf16.gmra.mxu1 %vm2360_vm4, %v3910_v21  ;;  %v3889_v44 = vmul.f32 %v3874_v31, %v7875_v5  ;;  %v5297_v5 = vld [vmem:[%s4415_s9 + $0x38] sm:$0xff] }
 0xbf9   :  { %v3878_v48 = vmul.f32 0.5, %v3877_v32  ;;  %4102 = vmatpush.bf16.msrb.mxu3 %v5297_v5 }
 0xbfa   :  { %v3898_v20 = vmul.f32 %v7900_v50, %v3889_v44 }
 0xbfb   :  { %v3879_v33 = vsub.f32 1.5, %v3878_v48 }
 0xbfc   :  { %v3907_v34 = vadd.f32 %v7904_v1, %v3898_v20 }
 0xbfd   :  { %v3880_v23 = vmul.f32 %v5632_v18, %v3879_v33 }
 0xbff   :  { %v3884_v42 = vsel %vm3883_vm11, %v5632_v18, %v3880_v23  ;;  %vm4246_vm11 = vcmask 517377  }
 0xc00   :  { %v3890_v39 = vmul.f32 %v3884_v42, %v7882_v26  ;;  %v5296_v26 = vld [vmem:[%s4415_s9 + $0x30] sm:$0xff] }
 0xc01   :  { %4103 = vmatpush.bf16.msrb.mxu3 %v5296_v26 }
 0xc02   :  { %v3899_v10 = vmul.f32 %v7900_v50, %v3890_v39  ;;  %v5294_v50 = vld [vmem:[%s4415_s9 + $0x20] sm:$0xff] }
 0xc04   :  { %v3908_v15 = vadd.f32 %v7904_v1, %v3899_v10  ;;  %v5291_v1 = vld [vmem:[%s4415_s9 + $0x8] sm:$0xff] }
 0xc05   :  { %4104 = vmatpush.bf16.msrb.mxu3 %v5295_v57 }
 0xc06   :  { %v3911_v29 = vpack.c.bf16 %v3908_v15, %v3907_v34 }
 0xc08   :  { %5072 = vmatmul.msk.bf16.gmra.mxu1 %vm2360_vm4, %v3911_v29 }
 0xc09   :  { %4105 = vmatpush.bf16.msrb.mxu3 %v5294_v50 }
 0xc0d   :  { %4106 = vmatpush.bf16.msrb.mxu3 %v5293_v17 }
 0xc11   :  { %4107 = vmatpush.bf16.msrb.mxu3 %v5292_v51 }
 0xc15   :  { %4108 = vmatpush.bf16.msrb.mxu3 %v5291_v1 }
 0xc19   :  { %4109 = vmatpush.bf16.msrb.mxu3 %v5290_v63 }
 0xc65   :  { %v3966_v56 = vpop.f32.mrf.mxu1 }
 0xc66   :  { %v3967_v9 = vadd.f32 %v5362_v3, %v3966_v56 }
 0xc68   :  { %v3981_v43 = vmul.f32 %v3967_v9, %v3967_v9 }
 0xc6a   :  { %v3987_v2 = vmul.f32 %v3981_v43, %v3967_v9 }
 0xc6c   :  { %v3993_v60 = vmul.f32 0.044715, %v3987_v2 }
 0xc6d   :  { %v3968_v58 = vpop.f32.mrf.mxu1 }
 0xc6e   :  { %v3999_v52 = vadd.f32 %v3993_v60, %v3967_v9  ;;  %v3969_v46 = vadd.f32 %v5362_v3, %v3968_v58 }
 0xc70   :  { %v4005_v59 = vmul.f32 0.7978846, %v3999_v52  ;;  %v3982_v35 = vmul.f32 %v3969_v46, %v3969_v46 }
 0xc72   :  { %v3988_v25 = vmul.f32 %v3982_v35, %v3969_v46  ;;  %5633 = vtanh.f32 %v4005_v59 }
 0xc74   :  { %v3994_v4 = vmul.f32 0.044715, %v3988_v25 }
 0xc75   :  { %v3971_v24 = vpop.f32.mrf.mxu1 }
 0xc76   :  { %v4000_v41 = vadd.f32 %v3994_v4, %v3969_v46  ;;  %v3972_v37 = vadd.f32 %v5362_v3, %v3971_v24  ;;  %v5363_v4 = vld [vmem:[%s4416_s13] ss:$0 sm:$0xff] }
 0xc78   :  { %v4006_v11 = vmul.f32 0.7978846, %v4000_v41  ;;  %v3983_v30 = vmul.f32 %v3972_v37, %v3972_v37  ;;  %v5634_v22 = vpop.eup %5633 }
 0xc79   :  { %v4017_v8 = vadd.f32 1.0, %v5634_v22 }
 0xc7a   :  { %5635 = vtanh.f32 %v4006_v11  ;;  %v3989_v54 = vmul.f32 %v3983_v30, %v3972_v37 }
 0xc7b   :  { %v4023_v49 = vmul.f32 0.5, %v4017_v8 }
 0xc7c   :  { %v3995_v36 = vmul.f32 0.044715, %v3989_v54 }
 0xc7d   :  { %v3973_v28 = vpop.f32.mrf.mxu1  ;;  %v4029_v45 = vmul.f32 %v4023_v49, %v3967_v9 }
 0xc7e   :  { %v4001_v53 = vadd.f32 %v3995_v36, %v3972_v37  ;;  %v3974_v14 = vadd.f32 %v5362_v3, %v3973_v28 }
 0xc80   :  { %v5636_v0 = vpop.eup %5635  ;;  %v4007_v16 = vmul.f32 0.7978846, %v4001_v53  ;;  %v3984_v61 = vmul.f32 %v3974_v14, %v3974_v14 }
 0xc81   :  { %v4018_v27 = vadd.f32 1.0, %v5636_v0 }
 0xc82   :  { %v3990_v55 = vmul.f32 %v3984_v61, %v3974_v14  ;;  %5637 = vtanh.f32 %v4007_v16 }
 0xc83   :  { %v4024_v7 = vmul.f32 0.5, %v4018_v27 }
 0xc84   :  { %v3996_v18 = vmul.f32 0.044715, %v3990_v55 }
 0xc85   :  { %v4030_v19 = vmul.f32 %v4024_v7, %v3969_v46  ;;  %v3976_v62 = vpop.f32.mrf.mxu1 }
 0xc86   :  { %v4002_v6 = vadd.f32 %v3996_v18, %v3974_v14  ;;  %v3977_v21 = vadd.f32 %v5362_v3, %v3976_v62 }
 0xc87   :  { %v4035_v32 = vpack.c.bf16 %v4030_v19, %v4029_v45 }
 0xc88   :  { %v4008_v31 = vmul.f32 0.7978846, %v4002_v6  ;;  %v3985_v48 = vmul.f32 %v3977_v21, %v3977_v21  ;;  %v5638_v33 = vpop.eup %5637 }
 0xc89   :  { %4110 = vmatmul.bf16.vlgmr.msrb.gmra.mxu3 %v4035_v32  ;;  %v4019_v39 = vadd.f32 1.0, %v5638_v33 }
 0xc8a   :  { %5639 = vtanh.f32 %v4008_v31  ;;  %v3991_v44 = vmul.f32 %v3985_v48, %v3977_v21 }
 0xc8b   :  { %v4025_v26 = vmul.f32 0.5, %v4019_v39 }
 0xc8c   :  { %v3997_v23 = vmul.f32 0.044715, %v3991_v44 }
 0xc8d   :  { %v3978_v42 = vpop.f32.mrf.mxu1  ;;  %v4031_v51 = vmul.f32 %v4025_v26, %v3972_v37 }
 0xc8e   :  { %v4003_v20 = vadd.f32 %v3997_v23, %v3977_v21  ;;  %v3979_v10 = vadd.f32 %v5362_v3, %v3978_v42 }
 0xc90   :  { %v5640_v34 = vpop.eup %5639  ;;  %v4009_v15 = vmul.f32 0.7978846, %v4003_v20  ;;  %v3986_v29 = vmul.f32 %v3979_v10, %v3979_v10 }
 0xc91   :  { %v4020_v5 = vadd.f32 1.0, %v5640_v34 }
 0xc92   :  { %v3992_v57 = vmul.f32 %v3986_v29, %v3979_v10  ;;  %5641 = vtanh.f32 %v4009_v15 }
 0xc93   :  { %v4026_v50 = vmul.f32 0.5, %v4020_v5 }
 0xc94   :  { %v3998_v17 = vmul.f32 0.044715, %v3992_v57 }
 0xc95   :  { %v4032_v1 = vmul.f32 %v4026_v50, %v3974_v14 }
 0xc96   :  { %v4004_v56 = vadd.f32 %v3998_v17, %v3979_v10 }
 0xc97   :  { %v4036_v9 = vpack.c.bf16 %v4032_v1, %v4031_v51 }
 0xc98   :  { %v4010_v63 = vmul.f32 0.7978846, %v4004_v56  ;;  %v5642_v3 = vpop.eup %5641 }
 0xc99   :  { %4114 = vmatmul.bf16.gmra.mxu3 %v4036_v9  ;;  %v4021_v43 = vadd.f32 1.0, %v5642_v3 }
 0xc9a   :  { %5643 = vtanh.f32 %v4010_v63  ;;  %v5364_v63 = vld [vmem:[%s7954_s17] ss:$0 sm:$0xff] }
 0xc9b   :  { %v4027_v58 = vmul.f32 0.5, %v4021_v43 }
 0xc9d   :  { %v4033_v46 = vmul.f32 %v4027_v58, %v3977_v21 }
 0xca0   :  { %v5644_v2 = vpop.eup %5643 }
 0xca1   :  { %v4022_v60 = vadd.f32 1.0, %v5644_v2 }
 0xca3   :  { %v4028_v52 = vmul.f32 0.5, %v4022_v60  ;;  %v5365_v60 = vld [vmem:[%s7959_s21] ss:$0 sm:$0xff] }
 0xca5   :  { %v4034_v59 = vmul.f32 %v4028_v52, %v3979_v10 }
 0xca7   :  { %v4037_v35 = vpack.c.bf16 %v4034_v59, %v4033_v46 }
 0xca9   :  { %4118 = vmatmul.bf16.gmra.mxu3 %v4037_v35 }
 0xd0c   :  { %v4111_v25 = vpop.f32.mrf.mxu3 }
 0xd14   :  { %v4112_v24 = vpop.f32.mrf.mxu3 }
 0xd15   :  { %v4124_v41 = vadd.f32 %v4112_v24, %v7820_v40 }
 0xd17   :  { %v4132_v37 = vadd.f32 %v5363_v4, %v4124_v41 }
 0xd19   :  { %v4138_v11 = vsel %vm2360_vm4, %v4132_v37, 0.0 }
 0xd1a   :  { %4139 = vadd.xlane.f32.xlu2 %v4138_v11 }
 0xd1c   :  { %v4115_v30 = vpop.f32.mrf.mxu3 }
 0xd1d   :  { %v4125_v22 = vadd.f32 %v4115_v30, %v7824_v38 }
 0xd1f   :  { %v4133_v54 = vadd.f32 %v5363_v4, %v4125_v22 }
 0xd21   :  { %v4141_v36 = vsel %vm2360_vm4, %v4133_v54, 0.0 }
 0xd22   :  { %4142 = vadd.xlane.f32.xlu1 %v4141_v36 }
 0xd24   :  { %v4117_v8 = vpop.f32.mrf.mxu3 }
 0xd2c   :  { %v4119_v28 = vpop.f32.mrf.mxu3 }
 0xd2d   :  { %v4126_v53 = vadd.f32 %v4119_v28, %v7829_v13 }
 0xd2f   :  { %v4134_v14 = vadd.f32 %v5363_v4, %v4126_v53 }
 0xd31   :  { %v4144_v0 = vsel %vm2360_vm4, %v4134_v14, 0.0 }
 0xd32   :  { %4145 = vadd.xlane.f32.xlu0 %v4144_v0 }
 0xd34   :  { %v4121_v40 = vpop.f32.mrf.mxu3 }
 0xd35   :  { %v4127_v16 = vadd.f32 %v4121_v40, %v7838_v12 }
 0xd37   :  { %v4135_v61 = vadd.f32 %v5363_v4, %v4127_v16 }
 0xd39   :  { %v4147_v49 = vsel %vm2360_vm4, %v4135_v61, 0.0 }
 0xd3a   :  { %4148 = vadd.xlane.f32.xlu2 %v4147_v49 }
 0xd8d   :  { %v4140_v38 = vpop.xlane.xlu2 %4139 }
 0xd8e   :  { %v4150_v27 = vmul.f32 %v4140_v38, %v7033_v47 }
 0xd90   :  { %v4154_v55 = vsub.f32 %v4132_v37, %v4150_v27 }
 0xd92   :  { %v4158_v7 = vmul.f32 %v4154_v55, %v4154_v55 }
 0xd94   :  { %v4162_v18 = vsel %vm2360_vm4, %v4158_v7, 0.0 }
 0xd95   :  { %v4143_v45 = vpop.xlane.xlu1 %4142  ;;  %4163 = vadd.xlane.f32.xlu1 %v4162_v18 }
 0xd96   :  { %v4151_v13 = vmul.f32 %v4143_v45, %v7033_v47 }
 0xd98   :  { %v7946_v19 = vsub.f32 %v4133_v54, %v4151_v13 }
 0xd9a   :  { %v4159_v12 = vmul.f32 %v7946_v19, %v7946_v19 }
 0xd9c   :  { %v4165_v62 = vsel %vm2360_vm4, %v4159_v12, 0.0 }
 0xd9d   :  { %4166 = vadd.xlane.f32.xlu0 %v4165_v62 }
 0xda5   :  { %v4146_v6 = vpop.xlane.xlu0 %4145 }
 0xda6   :  { %v4152_v21 = vmul.f32 %v4146_v6, %v7033_v47 }
 0xda8   :  { %v7962_v32 = vsub.f32 %v4134_v14, %v4152_v21 }
 0xdaa   :  { %v4160_v31 = vmul.f32 %v7962_v32, %v7962_v32 }
 0xdac   :  { %v4168_v48 = vsel %vm2360_vm4, %v4160_v31, 0.0  ;;  %v5304_v31 = vld [vmem:[%s4419_s1 + $0x30] sm:$0xff] }
 0xdad   :  { %4169 = vadd.xlane.f32.xlu2 %v4168_v48  ;;  %v4149_v33 = vpop.xlane.xlu2 %4148  ;;  %v5303_v48 = vld [vmem:[%s4419_s1 + $0x28] sm:$0xff] }
 0xdae   :  { %v4153_v44 = vmul.f32 %v4149_v33, %v7033_v47  ;;  %v5302_v33 = vld [vmem:[%s4419_s1 + $0x20] sm:$0xff] }
 0xdb0   :  { %v7968_v23 = vsub.f32 %v4135_v61, %v4153_v44 }
 0xdb2   :  { %v4161_v42 = vmul.f32 %v7968_v23, %v7968_v23 }
 0xdb4   :  { %v4171_v39 = vsel %vm2360_vm4, %v4161_v42, 0.0  ;;  %v5300_v42 = vld [vmem:[%s4419_s1 + $0x10] sm:$0xff] }
 0xdb5   :  { %4172 = vadd.xlane.f32.xlu1 %v4171_v39 }
 0xe08   :  { %v4164_v20 = vpop.xlane.xlu1 %4163 }
 0xe09   :  { %v4174_v10 = vmul.f32 %v4164_v20, %v7033_v47  ;;  %v5299_v20 = vld [vmem:[%s4419_s1 + $0x8] sm:$0xff] }
 0xe0b   :  { %v4178_v34 = vadd.f32 1e-05, %v4174_v10  ;;  %v5298_v10 = vld [vmem:[%s4419_s1] sm:$0xff] }
 0xe0d   :  { %5645 = vrsqrt.f32 %v4178_v34  ;;  %vm4188_vm4 = vweird.f32 %v4178_v34 }
 0xe10   :  { %v4167_v15 = vpop.xlane.xlu0 %4166 }
 0xe11   :  { %v4175_v29 = vmul.f32 %v4167_v15, %v7033_v47 }
 0xe13   :  { %v5646_v5 = vpop.eup %5645  ;;  %v4179_v26 = vadd.f32 1e-05, %v4175_v29 }
 0xe14   :  { %v4183_v57 = vmul.f32 %v5646_v5, %v4178_v34  ;;  %vm4189_vm12 = vweird.f32 %v5646_v5 }
 0xe15   :  { %5647 = vrsqrt.f32 %v4179_v26  ;;  %vm4190_vm13 = vmor %vm4188_vm4, %vm4189_vm12  ;;  %vm4198_vm1 = vweird.f32 %v4179_v26  ;;  %vm4251_vm12 = vcmask 780802   ;;  %vm4256_vm4 = vcmask 1044227  }
 0xe16   :  { %v4184_v50 = vmul.f32 %v5646_v5, %v4183_v57 }
 0xe18   :  { %v4185_v17 = vmul.f32 0.5, %v4184_v50 }
 0xe1a   :  { %v4186_v51 = vsub.f32 1.5, %v4185_v17 }
 0xe1b   :  { %v5648_v1 = vpop.eup %5647 }
 0xe1c   :  { %v4187_v56 = vmul.f32 %v5646_v5, %v4186_v51  ;;  %v4193_v9 = vmul.f32 %v5648_v1, %v4179_v26  ;;  %vm4199_vm14 = vweird.f32 %v5648_v1 }
 0xe1d   :  { %vm4200_vm2 = vmor %vm4198_vm1, %vm4199_vm14  ;;  %vm4274_vm14 = vcmask 1048327  }
 0xe1e   :  { %v4191_v3 = vsel %vm4190_vm13, %v5646_v5, %v4187_v56  ;;  %v4194_v43 = vmul.f32 %v5648_v1, %v4193_v9  ;;  %vm4269_vm13 = vcmask 784902   ;;  %v5366_v56 = vld [vmem:[%s7998_s27] ss:$0 sm:$0xff] }
 0xe1f   :  { %v4222_v2 = vmul.f32 %v4191_v3, %v4154_v55 }
 0xe20   :  { %v4195_v58 = vmul.f32 0.5, %v4194_v43  ;;  %v4170_v52 = vpop.xlane.xlu2 %4169 }
 0xe21   :  { %v4176_v46 = vmul.f32 %v4170_v52, %v7033_v47  ;;  %v4229_v59 = vmul.f32 %v5364_v63, %v4222_v2 }
 0xe22   :  { %v4196_v35 = vsub.f32 1.5, %v4195_v58 }
 0xe23   :  { %v4180_v25 = vadd.f32 1e-05, %v4176_v46  ;;  %v4236_v4 = vadd.f32 %v5365_v60, %v4229_v59 }
 0xe24   :  { %v4197_v24 = vmul.f32 %v5648_v1, %v4196_v35 }
 0xe25   :  { %5649 = vrsqrt.f32 %v4180_v25  ;;  %4248 = vrot.lane.b32.xlu2 %v4236_v4, %s5707_s6  ;;  %4243 = vrot.lane.b32.xlu0 %v4236_v4, %s5719_s22  ;;  %4241 = vst.msk [vmem:[#allocation3] sm:$0x1] %vm4240_vm15, %v4236_v4  ;;  %vm4208_vm6 = vweird.f32 %v4180_v25 }
 0xe26   :  { %v4201_v41 = vsel %vm4200_vm2, %v5648_v1, %v4197_v24 }
 0xe27   :  { %v4223_v37 = vmul.f32 %v4201_v41, %v7946_v19 }
 0xe28   :  { %v4173_v11 = vpop.xlane.xlu1 %4172 }
 0xe29   :  { %v4177_v30 = vmul.f32 %v4173_v11, %v7033_v47  ;;  %v4230_v22 = vmul.f32 %v5364_v63, %v4223_v37 }
 0xe2b   :  { %v5650_v54 = vpop.eup %5649  ;;  %v4181_v36 = vadd.f32 1e-05, %v4177_v30  ;;  %v4237_v8 = vadd.f32 %v5365_v60, %v4230_v22 }
 0xe2c   :  { %v4203_v28 = vmul.f32 %v5650_v54, %v4180_v25  ;;  %vm4209_vm5 = vweird.f32 %v5650_v54 }
 0xe2d   :  { %5651 = vrsqrt.f32 %v4181_v36  ;;  %4261 = vrot.lane.b32.xlu2 %v4237_v8, %s5719_s22  ;;  %4253 = vrot.lane.b32.xlu0 %v4236_v4, %s5720_s23  ;;  %4259 = vst.msk [vmem:[#allocation3 - $0x3] sm:$0x10] %vm4258_vm3, %v4237_v8  ;;  %vm4210_vm7 = vmor %vm4208_vm6, %vm4209_vm5  ;;  %vm4218_vm9 = vweird.f32 %v4181_v36 }
 0xe2e   :  { %v4204_v53 = vmul.f32 %v5650_v54, %v4203_v28 }
 0xe30   :  { %v4205_v14 = vmul.f32 0.5, %v4204_v53 }
 0xe32   :  { %v4206_v0 = vsub.f32 1.5, %v4205_v14 }
 0xe33   :  { %v5652_v40 = vpop.eup %5651 }
 0xe34   :  { %v4207_v47 = vmul.f32 %v5650_v54, %v4206_v0  ;;  %v4213_v16 = vmul.f32 %v5652_v40, %v4181_v36  ;;  %vm4219_vm8 = vweird.f32 %v5652_v40 }
 0xe35   :  { %4266 = vrot.lane.b32.xlu0 %v4237_v8, %s5707_s6  ;;  %vm4220_vm0 = vmor %vm4218_vm9, %vm4219_vm8 }
 0xe36   :  { %v4211_v61 = vsel %vm4210_vm7, %v5650_v54, %v4207_v47  ;;  %v4214_v49 = vmul.f32 %v5652_v40, %v4213_v16 }
 0xe37   :  { %v4224_v38 = vmul.f32 %v4211_v61, %v7962_v32  ;;  %v5305_v32 = vld [vmem:[%s4419_s1 + $0x38] sm:$0xff] }
 0xe38   :  { %v4215_v27 = vmul.f32 0.5, %v4214_v49  ;;  %4374 = vmatpush.bf16.msrb.mxu1 %v5305_v32 }
 0xe39   :  { %v4231_v55 = vmul.f32 %v5364_v63, %v4224_v38 }
 0xe3a   :  { %v4216_v7 = vsub.f32 1.5, %v4215_v27 }
 0xe3b   :  { %v4238_v18 = vadd.f32 %v5365_v60, %v4231_v55 }
 0xe3c   :  { %v4217_v45 = vmul.f32 %v5652_v40, %v4216_v7  ;;  %4375 = vmatpush.bf16.msrb.mxu1 %v5304_v31 }
 0xe3d   :  { %4278 = vrot.lane.b32.xlu1 %v4238_v18, %s5719_s22  ;;  %4276 = vst.msk [vmem:[#allocation3 + $0x2] sm:$0x1] %vm4240_vm15, %v4238_v18  ;;  %vm4387_vm15 = vcmask 60416  }
 0xe3e   :  { %v4221_v13 = vsel %vm4220_vm0, %v5652_v40, %v4217_v45 }
 0xe3f   :  { %v4225_v19 = vmul.f32 %v4221_v13, %v7968_v23  ;;  %v5301_v23 = vld [vmem:[%s4419_s1 + $0x18] sm:$0xff] }
 0xe40   :  { %4376 = vmatpush.bf16.msrb.mxu1 %v5303_v48 }
 0xe41   :  { %v4232_v12 = vmul.f32 %v5364_v63, %v4225_v19 }
 0xe43   :  { %v4239_v62 = vadd.f32 %v5365_v60, %v4232_v12 }
 0xe44   :  { %4377 = vmatpush.bf16.msrb.mxu1 %v5302_v33 }
 0xe45   :  { %4296 = vrot.lane.b32.xlu2 %v4239_v62, %s5707_s6  ;;  %4292 = vrot.lane.b32.xlu0 %v4239_v62, %s5719_s22  ;;  %4290 = vst.msk [vmem:[#allocation3 - $0x1] sm:$0x10] %vm4258_vm3, %v4239_v62 }
 0xe46   :  { %4282 = vrot.lane.b32.xlu1 %v4238_v18, %s5707_s6  ;;  %s5723_s6 = smov 29  }
 0xe47   :  { %s4421_s4 = sld [smem:[%s8018_s0 + %s5723_s6]]  }
 0xe48   :  { %4378 = vmatpush.bf16.msrb.mxu1 %v5301_v23 }
 0xe4c   :  { %4379 = vmatpush.bf16.msrb.mxu1 %v5300_v42 }
 0xe4d   :  { %4300 = vrot.lane.b32.xlu0 %v4239_v62, %s5720_s23  ;;  %4286 = vrot.lane.b32.xlu2 %v4238_v18, %s5720_s23 }
 0xe4e   :  { %4271 = vrot.lane.b32.xlu1 %v4237_v8, %s5720_s23 }
 0xe50   :  { %4380 = vmatpush.bf16.msrb.mxu1 %v5299_v20 }
 0xe54   :  { %4381 = vmatpush.bf16.msrb.mxu1 %v5298_v10 }
 0xe7f   :  { %v4249_v6 = vpop.permute.xlu2 %4248 }
 0xe87   :  { %v4262_v21 = vpop.permute.xlu2 %4261 }
 0xe88   :  { %4265 = vst.msk [vmem:[#allocation3 - $0x4] sm:$0x20] %vm4264_vm10, %v4262_v21 }
 0xe97   :  { %v4244_v44 = vpop.permute.xlu0 %4243 }
 0xe98   :  { %4247 = vst.msk [vmem:[#allocation3 - $0x1] sm:$0x2] %vm4246_vm11, %v4244_v44 }
 0xe99   :  { %4252 = vst.msk [vmem:[#allocation3 - $0x2] sm:$0x4] %vm4251_vm12, %v4249_v6 }
 0xe9f   :  { %v4254_v39 = vpop.permute.xlu0 %4253  ;;  %v4297_v29 = vpop.permute.xlu2 %4296 }
 0xea0   :  { %4257 = vst.msk [vmem:[#allocation3 - $0x3] sm:$0x8] %vm4256_vm4, %v4254_v39 }
 0xea7   :  { %v4267_v34 = vpop.permute.xlu0 %4266  ;;  %v4287_v57 = vpop.permute.xlu2 %4286 }
 0xea8   :  { %4270 = vst.msk [vmem:[#allocation3 - $0x5] sm:$0x40] %vm4269_vm13, %v4267_v34 }
 0xeaf   :  { %v4279_v15 = vpop.permute.xlu1 %4278 }
 0xeb0   :  { %4281 = vst.msk [vmem:[#allocation3 + $0x1] sm:$0x2] %vm4246_vm11, %v4279_v15 }
 0xeb7   :  { %v4293_v5 = vpop.permute.xlu0 %4292 }
 0xeb8   :  { %4295 = vst.msk [vmem:[#allocation3 - $0x2] sm:$0x20] %vm4264_vm10, %v4293_v5  ;;  %v4283_v26 = vpop.permute.xlu1 %4282 }
 0xeb9   :  { %4299 = vst.msk [vmem:[#allocation3 - $0x3] sm:$0x40] %vm4269_vm13, %v4297_v29 }
 0xeba   :  { %4285 = vst.msk [vmem:[#allocation3] sm:$0x4] %vm4251_vm12, %v4283_v26 }
 0xebb   :  { %4289 = vst.msk [vmem:[#allocation3 - $0x1] sm:$0x8] %vm4256_vm4, %v4287_v57 }
 0xebf   :  { %v4301_v50 = vpop.permute.xlu0 %4300 }
 0xec0   :  { %4303 = vst.msk [vmem:[#allocation3 - $0x4] sm:$0x80] %vm4274_vm14, %v4301_v50  ;;  %v4272_v17 = vpop.permute.xlu1 %4271 }
 0xec1   :  { %4275 = vst.msk [vmem:[#allocation3 - $0x6] sm:$0x80] %vm4274_vm14, %v4272_v17 }
 0xec8   :  { %v4304_v51 = vld [vmem:[#allocation3] sm:$0xf] }
 0xec9   :  { %v4305_v1 = vpack.c.bf16 %v4304_v51, %v4304_v51 }
 0xecb   :  { %4382 = vmatmul.bf16.vlgmr.msrb.gmra.mxu1 %v4305_v1 }
 0xf48   :  { %v4383_v9 = vpop.f32.mrf.mxu1 }
 0xf49   :  { %v4384_v63 = vadd.f32 %v5366_v56, %v4383_v9 }
 0xf4b   :  { %4388 = vst.msk [vmem:[%s4421_s4] sm:$0xf] %vm4387_vm15, %v4384_v63 }
 0xf50   :  { %v4385_v3 = vpop.f32.mrf.mxu1 }

</bundles_post_ra>
